<compile_context>
chip_gen: v7x
topology: tpu7x:2x2x1
jax: 0.10.0
libtpu: 0.0.40
codegen_flags: <defaults>
</compile_context>

<pallas_src>
import jax
import jax.numpy as jnp
from jax import lax
from jax.experimental import pallas as pl
from jax.experimental.pallas import tpu as pltpu

_LANES = 128


def _resblock_kernel(x_ref, s1_ref, b1_ref, w1_ref, s2_ref, b2_ref, w2_ref,
                     o_ref, pad_ref):
    """Processes one (NB, H, W, Cp) block (Cp = channels padded to 128 lanes).

    x_ref  : (NB, H, W, Cp)   f32 input tile (NHWC, lane-dense channels)
    s*/b*  : (1, Cp)          f32 folded BN scale / shift
    w*_ref : (9, Cp, Cp)      bf16 3x3 conv taps, tap index = dy*3 + dx
    o_ref  : (NB, H, W, Cp)   output tile
    pad_ref: VMEM (NB, H+2, W+2, Cp) f32 shared zero-padded activation buffer
    """
    NB, H, W, Cp = x_ref.shape
    M = NB * H * W

    # Zero once: only the 1-pixel border must be zero; the interior is fully
    # overwritten before each conv, so a single fill serves both convs.
    pad_ref[...] = jnp.zeros_like(pad_ref)

    def conv3x3(w_ref):
        # 9 shifted full-image matmuls, bf16 operands, f32 accumulation.
        acc = jnp.zeros((M, Cp), jnp.float32)
        for dy in range(3):
            for dx in range(3):
                lhs = pad_ref[:, dy:dy + H, dx:dx + W, :].reshape(M, Cp)
                acc = acc + jnp.dot(lhs.astype(jnp.bfloat16),
                                    w_ref[dy * 3 + dx],
                                    preferred_element_type=jnp.float32)
        return acc

    # --- BN1 + ReLU (pre-activation), conv1 ---
    a = jnp.maximum(x_ref[...] * s1_ref[...] + b1_ref[...], 0.0)
    pad_ref[:, 1:H + 1, 1:W + 1, :] = a
    t = conv3x3(w1_ref)                               # (M, Cp) f32

    # --- BN2 + ReLU, conv2 ---
    b = jnp.maximum(t * s2_ref[...] + b2_ref[...], 0.0)
    pad_ref[:, 1:H + 1, 1:W + 1, :] = b.reshape(NB, H, W, Cp)
    u = conv3x3(w2_ref)

    # --- residual add (identity shortcut: stride 1, in_planes == planes) ---
    o_ref[...] = (u.reshape(NB, H, W, Cp) + x_ref[...]).astype(o_ref.dtype)


def _pad_last(arr, cp):
    c = arr.shape[-1]
    if c == cp:
        return arr
    pad = [(0, 0)] * (arr.ndim - 1) + [(0, cp - c)]
    return jnp.pad(arr, pad)


def resblock_forward(x_nhwc, scale1, shift1, w1_hwio, scale2, shift2, w2_hwio):
    N, H, W, C = x_nhwc.shape
    Cout = w1_hwio.shape[-1]
    assert C == Cout, "identity-shortcut config requires in_planes == planes"

    Cp = max(_LANES, -(-C // _LANES) * _LANES)   # channels padded to lane width

    # Lane-dense channel padding with zeros: padded channels of activations,
    # BN scale/shift and weights are all zero, so they stay zero through both
    # convs and the residual add; slicing at the end recovers exact results.
    xp = _pad_last(x_nhwc.astype(jnp.float32), Cp)
    s1 = _pad_last(scale1.reshape(1, C).astype(jnp.float32), Cp)
    b1 = _pad_last(shift1.reshape(1, C).astype(jnp.float32), Cp)
    s2 = _pad_last(scale2.reshape(1, C).astype(jnp.float32), Cp)
    b2 = _pad_last(shift2.reshape(1, C).astype(jnp.float32), Cp)

    def prep_w(w):  # HWIO (3,3,C,C) -> (9, Cp, Cp) bf16, tap index = dy*3+dx
        wp = jnp.pad(w.astype(jnp.float32),
                     ((0, 0), (0, 0), (0, Cp - C), (0, Cp - C)))
        return wp.reshape(9, Cp, Cp).astype(jnp.bfloat16)

    w1k = prep_w(w1_hwio)
    w2k = prep_w(w2_hwio)

    # Two "parallel" grid steps over batch halves keep both v7x TensorCores
    # busy; on v5e/v6e this is just a 2-iteration loop.
    G = 2 if (N >= 2 and N % 2 == 0) else 1
    NB = N // G

    out = pl.pallas_call(
        _resblock_kernel,
        out_shape=jax.ShapeDtypeStruct((N, H, W, Cp), x_nhwc.dtype),
        grid_spec=pltpu.PrefetchScalarGridSpec(
            num_scalar_prefetch=0,
            grid=(G,),
            in_specs=[
                pl.BlockSpec((NB, H, W, Cp), lambda n: (n, 0, 0, 0)),
                pl.BlockSpec((1, Cp), lambda n: (0, 0)),
                pl.BlockSpec((1, Cp), lambda n: (0, 0)),
                # constant index maps -> params stay resident across steps
                pl.BlockSpec((9, Cp, Cp), lambda n: (0, 0, 0)),
                pl.BlockSpec((1, Cp), lambda n: (0, 0)),
                pl.BlockSpec((1, Cp), lambda n: (0, 0)),
                pl.BlockSpec((9, Cp, Cp), lambda n: (0, 0, 0)),
            ],
            out_specs=pl.BlockSpec((NB, H, W, Cp), lambda n: (n, 0, 0, 0)),
            scratch_shapes=[
                pltpu.VMEM((NB, H + 2, W + 2, Cp), jnp.float32),
            ],
        ),
        compiler_params=pltpu.CompilerParams(
            dimension_semantics=("parallel",),
            # ~2 MiB working set at these shapes; explicit limit keeps the
            # kernel portable to v7x's smaller (64 MiB physical) VMEM.
            vmem_limit_bytes=32 * 1024 * 1024,
        ),
    )(xp, s1, b1, w1k, s2, b2, w2k)

    return out[..., :C]


if __name__ == "__main__":
    key = jax.random.PRNGKey(0)
    ks = jax.random.split(key, 10)

    # in_planes = planes = 4, stride = 1 -> identity shortcut
    N, C, H, W = 2, 4, 16, 16
    eps = 1e-5

    x_nchw = jax.random.normal(ks[0], (N, C, H, W), jnp.float32)   # PyTorch NCHW
    x = jnp.transpose(x_nchw, (0, 2, 3, 1))                        # -> NHWC

    # BatchNorm2d parameters (deterministic synthetic values, eval-mode stats)
    gamma1 = 1.0 + 0.1 * jax.random.normal(ks[1], (C,), jnp.float32)
    beta1 = 0.1 * jax.random.normal(ks[2], (C,), jnp.float32)
    mean1 = 0.1 * jax.random.normal(ks[3], (C,), jnp.float32)
    var1 = jax.random.uniform(ks[4], (C,), jnp.float32, 0.5, 1.5)

    gamma2 = 1.0 + 0.1 * jax.random.normal(ks[5], (C,), jnp.float32)
    beta2 = 0.1 * jax.random.normal(ks[6], (C,), jnp.float32)
    mean2 = 0.1 * jax.random.normal(ks[7], (C,), jnp.float32)
    var2 = jax.random.uniform(ks[8], (C,), jnp.float32, 0.5, 1.5)

    # 3x3 conv weights in HWIO layout (PyTorch OIHW -> HWIO)
    w1 = 0.2 * jax.random.normal(ks[9], (3, 3, C, C), jnp.float32)
    w2 = 0.2 * jax.random.normal(jax.random.PRNGKey(1), (3, 3, C, C), jnp.float32)

    # fold BN running stats into per-channel affine (eval mode)
    scale1 = gamma1 / jnp.sqrt(var1 + eps)
    shift1 = beta1 - mean1 * scale1
    scale2 = gamma2 / jnp.sqrt(var2 + eps)
    shift2 = beta2 - mean2 * scale2

    out = resblock_forward(x, scale1, shift1, w1, scale2, shift2, w2)
    out = jax.block_until_ready(out)

    # Plain-JAX reference.  Conv operands are cast to bf16 to mirror the
    # kernel's bf16-input / f32-accumulate MXU matmuls (elementwise math f32).
    dn = ("NHWC", "HWIO", "NHWC")
    a = jnp.maximum(x * scale1 + shift1, 0.0)
    t = lax.conv_general_dilated(a.astype(jnp.bfloat16), w1.astype(jnp.bfloat16),
                                 (1, 1), "SAME", dimension_numbers=dn,
                                 preferred_element_type=jnp.float32)
    b = jnp.maximum(t * scale2 + shift2, 0.0)
    ref = lax.conv_general_dilated(b.astype(jnp.bfloat16), w2.astype(jnp.bfloat16),
                                   (1, 1), "SAME", dimension_numbers=dn,
                                   preferred_element_type=jnp.float32) + x

    assert jnp.allclose(out, ref, atol=2e-2, rtol=2e-2), \
        f"max abs err = {float(jnp.max(jnp.abs(out - ref)))}"
    print("KERNEL_OK")
</pallas_src>

<mosaic_0001>
module attributes {stable_mosaic.version = 11 : i64} {
  func.func @_resblock_kernel(%arg0: i32, %arg1: memref<1x16x16x128xf32, #tpu.memory_space<vmem>>, %arg2: memref<1x128xf32, #tpu.memory_space<vmem>>, %arg3: memref<1x128xf32, #tpu.memory_space<vmem>>, %arg4: memref<9x128x128xbf16, #tpu.memory_space<vmem>>, %arg5: memref<1x128xf32, #tpu.memory_space<vmem>>, %arg6: memref<1x128xf32, #tpu.memory_space<vmem>>, %arg7: memref<9x128x128xbf16, #tpu.memory_space<vmem>>, %arg8: memref<1x16x16x128xf32, #tpu.memory_space<vmem>>, %arg9: memref<1x18x18x128xf32, #tpu.memory_space<vmem>>) attributes {dimension_semantics = [#tpu.dimension_semantics<parallel>], iteration_bounds = array<i64: 2>, scalar_prefetch = 0 : i64, scratch_operands = 1 : i64, tpu.core_type = #tpu.core_type<tc>, window_params = [{transform_indices = @transform_0, window_bounds = array<i64: 1, 16, 16, 128>}, {pipeline_mode = #tpu.pipeline_mode<synchronous>, transform_indices = @transform_1, window_bounds = array<i64: 1, 128>}, {pipeline_mode = #tpu.pipeline_mode<synchronous>, transform_indices = @transform_2, window_bounds = array<i64: 1, 128>}, {pipeline_mode = #tpu.pipeline_mode<synchronous>, transform_indices = @transform_3, window_bounds = array<i64: 9, 128, 128>}, {pipeline_mode = #tpu.pipeline_mode<synchronous>, transform_indices = @transform_4, window_bounds = array<i64: 1, 128>}, {pipeline_mode = #tpu.pipeline_mode<synchronous>, transform_indices = @transform_5, window_bounds = array<i64: 1, 128>}, {pipeline_mode = #tpu.pipeline_mode<synchronous>, transform_indices = @transform_6, window_bounds = array<i64: 9, 128, 128>}, {transform_indices = @transform_7, window_bounds = array<i64: 1, 16, 16, 128>}]} {
    %cst = arith.constant 0.000000e+00 : f32
    %0 = vector.broadcast %cst : f32 to vector<1x18x18x128xf32>
    %c0 = arith.constant 0 : index
    %c0_0 = arith.constant 0 : index
    %c0_1 = arith.constant 0 : index
    %c0_2 = arith.constant 0 : index
    %1 = vector.load %arg9[%c0, %c0_0, %c0_1, %c0_2] : memref<1x18x18x128xf32, #tpu.memory_space<vmem>>, vector<1x18x18x128xf32>
    tpu.vector_store %arg9[%c0, %c0_0, %c0_1, %c0_2], %0 {strides = array<i32>} : memref<1x18x18x128xf32, #tpu.memory_space<vmem>>, vector<1x18x18x128xf32>,
    %c0_3 = arith.constant 0 : index
    %c0_4 = arith.constant 0 : index
    %c0_5 = arith.constant 0 : index
    %c0_6 = arith.constant 0 : index
    %2 = vector.load %arg1[%c0_3, %c0_4, %c0_5, %c0_6] : memref<1x16x16x128xf32, #tpu.memory_space<vmem>>, vector<1x16x16x128xf32>
    %c0_7 = arith.constant 0 : index
    %c0_8 = arith.constant 0 : index
    %3 = vector.load %arg2[%c0_7, %c0_8] : memref<1x128xf32, #tpu.memory_space<vmem>>, vector<1x128xf32>
    %4 = vector.shape_cast %3 : vector<1x128xf32> to vector<1x1x1x128xf32>
    %5 = vector.broadcast %4 : vector<1x1x1x128xf32> to vector<1x16x16x128xf32>
    %6 = arith.mulf %2, %5 : vector<1x16x16x128xf32>
    %c0_9 = arith.constant 0 : index
    %c0_10 = arith.constant 0 : index
    %7 = vector.load %arg3[%c0_9, %c0_10] : memref<1x128xf32, #tpu.memory_space<vmem>>, vector<1x128xf32>
    %8 = vector.shape_cast %7 : vector<1x128xf32> to vector<1x1x1x128xf32>
    %9 = vector.broadcast %8 : vector<1x1x1x128xf32> to vector<1x16x16x128xf32>
    %10 = arith.addf %6, %9 : vector<1x16x16x128xf32>
    %cst_11 = arith.constant 0.000000e+00 : f32
    %11 = vector.broadcast %cst_11 : f32 to vector<1x16x16x128xf32>
    %12 = arith.maximumf %10, %11 : vector<1x16x16x128xf32>
    %c0_12 = arith.constant 0 : index
    %c1 = arith.constant 1 : index
    %c1_13 = arith.constant 1 : index
    %c0_14 = arith.constant 0 : index
    %13 = vector.load %arg9[%c0_12, %c1, %c1_13, %c0_14] : memref<1x18x18x128xf32, #tpu.memory_space<vmem>>, vector<1x16x16x128xf32>
    tpu.vector_store %arg9[%c0_12, %c1, %c1_13, %c0_14], %12 {strides = array<i32>} : memref<1x18x18x128xf32, #tpu.memory_space<vmem>>, vector<1x16x16x128xf32>,
    %cst_15 = arith.constant 0.000000e+00 : f32
    %14 = vector.broadcast %cst_15 : f32 to vector<256x128xf32>
    %c0_16 = arith.constant 0 : index
    %c0_17 = arith.constant 0 : index
    %c0_18 = arith.constant 0 : index
    %c0_19 = arith.constant 0 : index
    %15 = vector.load %arg9[%c0_16, %c0_17, %c0_18, %c0_19] : memref<1x18x18x128xf32, #tpu.memory_space<vmem>>, vector<1x16x16x128xf32>
    %16 = vector.shape_cast %15 : vector<1x16x16x128xf32> to vector<256x128xf32>
    %17 = arith.truncf %16 : vector<256x128xf32> to vector<256x128xbf16>
    %c0_20 = arith.constant 0 : index
    %c0_21 = arith.constant 0 : index
    %c0_22 = arith.constant 0 : index
    %18 = vector.load %arg4[%c0_20, %c0_21, %c0_22] : memref<9x128x128xbf16, #tpu.memory_space<vmem>>, vector<1x128x128xbf16>
    %19 = vector.shape_cast %18 : vector<1x128x128xbf16> to vector<128x128xbf16>
    %cst_23 = arith.constant dense<0.000000e+00> : vector<256x128xf32>
    %20 = tpu.matmul %17, %19, %cst_23 {dimension_numbers = #tpu.dot_dimension_numbers<[1], [0], [0], [1], [0, 0, 1, 1], [], []>} : vector<256x128xbf16>, vector<128x128xbf16>, vector<256x128xf32> -> vector<256x128xf32>
    %21 = arith.addf %14, %20 : vector<256x128xf32>
    %c0_24 = arith.constant 0 : index
    %c0_25 = arith.constant 0 : index
    %c1_26 = arith.constant 1 : index
    %c0_27 = arith.constant 0 : index
    %22 = vector.load %arg9[%c0_24, %c0_25, %c1_26, %c0_27] : memref<1x18x18x128xf32, #tpu.memory_space<vmem>>, vector<1x16x16x128xf32>
    %23 = vector.shape_cast %22 : vector<1x16x16x128xf32> to vector<256x128xf32>
    %24 = arith.truncf %23 : vector<256x128xf32> to vector<256x128xbf16>
    %c1_28 = arith.constant 1 : index
    %c0_29 = arith.constant 0 : index
    %c0_30 = arith.constant 0 : index
    %25 = vector.load %arg4[%c1_28, %c0_29, %c0_30] : memref<9x128x128xbf16, #tpu.memory_space<vmem>>, vector<1x128x128xbf16>
    %26 = vector.shape_cast %25 : vector<1x128x128xbf16> to vector<128x128xbf16>
    %cst_31 = arith.constant dense<0.000000e+00> : vector<256x128xf32>
    %27 = tpu.matmul %24, %26, %cst_31 {dimension_numbers = #tpu.dot_dimension_numbers<[1], [0], [0], [1], [0, 0, 1, 1], [], []>} : vector<256x128xbf16>, vector<128x128xbf16>, vector<256x128xf32> -> vector<256x128xf32>
    %28 = arith.addf %21, %27 : vector<256x128xf32>
    %c0_32 = arith.constant 0 : index
    %c0_33 = arith.constant 0 : index
    %c2 = arith.constant 2 : index
    %c0_34 = arith.constant 0 : index
    %29 = vector.load %arg9[%c0_32, %c0_33, %c2, %c0_34] : memref<1x18x18x128xf32, #tpu.memory_space<vmem>>, vector<1x16x16x128xf32>
    %30 = vector.shape_cast %29 : vector<1x16x16x128xf32> to vector<256x128xf32>
    %31 = arith.truncf %30 : vector<256x128xf32> to vector<256x128xbf16>
    %c2_35 = arith.constant 2 : index
    %c0_36 = arith.constant 0 : index
    %c0_37 = arith.constant 0 : index
    %32 = vector.load %arg4[%c2_35, %c0_36, %c0_37] : memref<9x128x128xbf16, #tpu.memory_space<vmem>>, vector<1x128x128xbf16>
    %33 = vector.shape_cast %32 : vector<1x128x128xbf16> to vector<128x128xbf16>
    %cst_38 = arith.constant dense<0.000000e+00> : vector<256x128xf32>
    %34 = tpu.matmul %31, %33, %cst_38 {dimension_numbers = #tpu.dot_dimension_numbers<[1], [0], [0], [1], [0, 0, 1, 1], [], []>} : vector<256x128xbf16>, vector<128x128xbf16>, vector<256x128xf32> -> vector<256x128xf32>
    %35 = arith.addf %28, %34 : vector<256x128xf32>
    %c0_39 = arith.constant 0 : index
    %c1_40 = arith.constant 1 : index
    %c0_41 = arith.constant 0 : index
    %c0_42 = arith.constant 0 : index
    %36 = vector.load %arg9[%c0_39, %c1_40, %c0_41, %c0_42] : memref<1x18x18x128xf32, #tpu.memory_space<vmem>>, vector<1x16x16x128xf32>
    %37 = vector.shape_cast %36 : vector<1x16x16x128xf32> to vector<256x128xf32>
    %38 = arith.truncf %37 : vector<256x128xf32> to vector<256x128xbf16>
    %c3 = arith.constant 3 : index
    %c0_43 = arith.constant 0 : index
    %c0_44 = arith.constant 0 : index
    %39 = vector.load %arg4[%c3, %c0_43, %c0_44] : memref<9x128x128xbf16, #tpu.memory_space<vmem>>, vector<1x128x128xbf16>
    %40 = vector.shape_cast %39 : vector<1x128x128xbf16> to vector<128x128xbf16>
    %cst_45 = arith.constant dense<0.000000e+00> : vector<256x128xf32>
    %41 = tpu.matmul %38, %40, %cst_45 {dimension_numbers = #tpu.dot_dimension_numbers<[1], [0], [0], [1], [0, 0, 1, 1], [], []>} : vector<256x128xbf16>, vector<128x128xbf16>, vector<256x128xf32> -> vector<256x128xf32>
    %42 = arith.addf %35, %41 : vector<256x128xf32>
    %c0_46 = arith.constant 0 : index
    %c1_47 = arith.constant 1 : index
    %c1_48 = arith.constant 1 : index
    %c0_49 = arith.constant 0 : index
    %43 = vector.load %arg9[%c0_46, %c1_47, %c1_48, %c0_49] : memref<1x18x18x128xf32, #tpu.memory_space<vmem>>, vector<1x16x16x128xf32>
    %44 = vector.shape_cast %43 : vector<1x16x16x128xf32> to vector<256x128xf32>
    %45 = arith.truncf %44 : vector<256x128xf32> to vector<256x128xbf16>
    %c4 = arith.constant 4 : index
    %c0_50 = arith.constant 0 : index
    %c0_51 = arith.constant 0 : index
    %46 = vector.load %arg4[%c4, %c0_50, %c0_51] : memref<9x128x128xbf16, #tpu.memory_space<vmem>>, vector<1x128x128xbf16>
    %47 = vector.shape_cast %46 : vector<1x128x128xbf16> to vector<128x128xbf16>
    %cst_52 = arith.constant dense<0.000000e+00> : vector<256x128xf32>
    %48 = tpu.matmul %45, %47, %cst_52 {dimension_numbers = #tpu.dot_dimension_numbers<[1], [0], [0], [1], [0, 0, 1, 1], [], []>} : vector<256x128xbf16>, vector<128x128xbf16>, vector<256x128xf32> -> vector<256x128xf32>
    %49 = arith.addf %42, %48 : vector<256x128xf32>
    %c0_53 = arith.constant 0 : index
    %c1_54 = arith.constant 1 : index
    %c2_55 = arith.constant 2 : index
    %c0_56 = arith.constant 0 : index
    %50 = vector.load %arg9[%c0_53, %c1_54, %c2_55, %c0_56] : memref<1x18x18x128xf32, #tpu.memory_space<vmem>>, vector<1x16x16x128xf32>
    %51 = vector.shape_cast %50 : vector<1x16x16x128xf32> to vector<256x128xf32>
    %52 = arith.truncf %51 : vector<256x128xf32> to vector<256x128xbf16>
    %c5 = arith.constant 5 : index
    %c0_57 = arith.constant 0 : index
    %c0_58 = arith.constant 0 : index
    %53 = vector.load %arg4[%c5, %c0_57, %c0_58] : memref<9x128x128xbf16, #tpu.memory_space<vmem>>, vector<1x128x128xbf16>
    %54 = vector.shape_cast %53 : vector<1x128x128xbf16> to vector<128x128xbf16>
    %cst_59 = arith.constant dense<0.000000e+00> : vector<256x128xf32>
    %55 = tpu.matmul %52, %54, %cst_59 {dimension_numbers = #tpu.dot_dimension_numbers<[1], [0], [0], [1], [0, 0, 1, 1], [], []>} : vector<256x128xbf16>, vector<128x128xbf16>, vector<256x128xf32> -> vector<256x128xf32>
    %56 = arith.addf %49, %55 : vector<256x128xf32>
    %c0_60 = arith.constant 0 : index
    %c2_61 = arith.constant 2 : index
    %c0_62 = arith.constant 0 : index
    %c0_63 = arith.constant 0 : index
    %57 = vector.load %arg9[%c0_60, %c2_61, %c0_62, %c0_63] : memref<1x18x18x128xf32, #tpu.memory_space<vmem>>, vector<1x16x16x128xf32>
    %58 = vector.shape_cast %57 : vector<1x16x16x128xf32> to vector<256x128xf32>
    %59 = arith.truncf %58 : vector<256x128xf32> to vector<256x128xbf16>
    %c6 = arith.constant 6 : index
    %c0_64 = arith.constant 0 : index
    %c0_65 = arith.constant 0 : index
    %60 = vector.load %arg4[%c6, %c0_64, %c0_65] : memref<9x128x128xbf16, #tpu.memory_space<vmem>>, vector<1x128x128xbf16>
    %61 = vector.shape_cast %60 : vector<1x128x128xbf16> to vector<128x128xbf16>
    %cst_66 = arith.constant dense<0.000000e+00> : vector<256x128xf32>
    %62 = tpu.matmul %59, %61, %cst_66 {dimension_numbers = #tpu.dot_dimension_numbers<[1], [0], [0], [1], [0, 0, 1, 1], [], []>} : vector<256x128xbf16>, vector<128x128xbf16>, vector<256x128xf32> -> vector<256x128xf32>
    %63 = arith.addf %56, %62 : vector<256x128xf32>
    %c0_67 = arith.constant 0 : index
    %c2_68 = arith.constant 2 : index
    %c1_69 = arith.constant 1 : index
    %c0_70 = arith.constant 0 : index
    %64 = vector.load %arg9[%c0_67, %c2_68, %c1_69, %c0_70] : memref<1x18x18x128xf32, #tpu.memory_space<vmem>>, vector<1x16x16x128xf32>
    %65 = vector.shape_cast %64 : vector<1x16x16x128xf32> to vector<256x128xf32>
    %66 = arith.truncf %65 : vector<256x128xf32> to vector<256x128xbf16>
    %c7 = arith.constant 7 : index
    %c0_71 = arith.constant 0 : index
    %c0_72 = arith.constant 0 : index
    %67 = vector.load %arg4[%c7, %c0_71, %c0_72] : memref<9x128x128xbf16, #tpu.memory_space<vmem>>, vector<1x128x128xbf16>
    %68 = vector.shape_cast %67 : vector<1x128x128xbf16> to vector<128x128xbf16>
    %cst_73 = arith.constant dense<0.000000e+00> : vector<256x128xf32>
    %69 = tpu.matmul %66, %68, %cst_73 {dimension_numbers = #tpu.dot_dimension_numbers<[1], [0], [0], [1], [0, 0, 1, 1], [], []>} : vector<256x128xbf16>, vector<128x128xbf16>, vector<256x128xf32> -> vector<256x128xf32>
    %70 = arith.addf %63, %69 : vector<256x128xf32>
    %c0_74 = arith.constant 0 : index
    %c2_75 = arith.constant 2 : index
    %c2_76 = arith.constant 2 : index
    %c0_77 = arith.constant 0 : index
    %71 = vector.load %arg9[%c0_74, %c2_75, %c2_76, %c0_77] : memref<1x18x18x128xf32, #tpu.memory_space<vmem>>, vector<1x16x16x128xf32>
    %72 = vector.shape_cast %71 : vector<1x16x16x128xf32> to vector<256x128xf32>
    %73 = arith.truncf %72 : vector<256x128xf32> to vector<256x128xbf16>
    %c8 = arith.constant 8 : index
    %c0_78 = arith.constant 0 : index
    %c0_79 = arith.constant 0 : index
    %74 = vector.load %arg4[%c8, %c0_78, %c0_79] : memref<9x128x128xbf16, #tpu.memory_space<vmem>>, vector<1x128x128xbf16>
    %75 = vector.shape_cast %74 : vector<1x128x128xbf16> to vector<128x128xbf16>
    %cst_80 = arith.constant dense<0.000000e+00> : vector<256x128xf32>
    %76 = tpu.matmul %73, %75, %cst_80 {dimension_numbers = #tpu.dot_dimension_numbers<[1], [0], [0], [1], [0, 0, 1, 1], [], []>} : vector<256x128xbf16>, vector<128x128xbf16>, vector<256x128xf32> -> vector<256x128xf32>
    %77 = arith.addf %70, %76 : vector<256x128xf32>
    %c0_81 = arith.constant 0 : index
    %c0_82 = arith.constant 0 : index
    %78 = vector.load %arg5[%c0_81, %c0_82] : memref<1x128xf32, #tpu.memory_space<vmem>>, vector<1x128xf32>
    %79 = vector.broadcast %78 : vector<1x128xf32> to vector<256x128xf32>
    %80 = arith.mulf %77, %79 : vector<256x128xf32>
    %c0_83 = arith.constant 0 : index
    %c0_84 = arith.constant 0 : index
    %81 = vector.load %arg6[%c0_83, %c0_84] : memref<1x128xf32, #tpu.memory_space<vmem>>, vector<1x128xf32>
    %82 = vector.broadcast %81 : vector<1x128xf32> to vector<256x128xf32>
    %83 = arith.addf %80, %82 : vector<256x128xf32>
    %cst_85 = arith.constant 0.000000e+00 : f32
    %84 = vector.broadcast %cst_85 : f32 to vector<256x128xf32>
    %85 = arith.maximumf %83, %84 : vector<256x128xf32>
    %86 = vector.shape_cast %85 : vector<256x128xf32> to vector<1x16x16x128xf32>
    %c0_86 = arith.constant 0 : index
    %c1_87 = arith.constant 1 : index
    %c1_88 = arith.constant 1 : index
    %c0_89 = arith.constant 0 : index
    %87 = vector.load %arg9[%c0_86, %c1_87, %c1_88, %c0_89] : memref<1x18x18x128xf32, #tpu.memory_space<vmem>>, vector<1x16x16x128xf32>
    tpu.vector_store %arg9[%c0_86, %c1_87, %c1_88, %c0_89], %86 {strides = array<i32>} : memref<1x18x18x128xf32, #tpu.memory_space<vmem>>, vector<1x16x16x128xf32>,
    %cst_90 = arith.constant 0.000000e+00 : f32
    %88 = vector.broadcast %cst_90 : f32 to vector<256x128xf32>
    %c0_91 = arith.constant 0 : index
    %c0_92 = arith.constant 0 : index
    %c0_93 = arith.constant 0 : index
    %c0_94 = arith.constant 0 : index
    %89 = vector.load %arg9[%c0_91, %c0_92, %c0_93, %c0_94] : memref<1x18x18x128xf32, #tpu.memory_space<vmem>>, vector<1x16x16x128xf32>
    %90 = vector.shape_cast %89 : vector<1x16x16x128xf32> to vector<256x128xf32>
    %91 = arith.truncf %90 : vector<256x128xf32> to vector<256x128xbf16>
    %c0_95 = arith.constant 0 : index
    %c0_96 = arith.constant 0 : index
    %c0_97 = arith.constant 0 : index
    %92 = vector.load %arg7[%c0_95, %c0_96, %c0_97] : memref<9x128x128xbf16, #tpu.memory_space<vmem>>, vector<1x128x128xbf16>
    %93 = vector.shape_cast %92 : vector<1x128x128xbf16> to vector<128x128xbf16>
    %cst_98 = arith.constant dense<0.000000e+00> : vector<256x128xf32>
    %94 = tpu.matmul %91, %93, %cst_98 {dimension_numbers = #tpu.dot_dimension_numbers<[1], [0], [0], [1], [0, 0, 1, 1], [], []>} : vector<256x128xbf16>, vector<128x128xbf16>, vector<256x128xf32> -> vector<256x128xf32>
    %95 = arith.addf %88, %94 : vector<256x128xf32>
    %c0_99 = arith.constant 0 : index
    %c0_100 = arith.constant 0 : index
    %c1_101 = arith.constant 1 : index
    %c0_102 = arith.constant 0 : index
    %96 = vector.load %arg9[%c0_99, %c0_100, %c1_101, %c0_102] : memref<1x18x18x128xf32, #tpu.memory_space<vmem>>, vector<1x16x16x128xf32>
    %97 = vector.shape_cast %96 : vector<1x16x16x128xf32> to vector<256x128xf32>
    %98 = arith.truncf %97 : vector<256x128xf32> to vector<256x128xbf16>
    %c1_103 = arith.constant 1 : index
    %c0_104 = arith.constant 0 : index
    %c0_105 = arith.constant 0 : index
    %99 = vector.load %arg7[%c1_103, %c0_104, %c0_105] : memref<9x128x128xbf16, #tpu.memory_space<vmem>>, vector<1x128x128xbf16>
    %100 = vector.shape_cast %99 : vector<1x128x128xbf16> to vector<128x128xbf16>
    %cst_106 = arith.constant dense<0.000000e+00> : vector<256x128xf32>
    %101 = tpu.matmul %98, %100, %cst_106 {dimension_numbers = #tpu.dot_dimension_numbers<[1], [0], [0], [1], [0, 0, 1, 1], [], []>} : vector<256x128xbf16>, vector<128x128xbf16>, vector<256x128xf32> -> vector<256x128xf32>
    %102 = arith.addf %95, %101 : vector<256x128xf32>
    %c0_107 = arith.constant 0 : index
    %c0_108 = arith.constant 0 : index
    %c2_109 = arith.constant 2 : index
    %c0_110 = arith.constant 0 : index
    %103 = vector.load %arg9[%c0_107, %c0_108, %c2_109, %c0_110] : memref<1x18x18x128xf32, #tpu.memory_space<vmem>>, vector<1x16x16x128xf32>
    %104 = vector.shape_cast %103 : vector<1x16x16x128xf32> to vector<256x128xf32>
    %105 = arith.truncf %104 : vector<256x128xf32> to vector<256x128xbf16>
    %c2_111 = arith.constant 2 : index
    %c0_112 = arith.constant 0 : index
    %c0_113 = arith.constant 0 : index
    %106 = vector.load %arg7[%c2_111, %c0_112, %c0_113] : memref<9x128x128xbf16, #tpu.memory_space<vmem>>, vector<1x128x128xbf16>
    %107 = vector.shape_cast %106 : vector<1x128x128xbf16> to vector<128x128xbf16>
    %cst_114 = arith.constant dense<0.000000e+00> : vector<256x128xf32>
    %108 = tpu.matmul %105, %107, %cst_114 {dimension_numbers = #tpu.dot_dimension_numbers<[1], [0], [0], [1], [0, 0, 1, 1], [], []>} : vector<256x128xbf16>, vector<128x128xbf16>, vector<256x128xf32> -> vector<256x128xf32>
    %109 = arith.addf %102, %108 : vector<256x128xf32>
    %c0_115 = arith.constant 0 : index
    %c1_116 = arith.constant 1 : index
    %c0_117 = arith.constant 0 : index
    %c0_118 = arith.constant 0 : index
    %110 = vector.load %arg9[%c0_115, %c1_116, %c0_117, %c0_118] : memref<1x18x18x128xf32, #tpu.memory_space<vmem>>, vector<1x16x16x128xf32>
    %111 = vector.shape_cast %110 : vector<1x16x16x128xf32> to vector<256x128xf32>
    %112 = arith.truncf %111 : vector<256x128xf32> to vector<256x128xbf16>
    %c3_119 = arith.constant 3 : index
    %c0_120 = arith.constant 0 : index
    %c0_121 = arith.constant 0 : index
    %113 = vector.load %arg7[%c3_119, %c0_120, %c0_121] : memref<9x128x128xbf16, #tpu.memory_space<vmem>>, vector<1x128x128xbf16>
    %114 = vector.shape_cast %113 : vector<1x128x128xbf16> to vector<128x128xbf16>
    %cst_122 = arith.constant dense<0.000000e+00> : vector<256x128xf32>
    %115 = tpu.matmul %112, %114, %cst_122 {dimension_numbers = #tpu.dot_dimension_numbers<[1], [0], [0], [1], [0, 0, 1, 1], [], []>} : vector<256x128xbf16>, vector<128x128xbf16>, vector<256x128xf32> -> vector<256x128xf32>
    %116 = arith.addf %109, %115 : vector<256x128xf32>
    %c0_123 = arith.constant 0 : index
    %c1_124 = arith.constant 1 : index
    %c1_125 = arith.constant 1 : index
    %c0_126 = arith.constant 0 : index
    %117 = vector.load %arg9[%c0_123, %c1_124, %c1_125, %c0_126] : memref<1x18x18x128xf32, #tpu.memory_space<vmem>>, vector<1x16x16x128xf32>
    %118 = vector.shape_cast %117 : vector<1x16x16x128xf32> to vector<256x128xf32>
    %119 = arith.truncf %118 : vector<256x128xf32> to vector<256x128xbf16>
    %c4_127 = arith.constant 4 : index
    %c0_128 = arith.constant 0 : index
    %c0_129 = arith.constant 0 : index
    %120 = vector.load %arg7[%c4_127, %c0_128, %c0_129] : memref<9x128x128xbf16, #tpu.memory_space<vmem>>, vector<1x128x128xbf16>
    %121 = vector.shape_cast %120 : vector<1x128x128xbf16> to vector<128x128xbf16>
    %cst_130 = arith.constant dense<0.000000e+00> : vector<256x128xf32>
    %122 = tpu.matmul %119, %121, %cst_130 {dimension_numbers = #tpu.dot_dimension_numbers<[1], [0], [0], [1], [0, 0, 1, 1], [], []>} : vector<256x128xbf16>, vector<128x128xbf16>, vector<256x128xf32> -> vector<256x128xf32>
    %123 = arith.addf %116, %122 : vector<256x128xf32>
    %c0_131 = arith.constant 0 : index
    %c1_132 = arith.constant 1 : index
    %c2_133 = arith.constant 2 : index
    %c0_134 = arith.constant 0 : index
    %124 = vector.load %arg9[%c0_131, %c1_132, %c2_133, %c0_134] : memref<1x18x18x128xf32, #tpu.memory_space<vmem>>, vector<1x16x16x128xf32>
    %125 = vector.shape_cast %124 : vector<1x16x16x128xf32> to vector<256x128xf32>
    %126 = arith.truncf %125 : vector<256x128xf32> to vector<256x128xbf16>
    %c5_135 = arith.constant 5 : index
    %c0_136 = arith.constant 0 : index
    %c0_137 = arith.constant 0 : index
    %127 = vector.load %arg7[%c5_135, %c0_136, %c0_137] : memref<9x128x128xbf16, #tpu.memory_space<vmem>>, vector<1x128x128xbf16>
    %128 = vector.shape_cast %127 : vector<1x128x128xbf16> to vector<128x128xbf16>
    %cst_138 = arith.constant dense<0.000000e+00> : vector<256x128xf32>
    %129 = tpu.matmul %126, %128, %cst_138 {dimension_numbers = #tpu.dot_dimension_numbers<[1], [0], [0], [1], [0, 0, 1, 1], [], []>} : vector<256x128xbf16>, vector<128x128xbf16>, vector<256x128xf32> -> vector<256x128xf32>
    %130 = arith.addf %123, %129 : vector<256x128xf32>
    %c0_139 = arith.constant 0 : index
    %c2_140 = arith.constant 2 : index
    %c0_141 = arith.constant 0 : index
    %c0_142 = arith.constant 0 : index
    %131 = vector.load %arg9[%c0_139, %c2_140, %c0_141, %c0_142] : memref<1x18x18x128xf32, #tpu.memory_space<vmem>>, vector<1x16x16x128xf32>
    %132 = vector.shape_cast %131 : vector<1x16x16x128xf32> to vector<256x128xf32>
    %133 = arith.truncf %132 : vector<256x128xf32> to vector<256x128xbf16>
    %c6_143 = arith.constant 6 : index
    %c0_144 = arith.constant 0 : index
    %c0_145 = arith.constant 0 : index
    %134 = vector.load %arg7[%c6_143, %c0_144, %c0_145] : memref<9x128x128xbf16, #tpu.memory_space<vmem>>, vector<1x128x128xbf16>
    %135 = vector.shape_cast %134 : vector<1x128x128xbf16> to vector<128x128xbf16>
    %cst_146 = arith.constant dense<0.000000e+00> : vector<256x128xf32>
    %136 = tpu.matmul %133, %135, %cst_146 {dimension_numbers = #tpu.dot_dimension_numbers<[1], [0], [0], [1], [0, 0, 1, 1], [], []>} : vector<256x128xbf16>, vector<128x128xbf16>, vector<256x128xf32> -> vector<256x128xf32>
    %137 = arith.addf %130, %136 : vector<256x128xf32>
    %c0_147 = arith.constant 0 : index
    %c2_148 = arith.constant 2 : index
    %c1_149 = arith.constant 1 : index
    %c0_150 = arith.constant 0 : index
    %138 = vector.load %arg9[%c0_147, %c2_148, %c1_149, %c0_150] : memref<1x18x18x128xf32, #tpu.memory_space<vmem>>, vector<1x16x16x128xf32>
    %139 = vector.shape_cast %138 : vector<1x16x16x128xf32> to vector<256x128xf32>
    %140 = arith.truncf %139 : vector<256x128xf32> to vector<256x128xbf16>
    %c7_151 = arith.constant 7 : index
    %c0_152 = arith.constant 0 : index
    %c0_153 = arith.constant 0 : index
    %141 = vector.load %arg7[%c7_151, %c0_152, %c0_153] : memref<9x128x128xbf16, #tpu.memory_space<vmem>>, vector<1x128x128xbf16>
    %142 = vector.shape_cast %141 : vector<1x128x128xbf16> to vector<128x128xbf16>
    %cst_154 = arith.constant dense<0.000000e+00> : vector<256x128xf32>
    %143 = tpu.matmul %140, %142, %cst_154 {dimension_numbers = #tpu.dot_dimension_numbers<[1], [0], [0], [1], [0, 0, 1, 1], [], []>} : vector<256x128xbf16>, vector<128x128xbf16>, vector<256x128xf32> -> vector<256x128xf32>
    %144 = arith.addf %137, %143 : vector<256x128xf32>
    %c0_155 = arith.constant 0 : index
    %c2_156 = arith.constant 2 : index
    %c2_157 = arith.constant 2 : index
    %c0_158 = arith.constant 0 : index
    %145 = vector.load %arg9[%c0_155, %c2_156, %c2_157, %c0_158] : memref<1x18x18x128xf32, #tpu.memory_space<vmem>>, vector<1x16x16x128xf32>
    %146 = vector.shape_cast %145 : vector<1x16x16x128xf32> to vector<256x128xf32>
    %147 = arith.truncf %146 : vector<256x128xf32> to vector<256x128xbf16>
    %c8_159 = arith.constant 8 : index
    %c0_160 = arith.constant 0 : index
    %c0_161 = arith.constant 0 : index
    %148 = vector.load %arg7[%c8_159, %c0_160, %c0_161] : memref<9x128x128xbf16, #tpu.memory_space<vmem>>, vector<1x128x128xbf16>
    %149 = vector.shape_cast %148 : vector<1x128x128xbf16> to vector<128x128xbf16>
    %cst_162 = arith.constant dense<0.000000e+00> : vector<256x128xf32>
    %150 = tpu.matmul %147, %149, %cst_162 {dimension_numbers = #tpu.dot_dimension_numbers<[1], [0], [0], [1], [0, 0, 1, 1], [], []>} : vector<256x128xbf16>, vector<128x128xbf16>, vector<256x128xf32> -> vector<256x128xf32>
    %151 = arith.addf %144, %150 : vector<256x128xf32>
    %152 = vector.shape_cast %151 : vector<256x128xf32> to vector<1x16x16x128xf32>
    %c0_163 = arith.constant 0 : index
    %c0_164 = arith.constant 0 : index
    %c0_165 = arith.constant 0 : index
    %c0_166 = arith.constant 0 : index
    %153 = vector.load %arg1[%c0_163, %c0_164, %c0_165, %c0_166] : memref<1x16x16x128xf32, #tpu.memory_space<vmem>>, vector<1x16x16x128xf32>
    %154 = arith.addf %152, %153 : vector<1x16x16x128xf32>
    %c0_167 = arith.constant 0 : index
    %c0_168 = arith.constant 0 : index
    %c0_169 = arith.constant 0 : index
    %c0_170 = arith.constant 0 : index
    %155 = vector.load %arg8[%c0_167, %c0_168, %c0_169, %c0_170] : memref<1x16x16x128xf32, #tpu.memory_space<vmem>>, vector<1x16x16x128xf32>
    tpu.vector_store %arg8[%c0_167, %c0_168, %c0_169, %c0_170], %154 {strides = array<i32>} : memref<1x16x16x128xf32, #tpu.memory_space<vmem>>, vector<1x16x16x128xf32>,
    return
  }
  func.func @transform_0(%arg0: i32) -> (i32, i32, i32, i32) {
    %c0_i32 = arith.constant 0 : i32
    %c0_i32_0 = arith.constant 0 : i32
    %c0_i32_1 = arith.constant 0 : i32
    %c0_i32_2 = arith.constant 0 : i32
    return %arg0, %c0_i32, %c0_i32_0, %c0_i32_1 : i32, i32, i32, i32
  }
  func.func @transform_1(%arg0: i32) -> (i32, i32) {
    %c0_i32 = arith.constant 0 : i32
    %c0_i32_0 = arith.constant 0 : i32
    %c0_i32_1 = arith.constant 0 : i32
    return %c0_i32, %c0_i32_0 : i32, i32
  }
  func.func @transform_2(%arg0: i32) -> (i32, i32) {
    %c0_i32 = arith.constant 0 : i32
    %c0_i32_0 = arith.constant 0 : i32
    %c0_i32_1 = arith.constant 0 : i32
    return %c0_i32, %c0_i32_0 : i32, i32
  }
  func.func @transform_3(%arg0: i32) -> (i32, i32, i32) {
    %c0_i32 = arith.constant 0 : i32
    %c0_i32_0 = arith.constant 0 : i32
    %c0_i32_1 = arith.constant 0 : i32
    %c0_i32_2 = arith.constant 0 : i32
    return %c0_i32, %c0_i32_0, %c0_i32_1 : i32, i32, i32
  }
  func.func @transform_4(%arg0: i32) -> (i32, i32) {
    %c0_i32 = arith.constant 0 : i32
    %c0_i32_0 = arith.constant 0 : i32
    %c0_i32_1 = arith.constant 0 : i32
    return %c0_i32, %c0_i32_0 : i32, i32
  }
  func.func @transform_5(%arg0: i32) -> (i32, i32) {
    %c0_i32 = arith.constant 0 : i32
    %c0_i32_0 = arith.constant 0 : i32
    %c0_i32_1 = arith.constant 0 : i32
    return %c0_i32, %c0_i32_0 : i32, i32
  }
  func.func @transform_6(%arg0: i32) -> (i32, i32, i32) {
    %c0_i32 = arith.constant 0 : i32
    %c0_i32_0 = arith.constant 0 : i32
    %c0_i32_1 = arith.constant 0 : i32
    %c0_i32_2 = arith.constant 0 : i32
    return %c0_i32, %c0_i32_0, %c0_i32_1 : i32, i32, i32
  }
  func.func @transform_7(%arg0: i32) -> (i32, i32, i32, i32) {
    %c0_i32 = arith.constant 0 : i32
    %c0_i32_0 = arith.constant 0 : i32
    %c0_i32_1 = arith.constant 0 : i32
    %c0_i32_2 = arith.constant 0 : i32
    return %arg0, %c0_i32, %c0_i32_0, %c0_i32_1 : i32, i32, i32, i32
  }
}

</mosaic_0001>

<bundles_post_ra>
// kernel: tpu_custom_call.1
= control target key start
LH: loop header
LB: loop body
LE: loop exit
PB: predicated region body
PF: predicated region fallthrough
CT: control target
= control target key end

     0   :  { %12 = vsyncpa [#allocation4], 0  ;;  %s9773_s0 = inlined_call_operand.hbm [shape: f32[2,16,16,128], index: 0, kind: input, shape index: {}]   ;;  %s9774_s1 = inlined_call_operand.vmem [shape: f32[1,128], index: 1, kind: input, shape index: {}]   ;;  %s9775_s2 = inlined_call_operand.vmem [shape: f32[1,128], index: 2, kind: input, shape index: {}]   ;;  %s9776_s3 = inlined_call_operand.hbm [shape: bf16[9,128,128], index: 3, kind: input, shape index: {}]   ;;  %s9777_s4 = inlined_call_operand.vmem [shape: f32[1,128], index: 4, kind: input, shape index: {}]   ;;  %s9778_s5 = inlined_call_operand.vmem [shape: f32[1,128], index: 5, kind: input, shape index: {}]   ;;  %s9779_s6 = inlined_call_operand.hbm [shape: bf16[9,128,128], index: 6, kind: input, shape index: {}]   ;;  %s9780_s7 = inlined_call_operand.hbm [shape: f32[2,16,16,128], index: 7, kind: output, shape index: {}]  }
   0x1   :  { %14 = vsyncpa [#allocation4 + $0x1], 0 }
   0x2   :  { %15 = vsyncpa [#allocation7], 0 }
   0x3   :  { %16 = vsyncpa [#allocation5], 0 }
   0x4   :  { %18 = vsyncpa [#allocation5 + $0x1], 0  ;;  %s8687_s24 = smov 0   ;;  %s8689_s25 = smov 0  }
   0x5   :  { %s8691_s26 = smov 0   ;;  %s8693_s27 = smov 0  }
   0x6 LB: > { %s8708_s28 = sadd.s32 4294967295, %s8633_s27   ;;  %s6279_s29 = sadd.s32 4294967294, %s8633_s27   ;;  %s8633_s27 = sphi %s8693_s27, %s9800_s27   ;;  %s8629_s26 = sphi %s8691_s26, %s9799_s26   ;;  %s8625_s25 = sphi %s8689_s25, %s9798_s25   ;;  %s8621_s24 = sphi %s8687_s24, %s9797_s24  }
   0x7   : > { %p44_p0 = scmp.ne.s32.totalorder %s8625_s25, %s8621_s24  ;;  %p9781_p1 = scmp.eq.s32.totalorder %s8708_s28, 0 }
   0x8   : > { %p200_p3 = scmp.eq.s32.totalorder %s6279_s29, 1  ;;  %p6280_p5 = scmp.ge.s32.totalorder %s8633_s27, 1 }
   0x9   : > { %p8717_p4 = por %p9781_p1, %p44_p0  ;;  %p207_p7 = scmp.lt.s32.totalorder %s8633_s27, 3 }
   0xa   : > { %p8722_p6 = por %p200_p3, %p44_p0  ;;  %s8635_s10 = smov [#allocation6]  }
   0xb   : > { %s9784_s30 = scalar_select %p8717_p4, 1, 0 }
   0xc   : > { %s9785_s8 = scalar_select %p8722_p6, 1, 0 }
   0xd   : > { %p8727_p8 = pnand %p6280_p5, %p207_p7  ;;  %s225_s11 = sshll.u32 %s8635_s10, 4  ;;  %s8731_s11 = int_to_ptr.vmem [resolvable:$true] %s225_s11 }
   0xe   : > { %s8636_s13 = smov [#allocation8]   ;;  %s8477_s17 = scalar_lea.hbm %s9776_s3, 9216 }
   0xf   : > { %p8267_p9 = pneg %p8727_p8  ;;  %s244_s14 = sshll.u32 %s8636_s13, 4  ;;  %s8742_s14 = int_to_ptr.vmem [resolvable:$true] %s244_s14 }
  0x10   : > { %p8478_p12 = scmp.ne.s32.totalorder %s9776_s3, %s8477_s17  ;;  %p8484_p5 = scmp.lt.u32.totalorder %s8477_s17, %s9776_s3 }
  0x11   : > { %p8738_p11 = pnand %p8267_p9, %p9781_p1 }
  0x13   : > { %p8479_p13 = pneg %p8738_p11 }
  0x15   : > { %p8480_p0 = pnand %p8479_p13, %p8478_p12 }
  0x17   : > { %p8481_p3 = pneg %p8480_p0 }
  0x19   : > { %p8486_p7 = pnand %p8484_p5, %p8481_p3 }
  0x1b   : > { %8489 = shalt.err (!%p8486_p7)
}
  0x1c   : > { %s8490_s22 = scalar_lea.vmem %s8731_s11, 9216  ;;  %p8498_p2 = scmp.lt.s32.totalorder %s8731_s11, %s8731_s11 }
  0x1d   : > { %p8491_p9 = scmp.ne.s32.totalorder %s8731_s11, %s8490_s22  ;;  %p8499_p12 = scmp.lt.s32.totalorder %s8490_s22, %s8490_s22 }
  0x1f   : > { %p8493_p10 = pnand %p8491_p9, %p8479_p13  ;;  %p8500_p0 = por %p8499_p12, %p8498_p2 }
  0x21   : > { %p8494_p1 = pneg %p8493_p10 }
  0x23   : > { %p8501_p6 = pnand %p8500_p0, %p8494_p1 }
  0x25   : > { %8504 = shalt.err (!%p8501_p6)
}
  0x26   : > { %s8637_s23 = smov 64   ;;  %s8638_s29 = smov 4  }
  0x27   : > { %8270 = dma.hbm_to_vmem [thread:$0]  (!%p8738_p11), %s9776_s3, 9216, %s8731_s11, [#allocation7], %s8637_s23, %s8637_s23, %s8638_s29  }
  0x28   : > { %s8505_s17 = scalar_lea.hbm %s9779_s6, 9216 }
  0x29   : > { %p8506_p2 = scmp.ne.s32.totalorder %s9779_s6, %s8505_s17  ;;  %p8512_p10 = scmp.lt.u32.totalorder %s8505_s17, %s9779_s6 }
  0x2b   : > { %p8508_p1 = pnand %p8506_p2, %p8479_p13 }
  0x2d   : > { %p8509_p6 = pneg %p8508_p1 }
  0x2f   : > { %p8514_p3 = pnand %p8512_p10, %p8509_p6 }
  0x31   : > { %8517 = shalt.err (!%p8514_p3)
}
  0x32   : > { %s8518_s11 = scalar_lea.vmem %s8742_s14, 9216  ;;  %p8526_p12 = scmp.lt.s32.totalorder %s8742_s14, %s8742_s14 }
  0x33   : > { %p8519_p5 = scmp.ne.s32.totalorder %s8742_s14, %s8518_s11  ;;  %p8527_p0 = scmp.lt.s32.totalorder %s8518_s11, %s8518_s11 }
  0x35   : > { %p8521_p7 = pnand %p8519_p5, %p8479_p13  ;;  %p8528_p2 = por %p8527_p0, %p8526_p12 }
  0x37   : > { %p8522_p9 = pneg %p8521_p7 }
  0x39   : > { %p8529_p1 = pnand %p8528_p2, %p8522_p9 }
  0x3b   : > { %8532 = shalt.err (!%p8529_p1)
}
  0x3c   : > { %8273 = dma.hbm_to_vmem [thread:$0]  (!%p8738_p11), %s9779_s6, 9216, %s8742_s14, [#allocation7], %s8637_s23, %s8637_s23, %s8638_s29  }
  0x3d   : > { %s8797_s13 = sadd.s32 1, %s8633_s27   ;;  %s31_s12 = sadd.s32 1, %s8629_s26 }
  0x3e   : > { %s28_s15 = ssub.s32 %s8633_s27, %s8797_s13  ;;  %p38_p13 = scmp.ne.s32.totalorder %s8629_s26, %s8625_s25 }
  0x3f   : > { %p29_p6 = scmp.eq.s32.totalorder %s28_s15, 0  ;;  %p39_p10 = scmp.eq.s32.totalorder %s8633_s27, 0 }
  0x40   : > { %p9788_p3 = scmp.eq.s32.totalorder %s8708_s28, 1  ;;  %p8284_p7 = scmp.lt.s32.totalorder %s8633_s27, 2 }
  0x41   : > { %s8813_s17 = scalar_select %p29_p6, %s8629_s26, %s31_s12  }
  0x42   : > { %p8807_p5 = por %p9788_p3, %p38_p13  ;;  %p40_p9 = por %p39_p10, %p38_p13 }
  0x43   : > { %s258_s18 = sand.u32 1, %s8629_s26   ;;  %s6445_s14 = sshll.u32 %s8633_s27, 12 }
  0x44   : > { %s9789_s16 = scalar_select %p8807_p5, 1, 0 }
  0x45   : > { %s6284_s19 = sshll.u32 %s258_s18, 8  ;;  %s8820_s20 = scalar_lea.hbm %s9773_s0, %s6445_s14 }
  0x46   : > { %s262_s21 = scalar_lea.vmem [#allocation3], %s6284_s19  ;;  %p8824_p11 = pnand %p8284_p7, %p40_p9 }
  0x47   : > { %s269_s11 = sshll.u32 %s262_s21, 4  ;;  %s8828_s10 = scalar_lea.sflag [#allocation4], %s258_s18  ;;  %s8822_s11 = int_to_ptr.vmem [resolvable:$true] %s269_s11 }
  0x48   : > { %s8533_s12 = scalar_lea.hbm %s8820_s20, 4096  ;;  %p8535_p0 = pneg %p8824_p11 }
  0x49   : > { %p8534_p12 = scmp.ne.s32.totalorder %s8820_s20, %s8533_s12  ;;  %s8538_s14 = scalar_lea.hbm %s9773_s0, 8192 }
  0x4a   : > { %p8539_p13 = scmp.lt.u32.totalorder %s8820_s20, %s9773_s0  ;;  %p8540_p6 = scmp.lt.u32.totalorder %s8538_s14, %s8533_s12 }
  0x4b   : > { %p8536_p2 = pnand %p8535_p0, %p8534_p12  ;;  %p8542_p3 = scmp.lt.u32.totalorder %s8533_s12, %s8820_s20 }
  0x4c   : > { %p8541_p10 = por %p8540_p6, %p8539_p13 }
  0x4d   : > { %p8537_p1 = pneg %p8536_p2 }
  0x4e   : > { %p8543_p7 = por %p8542_p3, %p8541_p10 }
  0x50   : > { %p8544_p9 = pnand %p8543_p7, %p8537_p1 }
  0x52   : > { %8547 = shalt.err (!%p8544_p9)
}
  0x53   : > { %s8548_s18 = scalar_lea.vmem %s8822_s11, 4096  ;;  %s8639_s21 = smov [#allocation3]  }
  0x54   : > { %p8549_p12 = scmp.ne.s32.totalorder %s8822_s11, %s8548_s18  ;;  %s8553_s15 = sshll.u32 %s8639_s21, 4  ;;  %s8554_s15 = int_to_ptr.vmem [resolvable:$false] %s8553_s15 }
  0x55   : > { %s8555_s19 = scalar_lea.vmem %s8554_s15, 8192  ;;  %p8556_p4 = scmp.lt.s32.totalorder %s8822_s11, %s8554_s15 }
  0x56   : > { %p8551_p2 = pnand %p8549_p12, %p8535_p0  ;;  %p8557_p13 = scmp.lt.s32.totalorder %s8555_s19, %s8548_s18 }
  0x58   : > { %p8552_p5 = pneg %p8551_p2  ;;  %p8558_p6 = por %p8557_p13, %p8556_p4 }
  0x5a   : > { %p8559_p10 = pnand %p8558_p6, %p8552_p5 }
  0x5c   : > { %8562 = shalt.err (!%p8559_p10)
}
  0x5d   : > { %s8640_s12 = smov 128   ;;  %s8641_s14 = smov 8  }
  0x5e   : > { %8277 = dma.hbm_to_vmem [thread:$0]  (!%p8824_p11), %s8820_s20, 4096, %s8822_s11, %s8828_s10, %s8640_s12, %s8640_s12, %s8641_s14  }
  0x5f   : > { %281 = sbr.rel (%p8727_p8) target bundleno = 1674 (0x68a), region = 48  ;;  %s8859_s23 = sand.u32 (!%p8727_p8), 1, %s8625_s25  }
  0x60   : > { %s6288_s29 = sshll.u32 (!%p8727_p8), %s8859_s23, 8  ;;  %s284_s18 = scalar_lea.sflag (!%p8727_p8), [#allocation4], %s8859_s23 }
  0x61   : > { %s8865_s21 = scalar_lea.vmem (!%p8727_p8), [#allocation3], %s6288_s29  ;;  %p9791_p4 = scmp.ne.s32.totalorder (!%p8727_p8), %s9784_s30, 0 }
  0x66   : > { %8608 = dma.done.wait (%p9791_p4), %s284_s18, 4096  }
  0x67   : > { %8610 = vsyncadd (%p9791_p4), %s284_s18, 4294963200  ;;  %p9792_p5 = scmp.eq.s32.totalorder %s8708_s28, 0 }
  0x69   : > { %8612 = dma.done.wait (%p9792_p5), [#allocation7], 18432   ;;  %p9793_p8 = pmov %p9792_p5 }
  0x6a   : > { %v8642_v0 = vmov 0.0   ;;  %v8329_v1 = vld [vmem:[#allocation6 + $0x40] sm:$0xff]   ;;  %v8330_v2 = vld [vmem:[#allocation6 + $0x48] sm:$0xff]   ;;  %v8331_v3 = vld [vmem:[#allocation6 + $0x50] sm:$0xff]   ;;  %s9660_s9 = scalar_lea.vmem [#allocation9], %s6288_s29  ;;  %s6446_s29 = sshll.u32 %s8708_s28, 12 }
  0x6b   : > { %8614 = vsyncadd (%p9793_p8), [#allocation7], 4294948864  ;;  %327 = vst [vmem:[#allocation2] sm:$0xff] %v8642_v0  ;;  %6879 = vmatprep.subr.bf16.mxu0 %v8329_v1  ;;  %v8332_v4 = vld [vmem:[#allocation6 + $0x58] sm:$0xff]   ;;  %v381_v7 = vld [vmem:[%s8865_s21] sm:$0xff]  ;;  %s6187_s20 = sshll.u32 %s9660_s9, 4  ;;  %s9724_s10 = scalar_lea.hbm %s9780_s7, %s6446_s29  ;;  %s9726_s20 = int_to_ptr.vmem [resolvable:$true] %s6187_s20 }
  0x6c   : > { %328 = vst [vmem:[#allocation2 + $0x8] sm:$0xff] %v8642_v0  ;;  %329 = vst [vmem:[#allocation2 + $0x10] sm:$0x3] %v8642_v0  ;;  %6880 = vmatpush3.bf16.msra.mxu0 %v8329_v1  ;;  %v382_v9 = vld [vmem:[%s8865_s21 + $0x8] sm:$0xff]  ;;  %v8880_v10 = vld [vmem:[%s9774_s1] ss:$0 sm:$0xff] }
  0x6d   : > { %330 = vst [vmem:[#allocation2 + $0x18] sm:$0xff] %v8642_v0  ;;  %331 = vst [vmem:[#allocation2 + $0x20] sm:$0xff] %v8642_v0  ;;  %6881 = vmatprep.subr.bf16.mxu0 %v8330_v2  ;;  %v8885_v11 = vld [vmem:[%s9775_s2] ss:$0 sm:$0xff]  ;;  %v8333_v12 = vld [vmem:[#allocation6 + $0x60] sm:$0xff]   ;;  %v420_v13 = vmul.f32 %v8880_v10, %v381_v7  ;;  %v421_v14 = vmul.f32 %v8880_v10, %v382_v9  ;;  %s6174_s28 = scalar_lea.sflag [#allocation5], %s8859_s23 }
  0x6e   : > { %332 = vst [vmem:[#allocation2 + $0x28] sm:$0x3] %v8642_v0  ;;  %333 = vst [vmem:[#allocation2 + $0x30] sm:$0xff] %v8642_v0  ;;  %v383_v15 = vld [vmem:[%s8865_s21 + $0x10] sm:$0xff]  ;;  %v384_v16 = vld [vmem:[%s8865_s21 + $0x18] sm:$0xff]  ;;  %p9794_p0 = scmp.ne.s32.totalorder %s9789_s16, 0 }
  0x6f   : > { %334 = vst [vmem:[#allocation2 + $0x38] sm:$0xff] %v8642_v0  ;;  %335 = vst [vmem:[#allocation2 + $0x40] sm:$0x3] %v8642_v0  ;;  %v385_v17 = vld [vmem:[%s8865_s21 + $0x20] sm:$0xff]  ;;  %v8893_v18 = vadd.f32 %v8885_v11, %v420_v13  ;;  %v8896_v19 = vadd.f32 %v8885_v11, %v421_v14  ;;  %v422_v20 = vmul.f32 %v8880_v10, %v383_v15  ;;  %v386_v22 = vld [vmem:[%s8865_s21 + $0x28] sm:$0xff]  ;;  %s8644_s15 = smov [#allocation9]  }
  0x70   : > { %336 = vst [vmem:[#allocation2 + $0x48] sm:$0xff] %v8642_v0  ;;  %337 = vst [vmem:[#allocation2 + $0x50] sm:$0xff] %v8642_v0  ;;  %6882 = vmatpush3.bf16.msra.mxu0 %v8330_v2  ;;  %v423_v21 = vmul.f32 %v8880_v10, %v384_v16  ;;  %v424_v23 = vmul.f32 %v8880_v10, %v385_v17  ;;  %v425_v24 = vmul.f32 %v8880_v10, %v386_v22  ;;  %v387_v25 = vld [vmem:[%s8865_s21 + $0x30] sm:$0xff]  ;;  %v388_v26 = vld [vmem:[%s8865_s21 + $0x38] sm:$0xff]  ;;  %s8567_s19 = sshll.u32 %s8644_s15, 4  ;;  %s8568_s19 = int_to_ptr.vmem [resolvable:$false] %s8567_s19 }
  0x71   : > { %338 = vst [vmem:[#allocation2 + $0x58] sm:$0x3] %v8642_v0  ;;  %339 = vst [vmem:[#allocation2 + $0x60] sm:$0xff] %v8642_v0  ;;  %6883 = vmatprep.subr.bf16.mxu0 %v8331_v3  ;;  %v491_v27 = vmax.f32 %v8893_v18, 0.0  ;;  %v492_v28 = vmax.f32 %v8896_v19, 0.0  ;;  %v8908_v29 = vadd.f32 %v8885_v11, %v422_v20  ;;  %v389_v31 = vld [vmem:[%s8865_s21 + $0x40] sm:$0xff]  ;;  %v426_v34 = vmul.f32 %v8880_v10, %v387_v25  ;;  %p8570_p7 = scmp.lt.s32.totalorder %s9726_s20, %s8568_s19 }
  0x72   : > { %340 = vst [vmem:[#allocation2 + $0x68] sm:$0xff] %v8642_v0  ;;  %341 = vst [vmem:[#allocation2 + $0x70] sm:$0x3] %v8642_v0  ;;  %v8911_v30 = vadd.f32 %v8885_v11, %v423_v21  ;;  %v8915_v32 = vadd.f32 %v8885_v11, %v424_v23  ;;  %v8918_v33 = vadd.f32 %v8885_v11, %v425_v24  ;;  %v390_v36 = vld [vmem:[%s8865_s21 + $0x48] sm:$0xff]  ;;  %v391_v37 = vld [vmem:[%s8865_s21 + $0x50] sm:$0xff]  ;;  %s8569_s12 = scalar_lea.vmem %s8568_s19, 8192 }
  0x73   : > { %342 = vst [vmem:[#allocation2 + $0x78] sm:$0xff] %v8642_v0  ;;  %343 = vst [vmem:[#allocation2 + $0x80] sm:$0xff] %v8642_v0  ;;  %v620_v5 = vld [vmem:[#allocation2 + $0x1] sm:$0xff]  ;;  %v621_v6 = vld [vmem:[#allocation2 + $0x9] sm:$0xff]  ;;  %v427_v35 = vmul.f32 %v8880_v10, %v388_v26  ;;  %v493_v39 = vmax.f32 %v8908_v29, 0.0  ;;  %v428_v41 = vmul.f32 %v8880_v10, %v389_v31  ;;  %v8936_v46 = vadd.f32 %v8885_v11, %v426_v34 }
  0x74   : > { %344 = vst [vmem:[#allocation2 + $0x88] sm:$0x3] %v8642_v0  ;;  %345 = vst [vmem:[#allocation2 + $0x90] sm:$0xff] %v8642_v0  ;;  %v652_v8 = vpack.c.bf16 %v621_v6, %v620_v5  ;;  %6884 = vmatpush3.bf16.msra.mxu0 %v8331_v3  ;;  %v8334_v38 = vld [vmem:[#allocation6 + $0x68] sm:$0xff]   ;;  %v494_v40 = vmax.f32 %v8911_v30, 0.0  ;;  %v392_v42 = vld [vmem:[%s8865_s21 + $0x58] sm:$0xff]  ;;  %v429_v48 = vmul.f32 %v8880_v10, %v390_v36 }
  0x75   : > { %346 = vst [vmem:[#allocation2 + $0x98] sm:$0xff] %v8642_v0  ;;  %347 = vst [vmem:[#allocation2 + $0xa0] sm:$0x3] %v8642_v0  ;;  %6885 = vmatprep.subr.bf16.mxu0 %v8332_v4  ;;  %v393_v43 = vld [vmem:[%s8865_s21 + $0x60] sm:$0xff]  ;;  %v495_v44 = vmax.f32 %v8915_v32, 0.0  ;;  %v496_v45 = vmax.f32 %v8918_v33, 0.0  ;;  %v8939_v47 = vadd.f32 %v8885_v11, %v427_v35  ;;  %v8947_v49 = vadd.f32 %v8885_v11, %v428_v41 }
  0x76   : > { %348 = vst [vmem:[#allocation2 + $0xa8] sm:$0xff] %v8642_v0  ;;  %349 = vst [vmem:[#allocation2 + $0xb0] sm:$0xff] %v8642_v0  ;;  %6895 = vmatprep.mubr.bf16.mxu0 %v652_v8  ;;  %v430_v50 = vmul.f32 %v8880_v10, %v391_v37  ;;  %v394_v51 = vld [vmem:[%s8865_s21 + $0x68] sm:$0xff]  ;;  %v395_v52 = vld [vmem:[%s8865_s21 + $0x70] sm:$0xff]  ;;  %v497_v53 = vmax.f32 %v8936_v46, 0.0  ;;  %v431_v55 = vmul.f32 %v8880_v10, %v392_v42 }
  0x77   : > { %350 = vst [vmem:[#allocation2 + $0xb8] sm:$0x3] %v8642_v0  ;;  %351 = vst [vmem:[#allocation2 + $0xc0] sm:$0xff] %v8642_v0  ;;  %v498_v54 = vmax.f32 %v8939_v47, 0.0  ;;  %v396_v56 = vld [vmem:[%s8865_s21 + $0x78] sm:$0xff]  ;;  %v8335_v57 = vld [vmem:[#allocation6 + $0x70] sm:$0xff]   ;;  %v8961_v58 = vadd.f32 %v8885_v11, %v429_v48  ;;  %v432_v61 = vmul.f32 %v8880_v10, %v393_v43  ;;  %v434_v1 = vmul.f32 %v8880_v10, %v395_v52 }
  0x78   : > { %352 = vst [vmem:[#allocation2 + $0xc8] sm:$0xff] %v8642_v0  ;;  %353 = vst [vmem:[#allocation2 + $0xd0] sm:$0x3] %v8642_v0  ;;  %6886 = vmatpush3.bf16.msra.mxu0 %v8332_v4  ;;  %v499_v59 = vmax.f32 %v8947_v49, 0.0  ;;  %v8965_v60 = vadd.f32 %v8885_v11, %v430_v50  ;;  %v397_v62 = vld [vmem:[%s8865_s21 + $0x80] sm:$0xff]  ;;  %v8974_v63 = vadd.f32 %v8885_v11, %v431_v55  ;;  %v398_v2 = vld [vmem:[%s8865_s21 + $0x88] sm:$0xff] }
  0x79   : > { %354 = vst [vmem:[#allocation2 + $0xd8] sm:$0xff] %v8642_v0  ;;  %355 = vst [vmem:[#allocation2 + $0xe0] sm:$0xff] %v8642_v0  ;;  %6887 = vmatprep.subr.bf16.mxu0 %v8333_v12  ;;  %v500_v3 = vmax.f32 %v8961_v58, 0.0  ;;  %v8984_v5 = vadd.f32 %v8885_v11, %v432_v61  ;;  %v435_v6 = vmul.f32 %v8880_v10, %v396_v56  ;;  %v8336_v7 = vld [vmem:[#allocation6 + $0x78] sm:$0xff]   ;;  %v399_v14 = vld [vmem:[%s8865_s21 + $0x90] sm:$0xff] }
  0x7a   : > { %356 = vst [vmem:[#allocation2 + $0xe8] sm:$0x3] %v8642_v0  ;;  %357 = vst [vmem:[#allocation2 + $0xf0] sm:$0xff] %v8642_v0  ;;  %v501_v4 = vmax.f32 %v8965_v60, 0.0  ;;  %v502_v8 = vmax.f32 %v8974_v63, 0.0  ;;  %v436_v13 = vmul.f32 %v8880_v10, %v397_v62  ;;  %v400_v15 = vld [vmem:[%s8865_s21 + $0x98] sm:$0xff]  ;;  %v437_v20 = vmul.f32 %v8880_v10, %v398_v2 }
  0x7b   : > { %358 = vst [vmem:[#allocation2 + $0xf8] sm:$0xff] %v8642_v0  ;;  %359 = vst [vmem:[#allocation2 + $0x100] sm:$0x3] %v8642_v0  ;;  %v503_v16 = vmax.f32 %v8984_v5, 0.0  ;;  %v9003_v17 = vadd.f32 %v8885_v11, %v435_v6  ;;  %v401_v21 = vld [vmem:[%s8865_s21 + $0xa0] sm:$0xff]  ;;  %v402_v22 = vld [vmem:[%s8865_s21 + $0xa8] sm:$0xff]  ;;  %v438_v34 = vmul.f32 %v8880_v10, %v399_v14  ;;  %v439_v35 = vmul.f32 %v8880_v10, %v400_v15 }
  0x7c   : > { %360 = vst [vmem:[#allocation2 + $0x108] sm:$0xff] %v8642_v0  ;;  %361 = vst [vmem:[#allocation2 + $0x110] sm:$0xff] %v8642_v0  ;;  %6888 = vmatpush3.bf16.msra.mxu0 %v8333_v12  ;;  %v8992_v12 = vadd.f32 %v8885_v11, %v434_v1  ;;  %v9013_v25 = vadd.f32 %v8885_v11, %v436_v13  ;;  %v9019_v31 = vadd.f32 %v8885_v11, %v437_v20  ;;  %v403_v36 = vld [vmem:[%s8865_s21 + $0xb0] sm:$0xff]  ;;  %v404_v37 = vld [vmem:[%s8865_s21 + $0xb8] sm:$0xff] }
  0x7d   : > { %362 = vst [vmem:[#allocation2 + $0x118] sm:$0x3] %v8642_v0  ;;  %363 = vst [vmem:[#allocation2 + $0x120] sm:$0xff] %v8642_v0  ;;  %6889 = vmatprep.subr.bf16.mxu0 %v8334_v38  ;;  %v506_v26 = vmax.f32 %v9003_v17, 0.0  ;;  %v440_v41 = vmul.f32 %v8880_v10, %v401_v21  ;;  %v441_v42 = vmul.f32 %v8880_v10, %v402_v22  ;;  %v405_v43 = vld [vmem:[%s8865_s21 + $0xc0] sm:$0xff]  ;;  %v406_v56 = vld [vmem:[%s8865_s21 + $0xc8] sm:$0xff] }
  0x7e   : > { %364 = vst [vmem:[#allocation2 + $0x128] sm:$0xff] %v8642_v0  ;;  %365 = vst [vmem:[#allocation2 + $0x130] sm:$0x3] %v8642_v0  ;;  %v505_v24 = vmax.f32 %v8992_v12, 0.0  ;;  %v653_v48 = vpack.c.bf16 %v492_v28, %v491_v27  ;;  %v8337_v50 = vld [vmem:[#allocation6] sm:$0xff]   ;;  %v9041_v52 = vadd.f32 %v8885_v11, %v438_v34  ;;  %v9044_v55 = vadd.f32 %v8885_v11, %v439_v35  ;;  %v408_v2 = vld [vmem:[%s8865_s21 + $0xd8] sm:$0xff] }
  0x7f   : > { %366 = vst [vmem:[#allocation2 + $0x138] sm:$0xff] %v8642_v0  ;;  %367 = vst [vmem:[#allocation2 + $0x140] sm:$0xff] %v8642_v0  ;;  %v9049_v18 = vadd.f32 %v8885_v11, %v440_v41  ;;  %v9052_v19 = vadd.f32 %v8885_v11, %v441_v42  ;;  %v654_v61 = vpack.c.bf16 %v494_v40, %v493_v39  ;;  %v409_v6 = vld [vmem:[%s8865_s21 + $0xe0] sm:$0xff]  ;;  %v410_v20 = vld [vmem:[%s8865_s21 + $0xe8] sm:$0xff] }
  0x80   : > { %368 = vst [vmem:[#allocation2 + $0x148] sm:$0x3] %v8642_v0  ;;  %369 = vst [vmem:[#allocation2 + $0x150] sm:$0xff] %v8642_v0  ;;  %6890 = vmatpush3.bf16.msra.mxu0 %v8334_v38  ;;  %v507_v38 = vmax.f32 %v9013_v25, 0.0  ;;  %v509_v62 = vmax.f32 %v9041_v52, 0.0  ;;  %v444_v1 = vmul.f32 %v8880_v10, %v405_v43  ;;  %v447_v34 = vmul.f32 %v8880_v10, %v408_v2  ;;  %v8339_v42 = vld [vmem:[#allocation6 + $0x10] sm:$0xff]  }
  0x81   : > { %370 = vst [vmem:[#allocation2 + $0x158] sm:$0xff] %v8642_v0  ;;  %371 = vst [vmem:[#allocation2 + $0x160] sm:$0x3] %v8642_v0  ;;  %6891 = vmatprep.subr.bf16.mxu0 %v8335_v57  ;;  %v511_v13 = vmax.f32 %v9049_v18, 0.0  ;;  %v512_v29 = vmax.f32 %v9052_v19, 0.0  ;;  %v448_v41 = vmul.f32 %v8880_v10, %v409_v6  ;;  %v8340_v6 = vld [vmem:[#allocation6 + $0x18] sm:$0xff]   ;;  %v657_v32 = vpack.c.bf16 %v500_v3, %v499_v59 }
  0x82   : > { %372 = vst [vmem:[#allocation2 + $0x168] sm:$0xff] %v8642_v0  ;;  %373 = vst [vmem:[#allocation2 + $0x170] sm:$0xff] %v8642_v0  ;;  %v9083_v14 = vadd.f32 %v8885_v11, %v444_v1  ;;  %v486_v43 = vadd.f32 %v8885_v11, %v447_v34  ;;  %v656_v1 = vpack.c.bf16 %v498_v54, %v497_v53  ;;  %v8344_v47 = vld [vmem:[#allocation6 + $0x38] sm:$0xff]  }
  0x83   : > { %374 = vst [vmem:[#allocation2 + $0x178] sm:$0x3] %v8642_v0  ;;  %375 = vst [vmem:[#allocation2 + $0x180] sm:$0xff] %v8642_v0  ;;  %v9130_v33 = vpack.c.bf16 %v502_v8, %v501_v4  ;;  %v9143_v49 = vpack.c.bf16 %v506_v26, %v505_v24  ;;  %v8352_v34 = vld [vmem:[#allocation6 + $0xb8] sm:$0xff]  }
  0x84   : > { %376 = vst [vmem:[#allocation2 + $0x188] sm:$0xff] %v8642_v0  ;;  %377 = vst [vmem:[#allocation2 + $0x190] sm:$0x3] %v8642_v0  ;;  %6892 = vmatpush3.bf16.msra.mxu0 %v8335_v57  ;;  %v407_v57 = vld [vmem:[%s8865_s21 + $0xd0] sm:$0xff] }
  0x85   : > { %378 = vst [vmem:[#allocation2 + $0x198] sm:$0xff] %v8642_v0  ;;  %379 = vst [vmem:[#allocation2 + $0x1a0] sm:$0xff] %v8642_v0  ;;  %6893 = vmatprep.subr.bf16.mxu0 %v8336_v7  ;;  %v446_v15 = vmul.f32 %v8880_v10, %v407_v57 }
  0x86   : > { %380 = vst [vmem:[#allocation2 + $0x1a8] sm:$0x3] %v8642_v0  ;;  %524 = vst [vmem:[#allocation2 + $0x19] sm:$0xff] %v491_v27  ;;  %v433_v0 = vmul.f32 %v8880_v10, %v394_v51  ;;  %v508_v51 = vmax.f32 %v9019_v31, 0.0  ;;  %v442_v27 = vmul.f32 %v8880_v10, %v403_v36  ;;  %v515_v36 = vmax.f32 %v9083_v14, 0.0 }
  0x87   : > { %525 = vst [vmem:[#allocation2 + $0x21] sm:$0xff] %v492_v28  ;;  %526 = vst [vmem:[#allocation2 + $0x31] sm:$0xff] %v493_v39  ;;  %v443_v28 = vmul.f32 %v8880_v10, %v404_v37  ;;  %v9099_v37 = vadd.f32 %v8885_v11, %v446_v15 }
  0x88   : > { %527 = vst [vmem:[#allocation2 + $0x39] sm:$0xff] %v494_v40  ;;  %528 = vst [vmem:[#allocation2 + $0x49] sm:$0xff] %v495_v44  ;;  %v8989_v9 = vadd.f32 %v8885_v11, %v433_v0  ;;  %v510_v0 = vmax.f32 %v9044_v55, 0.0  ;;  %6894 = vmatpush3.bf16.msra.mxu0 %v8336_v7  ;;  %v9072_v30 = vadd.f32 %v8885_v11, %v442_v27  ;;  %v8338_v40 = vld [vmem:[#allocation6 + $0x8] sm:$0xff]   ;;  %v8348_v55 = vld [vmem:[#allocation6 + $0x98] sm:$0xff]  }
  0x89   : > { %529 = vst [vmem:[#allocation2 + $0x51] sm:$0xff] %v496_v45  ;;  %530 = vst [vmem:[#allocation2 + $0x61] sm:$0xff] %v497_v53  ;;  %v9075_v39 = vadd.f32 %v8885_v11, %v443_v28  ;;  %6927 = vmatprep.subr.bf16.mxu0 %v8337_v50  ;;  %v445_v7 = vmul.f32 %v8880_v10, %v406_v56  ;;  %v487_v28 = vadd.f32 %v8885_v11, %v448_v41  ;;  %v8345_v53 = vld [vmem:[#allocation6 + $0x80] sm:$0xff]  }
  0x8a   : > { %531 = vst [vmem:[#allocation2 + $0x69] sm:$0xff] %v498_v54  ;;  %532 = vst [vmem:[#allocation2 + $0x79] sm:$0xff] %v499_v59  ;;  %v504_v23 = vmax.f32 %v8989_v9, 0.0  ;;  %v513_v21 = vmax.f32 %v9072_v30, 0.0  ;;  %v518_v56 = vmax.f32 %v486_v43, 0.0  ;;  %v9151_v54 = vpack.c.bf16 %v508_v51, %v507_v38  ;;  %v8353_v43 = vld [vmem:[#allocation6 + $0xc0] sm:$0xff]  }
  0x8b   : > { %533 = vst [vmem:[#allocation2 + $0x81] sm:$0xff] %v500_v3  ;;  %534 = vst [vmem:[#allocation2 + $0x91] sm:$0xff] %v501_v4  ;;  %v514_v22 = vmax.f32 %v9075_v39, 0.0  ;;  %6896 = vmatmul.mubr.bf16.vlgmr.msra.gmra.mrb[0].mxu0 %v653_v48  ;;  %v9095_v35 = vadd.f32 %v8885_v11, %v445_v7  ;;  %v449_v48 = vmul.f32 %v8880_v10, %v410_v20  ;;  %v519_v10 = vmax.f32 %v487_v28, 0.0  ;;  %v8350_v39 = vld [vmem:[#allocation6 + $0xa8] sm:$0xff]  }
  0x8c   : > { %535 = vst [vmem:[#allocation2 + $0x99] sm:$0xff] %v502_v8  ;;  %536 = vst [vmem:[#allocation2 + $0xa9] sm:$0xff] %v503_v16  ;;  %6928 = vmatpush3.bf16.msra.mxu0 %v8337_v50  ;;  %6899 = vmatprep.mubr.bf16.mxu0 %v654_v61  ;;  %v517_v50 = vmax.f32 %v9099_v37, 0.0  ;;  %v655_v61 = vpack.c.bf16 %v496_v45, %v495_v44  ;;  %v8342_v44 = vld [vmem:[#allocation6 + $0x28] sm:$0xff]   ;;  %v8343_v45 = vld [vmem:[#allocation6 + $0x30] sm:$0xff]   ;;  %v9137_v46 = vpack.c.bf16 %v504_v23, %v503_v16  ;;  %v8643_v16 = vmov 0.0|0.0  }
  0x8d   : > { %537 = vst [vmem:[#allocation2 + $0xb1] sm:$0xff] %v504_v23  ;;  %538 = vst [vmem:[#allocation2 + $0xc1] sm:$0xff] %v505_v24  ;;  %6929 = vmatprep.subr.bf16.mxu0 %v8338_v40  ;;  %v516_v27 = vmax.f32 %v9095_v35, 0.0  ;;  %v488_v57 = vadd.f32 %v8885_v11, %v449_v48  ;;  %v8341_v11 = vld [vmem:[#allocation6 + $0x20] sm:$0xff]   ;;  %v9157_v58 = vpack.c.bf16 %v510_v0, %v509_v62  ;;  %v558_v5 = vld [vmem:[#allocation2 + $0x18] sm:$0xff] }
  0x8e   : > { %539 = vst [vmem:[#allocation2 + $0xc9] sm:$0xff] %v506_v26  ;;  %540 = vst [vmem:[#allocation2 + $0xd9] sm:$0xff] %v507_v38  ;;  %v9165_v59 = vpack.c.bf16 %v512_v29, %v511_v13  ;;  %v9171_v60 = vpack.c.bf16 %v514_v22, %v513_v21  ;;  %v9179_v3 = vpack.c.bf16 %v518_v56, %v517_v50  ;;  %v559_v8 = vld [vmem:[#allocation2 + $0x20] sm:$0xff]  ;;  %v560_v9 = vld [vmem:[#allocation2 + $0x30] sm:$0xff] }
  0x8f   : > { %541 = vst [vmem:[#allocation2 + $0xe1] sm:$0xff] %v508_v51  ;;  %542 = vst [vmem:[#allocation2 + $0xf1] sm:$0xff] %v509_v62  ;;  %v520_v2 = vmax.f32 %v488_v57, 0.0  ;;  %v9177_v63 = vpack.c.bf16 %v516_v27, %v515_v36  ;;  %v561_v12 = vld [vmem:[#allocation2 + $0x38] sm:$0xff]  ;;  %v9186_v17 = vpack.c.bf16 %v559_v8, %v558_v5  ;;  %v562_v25 = vld [vmem:[#allocation2 + $0x48] sm:$0xff] }
  0x90   : > { %543 = vst [vmem:[#allocation2 + $0xf9] sm:$0xff] %v510_v0  ;;  %544 = vst [vmem:[#allocation2 + $0x109] sm:$0xff] %v511_v13  ;;  %6930 = vmatpush3.bf16.msra.mxu0 %v8338_v40  ;;  %v8346_v23 = vld [vmem:[#allocation6 + $0x88] sm:$0xff]   ;;  %v9188_v24 = vpack.c.bf16 %v561_v12, %v560_v9  ;;  %v563_v26 = vld [vmem:[#allocation2 + $0x50] sm:$0xff] }
  0x91   : > { %545 = vst [vmem:[#allocation2 + $0x111] sm:$0xff] %v512_v29  ;;  %546 = vst [vmem:[#allocation2 + $0x121] sm:$0xff] %v513_v21  ;;  %6931 = vmatprep.subr.bf16.mxu0 %v8339_v42  ;;  %v9183_v4 = vpack.c.bf16 %v520_v2, %v519_v10  ;;  %v564_v31 = vld [vmem:[#allocation2 + $0x60] sm:$0xff]  ;;  %v565_v38 = vld [vmem:[#allocation2 + $0x68] sm:$0xff]  ;;  %v9192_v52 = vpack.c.bf16 %v563_v26, %v562_v25 }
  0x92   : > { %547 = vst [vmem:[#allocation2 + $0x129] sm:$0xff] %v514_v22  ;;  %548 = vst [vmem:[#allocation2 + $0x139] sm:$0xff] %v515_v36  ;;  %v8347_v51 = vld [vmem:[#allocation6 + $0x90] sm:$0xff]   ;;  %v9194_v18 = vpack.c.bf16 %v565_v38, %v564_v31  ;;  %v566_v19 = vld [vmem:[#allocation2 + $0x78] sm:$0xff] }
  0x93   : > { %549 = vst [vmem:[#allocation2 + $0x141] sm:$0xff] %v516_v27  ;;  %550 = vst [vmem:[#allocation2 + $0x151] sm:$0xff] %v517_v50  ;;  %6900 = vmatmul.mubr.bf16.gmra.mrb[4].mxu0 %v655_v61  ;;  %v567_v62 = vld [vmem:[#allocation2 + $0x80] sm:$0xff]  ;;  %v568_v0 = vld [vmem:[#allocation2 + $0x90] sm:$0xff] }
  0x94   : > { %551 = vst [vmem:[#allocation2 + $0x159] sm:$0xff] %v518_v56  ;;  %552 = vst [vmem:[#allocation2 + $0x169] sm:$0xff] %v519_v10  ;;  %6903 = vmatprep.mubr.bf16.mxu0 %v656_v1  ;;  %6932 = vmatpush3.bf16.msra.mxu0 %v8339_v42  ;;  %v569_v13 = vld [vmem:[#allocation2 + $0x98] sm:$0xff]  ;;  %v8349_v29 = vld [vmem:[#allocation6 + $0xa0] sm:$0xff]   ;;  %v9198_v30 = vpack.c.bf16 %v567_v62, %v566_v19 }
  0x95   : > { %553 = vst [vmem:[#allocation2 + $0x171] sm:$0xff] %v520_v2  ;;  %6933 = vmatprep.subr.bf16.mxu0 %v8340_v6  ;;  %v9200_v40 = vpack.c.bf16 %v569_v13, %v568_v0  ;;  %v570_v7 = vld [vmem:[#allocation2 + $0xa8] sm:$0xff]  ;;  %v571_v14 = vld [vmem:[#allocation2 + $0xb0] sm:$0xff]  ;;  %v572_v15 = vld [vmem:[#allocation2 + $0xc0] sm:$0xff] }
  0x96   : > { %v573_v20 = vld [vmem:[#allocation2 + $0xc8] sm:$0xff]  ;;  %v8351_v21 = vld [vmem:[#allocation6 + $0xb0] sm:$0xff]   ;;  %v9204_v22 = vpack.c.bf16 %v571_v14, %v570_v7  ;;  %v574_v36 = vld [vmem:[#allocation2 + $0xd8] sm:$0xff] }
  0x97   : > { %v9206_v35 = vpack.c.bf16 %v573_v20, %v572_v15  ;;  %v575_v37 = vld [vmem:[#allocation2 + $0xe0] sm:$0xff]  ;;  %v576_v41 = vld [vmem:[#allocation2 + $0xf0] sm:$0xff]  ;;  %v577_v42 = vld [vmem:[#allocation2 + $0xf8] sm:$0xff] }
  0x98   : > { %6934 = vmatpush3.bf16.msra.mxu0 %v8340_v6  ;;  %v9210_v48 = vpack.c.bf16 %v575_v37, %v574_v36  ;;  %v9212_v27 = vpack.c.bf16 %v577_v42, %v576_v41  ;;  %v578_v50 = vld [vmem:[#allocation2 + $0x108] sm:$0xff]  ;;  %v579_v28 = vld [vmem:[#allocation2 + $0x110] sm:$0xff]  ;;  %v580_v56 = vld [vmem:[#allocation2 + $0x120] sm:$0xff] }
  0x99   : > { %6935 = vmatprep.subr.bf16.mxu0 %v8341_v11  ;;  %v581_v57 = vld [vmem:[#allocation2 + $0x128] sm:$0xff]  ;;  %v9216_v61 = vpack.c.bf16 %v579_v28, %v578_v50  ;;  %v582_v1 = vld [vmem:[#allocation2 + $0x138] sm:$0xff]  ;;  %v411_v6 = vld [vmem:[%s8865_s21 + $0xf0] sm:$0xff] }
  0x9a   : > { %v9218_v10 = vpack.c.bf16 %v581_v57, %v580_v56  ;;  %v583_v2 = vld [vmem:[#allocation2 + $0x140] sm:$0xff]  ;;  %v1107_v13 = vld [vmem:[#allocation2 + $0x32] sm:$0xff]  ;;  %v1109_v15 = vld [vmem:[#allocation2 + $0x4a] sm:$0xff] }
  0x9b   : > { %6904 = vmatmul.mubr.bf16.gmra.mrb[8].mxu0 %v657_v32  ;;  %v584_v32 = vld [vmem:[#allocation2 + $0x150] sm:$0xff]  ;;  %v8474_v5 = vld [vmem:[%s9775_s2] ss:$0 sm:$0xff]  ;;  %v9234_v12 = vpack.c.bf16 %v583_v2, %v582_v1  ;;  %v586_v26 = vld [vmem:[#allocation2 + $0x168] sm:$0xff] }
  0x9c   : > { %6907 = vmatprep.mubr.bf16.mxu0 %v9130_v33  ;;  %6936 = vmatpush3.bf16.msra.mxu0 %v8341_v11  ;;  %v412_v11 = vld [vmem:[%s8865_s21 + $0xf8] sm:$0xff]  ;;  %v587_v31 = vld [vmem:[#allocation2 + $0x170] sm:$0xff]  ;;  %v1105_v62 = vld [vmem:[#allocation2 + $0x1a] sm:$0xff] }
  0x9d   : > { %6937 = vmatprep.subr.bf16.mxu0 %v8342_v44  ;;  %v1103_v38 = vld [vmem:[#allocation2 + $0x2] sm:$0xff]  ;;  %v8354_v14 = vld [vmem:[#allocation6 + $0xc8] sm:$0xff]   ;;  %v8357_v57 = vld [vmem:[#allocation6 + $0xe0] sm:$0xff]  }
  0x9e   : > { %v1106_v0 = vld [vmem:[#allocation2 + $0x22] sm:$0xff]  ;;  %v1110_v20 = vld [vmem:[#allocation2 + $0x52] sm:$0xff]  ;;  %v1116_v56 = vld [vmem:[#allocation2 + $0x9a] sm:$0xff] }
  0x9f   : > { %v8355_v36 = vld [vmem:[#allocation6 + $0xd0] sm:$0xff]   ;;  %v9255_v37 = vpack.c.bf16 %v1110_v20, %v1109_v15  ;;  %v8356_v42 = vld [vmem:[#allocation6 + $0xd8] sm:$0xff]   ;;  %v1115_v28 = vld [vmem:[#allocation2 + $0x92] sm:$0xff] }
  0xa0   : > { %6938 = vmatpush3.bf16.msra.mxu0 %v8342_v44  ;;  %v585_v44 = vld [vmem:[#allocation2 + $0x158] sm:$0xff]  ;;  %v1114_v50 = vld [vmem:[#allocation2 + $0x82] sm:$0xff]  ;;  %v9263_v2 = vpack.c.bf16 %v1116_v56, %v1115_v28  ;;  %v1128_v20 = vld [vmem:[#allocation2 + $0x12a] sm:$0xff] }
  0xa1   : > { %6939 = vmatprep.subr.bf16.mxu0 %v8343_v45  ;;  %v9238_v25 = vpack.c.bf16 %v585_v44, %v584_v32  ;;  %v1118_v32 = vld [vmem:[#allocation2 + $0xb2] sm:$0xff]  ;;  %v1119_v44 = vld [vmem:[#allocation2 + $0xc2] sm:$0xff] }
  0xa2   : > { %v1127_v15 = vld [vmem:[#allocation2 + $0x122] sm:$0xff] }
  0xa3   : > { %6908 = vmatmul.mubr.bf16.gmra.mrb[12].mxu0 %v9137_v46 }
  0xa4   : > { %6911 = vmatprep.mubr.bf16.mxu0 %v9143_v49  ;;  %6940 = vmatpush3.bf16.msra.mxu0 %v8343_v45  ;;  %v8473_v45 = vld [vmem:[%s9774_s1] ss:$0 sm:$0xff] }
  0xa5   : > { %6941 = vmatprep.subr.bf16.mxu0 %v8344_v47 }
  0xa8   : > { %6942 = vmatpush3.bf16.msra.mxu0 %v8344_v47  ;;  %v450_v47 = vmul.f32 %v8473_v45, %v411_v6  ;;  %v8358_v6 = vld [vmem:[#allocation6 + $0xe8] sm:$0xff]  }
  0xa9   : > { %6975 = vmatprep.subr.bf16.mxu0 %v8345_v53 }
  0xaa   : > { %v9230_v8 = vadd.f32 %v8474_v5, %v450_v47  ;;  %v8359_v47 = vld [vmem:[#allocation6 + $0xf0] sm:$0xff]  }
  0xab   : > { %6912 = vmatmul.mubr.bf16.gmra.mrb[16].mxu0 %v9151_v54 }
  0xac   : > { %6915 = vmatprep.mubr.bf16.mxu0 %v9157_v58 }
  0xb3   : > { %6916 = vmatmul.mubr.bf16.gmra.mrb[20].mxu0 %v9165_v59 }
  0xb4   : > { %6919 = vmatprep.mubr.bf16.mxu0 %v9171_v60 }
  0xbb   : > { %6920 = vmatmul.mubr.bf16.gmra.mrb[24].mxu0 %v9177_v63 }
  0xbc   : > { %6923 = vmatprep.mubr.bf16.mxu0 %v9179_v3 }
  0xc3   : > { %6924 = vmatmul.mubr.bf16.gmra.mrb[28].mxu0 %v9183_v4 }
  0xc4   : > { %6943 = vmatprep.mubr.bf16.mxu0 %v8643_v16  ;;  %v521_v16 = vmax.f32 %v9230_v8, 0.0 }
  0xc6   : > { %554 = vst [vmem:[#allocation2 + $0x181] sm:$0xff] %v521_v16 }
  0xcb   : > { %6944 = vmatmul.mubr.bf16.vlgmr.msra.gmra.mrb[0].mxu0 %v9186_v17 }
  0xcc   : > { %6976 = vmatpush3.bf16.msra.mxu0 %v8345_v53  ;;  %6947 = vmatprep.mubr.bf16.mxu0 %v9188_v24  ;;  %v451_v53 = vmul.f32 %v8473_v45, %v412_v11  ;;  %v1117_v11 = vld [vmem:[#allocation2 + $0xaa] sm:$0xff] }
  0xcd   : > { %6977 = vmatprep.subr.bf16.mxu0 %v8346_v23  ;;  %v1120_v45 = vld [vmem:[#allocation2 + $0xca] sm:$0xff] }
  0xce   : > { %v9232_v9 = vadd.f32 %v8474_v5, %v451_v53  ;;  %v9267_v53 = vpack.c.bf16 %v1118_v32, %v1117_v11  ;;  %v9269_v5 = vpack.c.bf16 %v1120_v45, %v1119_v44  ;;  %v8362_v32 = vld [vmem:[#allocation6 + $0x108] sm:$0xff]   ;;  %v8363_v44 = vld [vmem:[#allocation6 + $0x110] sm:$0xff]   ;;  %v8364_v45 = vld [vmem:[#allocation6 + $0x118] sm:$0xff]  }
  0xd0   : > { %6978 = vmatpush3.bf16.msra.mxu0 %v8346_v23  ;;  %v522_v23 = vmax.f32 %v9232_v9, 0.0  ;;  %v2328_v9 = vld [vmem:[#allocation2 + $0x30] sm:$0xff] }
  0xd1   : > { %6979 = vmatprep.subr.bf16.mxu0 %v8347_v51 }
  0xd2   : > { %555 = vst [vmem:[#allocation2 + $0x189] sm:$0xff] %v522_v23 }
  0xd3   : > { %6948 = vmatmul.mubr.bf16.gmra.mrb[4].mxu0 %v9192_v52 }
  0xd4   : > { %6951 = vmatprep.mubr.bf16.mxu0 %v9194_v18  ;;  %6980 = vmatpush3.bf16.msra.mxu0 %v8347_v51  ;;  %v1104_v51 = vld [vmem:[#allocation2 + $0xa] sm:$0xff] }
  0xd5   : > { %6981 = vmatprep.subr.bf16.mxu0 %v8348_v55  ;;  %v1135_v19 = vpack.c.bf16 %v1104_v51, %v1103_v38  ;;  %v1122_v38 = vld [vmem:[#allocation2 + $0xe2] sm:$0xff]  ;;  %v1123_v51 = vld [vmem:[#allocation2 + $0xf2] sm:$0xff] }
  0xd8   : > { %6982 = vmatpush3.bf16.msra.mxu0 %v8348_v55  ;;  %v9246_v55 = vpack.c.bf16 %v587_v31, %v586_v26  ;;  %v8360_v26 = vld [vmem:[#allocation6 + $0xf8] sm:$0xff]   ;;  %v1121_v31 = vld [vmem:[#allocation2 + $0xda] sm:$0xff] }
  0xd9   : > { %6983 = vmatprep.subr.bf16.mxu0 %v8349_v29  ;;  %v2052_v8 = vld [vmem:[#allocation2 + $0x18a] sm:$0xff] }
  0xdb   : > { %6952 = vmatmul.mubr.bf16.gmra.mrb[8].mxu0 %v9198_v30 }
  0xdc   : > { %6955 = vmatprep.mubr.bf16.mxu0 %v9200_v40  ;;  %6984 = vmatpush3.bf16.msra.mxu0 %v8349_v29  ;;  %v1108_v29 = vld [vmem:[#allocation2 + $0x3a] sm:$0xff] }
  0xdd   : > { %6985 = vmatprep.subr.bf16.mxu0 %v8350_v39  ;;  %v9251_v7 = vpack.c.bf16 %v1108_v29, %v1107_v13  ;;  %v1125_v29 = vld [vmem:[#allocation2 + $0x10a] sm:$0xff] }
  0xe0   : > { %6986 = vmatpush3.bf16.msra.mxu0 %v8350_v39  ;;  %v9249_v39 = vpack.c.bf16 %v1106_v0, %v1105_v62  ;;  %v8361_v62 = vld [vmem:[#allocation6 + $0x100] sm:$0xff]   ;;  %v9273_v0 = vpack.c.bf16 %v1122_v38, %v1121_v31 }
  0xe1   : > { %6987 = vmatprep.subr.bf16.mxu0 %v8351_v21  ;;  %v1719_v31 = vld [vmem:[#allocation2 + $0x49] sm:$0xff] }
  0xe3   : > { %6956 = vmatmul.mubr.bf16.gmra.mrb[12].mxu0 %v9204_v22 }
  0xe4   : > { %6959 = vmatprep.mubr.bf16.mxu0 %v9206_v35  ;;  %6988 = vmatpush3.bf16.msra.mxu0 %v8351_v21  ;;  %v1111_v21 = vld [vmem:[#allocation2 + $0x62] sm:$0xff] }
  0xe5   : > { %6989 = vmatprep.subr.bf16.mxu0 %v8352_v34 }
  0xe8   : > { %6990 = vmatpush3.bf16.msra.mxu0 %v8352_v34  ;;  %v1112_v34 = vld [vmem:[#allocation2 + $0x6a] sm:$0xff] }
  0xe9   : > { %7023 = vmatprep.subr.bf16.mxu0 %v8353_v43  ;;  %v9257_v41 = vpack.c.bf16 %v1112_v34, %v1111_v21  ;;  %v9281_v34 = vpack.c.bf16 %v1128_v20, %v1127_v15  ;;  %v8372_v20 = vld [vmem:[#allocation6 + $0x158] sm:$0xff]  }
  0xeb   : > { %6960 = vmatmul.mubr.bf16.gmra.mrb[16].mxu0 %v9210_v48 }
  0xec   : > { %6963 = vmatprep.mubr.bf16.mxu0 %v9212_v27 }
  0xf3   : > { %6964 = vmatmul.mubr.bf16.gmra.mrb[20].mxu0 %v9216_v61 }
  0xf4   : > { %6967 = vmatprep.mubr.bf16.mxu0 %v9218_v10 }
  0xfb   : > { %6968 = vmatmul.mubr.bf16.gmra.mrb[24].mxu0 %v9234_v12 }
  0xfc   : > { %6971 = vmatprep.mubr.bf16.mxu0 %v9238_v25 }
 0x103   : > { %6972 = vmatmul.mubr.bf16.gmra.mrb[28].mxu0 %v9246_v55 }
 0x104   : > { %6991 = vmatprep.mubr.bf16.mxu0 %v1135_v19  ;;  %v1124_v19 = vld [vmem:[#allocation2 + $0xfa] sm:$0xff] }
 0x105   : > { %v9275_v13 = vpack.c.bf16 %v1124_v19, %v1123_v51  ;;  %v1722_v51 = vld [vmem:[#allocation2 + $0x69] sm:$0xff]  ;;  %v1723_v19 = vld [vmem:[#allocation2 + $0x79] sm:$0xff] }
 0x10b   : > { %6992 = vmatmul.mubr.bf16.vlgmr.msra.gmra.mrb[0].mxu0 %v9249_v39 }
 0x10c   : > { %7024 = vmatpush3.bf16.msra.mxu0 %v8353_v43  ;;  %6995 = vmatprep.mubr.bf16.mxu0 %v9251_v7  ;;  %v1113_v43 = vld [vmem:[#allocation2 + $0x7a] sm:$0xff] }
 0x10d   : > { %7025 = vmatprep.subr.bf16.mxu0 %v8354_v14  ;;  %v9261_v1 = vpack.c.bf16 %v1114_v50, %v1113_v43  ;;  %v1131_v43 = vld [vmem:[#allocation2 + $0x152] sm:$0xff]  ;;  %v1132_v50 = vld [vmem:[#allocation2 + $0x15a] sm:$0xff] }
 0x10e   : > { %v9287_v56 = vpack.c.bf16 %v1132_v50, %v1131_v43  ;;  %v8375_v43 = vld [vmem:[#allocation6 + $0x170] sm:$0xff]   ;;  %v8376_v50 = vld [vmem:[#allocation6 + $0x178] sm:$0xff]  }
 0x110   : > { %7026 = vmatpush3.bf16.msra.mxu0 %v8354_v14  ;;  %v1126_v14 = vld [vmem:[#allocation2 + $0x112] sm:$0xff] }
 0x111   : > { %7027 = vmatprep.subr.bf16.mxu0 %v8355_v36  ;;  %v9279_v21 = vpack.c.bf16 %v1126_v14, %v1125_v29  ;;  %v8371_v29 = vld [vmem:[#allocation6 + $0x150] sm:$0xff]  }
 0x113   : > { %6996 = vmatmul.mubr.bf16.gmra.mrb[4].mxu0 %v9255_v37 }
 0x114   : > { %6999 = vmatprep.mubr.bf16.mxu0 %v9257_v41  ;;  %7028 = vmatpush3.bf16.msra.mxu0 %v8355_v36  ;;  %v1129_v36 = vld [vmem:[#allocation2 + $0x13a] sm:$0xff] }
 0x115   : > { %7029 = vmatprep.subr.bf16.mxu0 %v8356_v42 }
 0x118   : > { %7030 = vmatpush3.bf16.msra.mxu0 %v8356_v42  ;;  %v1130_v42 = vld [vmem:[#allocation2 + $0x142] sm:$0xff] }
 0x119   : > { %7031 = vmatprep.subr.bf16.mxu0 %v8357_v57  ;;  %v9285_v28 = vpack.c.bf16 %v1130_v42, %v1129_v36  ;;  %v8373_v36 = vld [vmem:[#allocation6 + $0x160] sm:$0xff]   ;;  %v8374_v42 = vld [vmem:[#allocation6 + $0x168] sm:$0xff]  }
 0x11b   : > { %7000 = vmatmul.mubr.bf16.gmra.mrb[8].mxu0 %v9261_v1 }
 0x11c   : > { %7003 = vmatprep.mubr.bf16.mxu0 %v9263_v2  ;;  %7032 = vmatpush3.bf16.msra.mxu0 %v8357_v57  ;;  %v1133_v57 = vld [vmem:[#allocation2 + $0x16a] sm:$0xff] }
 0x11d   : > { %7033 = vmatprep.subr.bf16.mxu0 %v8358_v6 }
 0x120   : > { %7034 = vmatpush3.bf16.msra.mxu0 %v8358_v6  ;;  %v1134_v6 = vld [vmem:[#allocation2 + $0x172] sm:$0xff] }
 0x121   : > { %7035 = vmatprep.subr.bf16.mxu0 %v8359_v47  ;;  %v9291_v11 = vpack.c.bf16 %v1134_v6, %v1133_v57  ;;  %v8377_v57 = vld [vmem:[#allocation6 + $0x180] sm:$0xff]  }
 0x123   : > { %7004 = vmatmul.mubr.bf16.gmra.mrb[12].mxu0 %v9267_v53 }
 0x124   : > { %7007 = vmatprep.mubr.bf16.mxu0 %v9269_v5  ;;  %7036 = vmatpush3.bf16.msra.mxu0 %v8359_v47  ;;  %v8365_v47 = vld [vmem:[#allocation6 + $0x120] sm:$0xff]  }
 0x125   : > { %7037 = vmatprep.subr.bf16.mxu0 %v8360_v26 }
 0x128   : > { %7038 = vmatpush3.bf16.msra.mxu0 %v8360_v26 }
 0x129   : > { %7071 = vmatprep.subr.bf16.mxu0 %v8361_v62 }
 0x12b   : > { %7008 = vmatmul.mubr.bf16.gmra.mrb[16].mxu0 %v9273_v0 }
 0x12c   : > { %7011 = vmatprep.mubr.bf16.mxu0 %v9275_v13 }
 0x133   : > { %7012 = vmatmul.mubr.bf16.gmra.mrb[20].mxu0 %v9279_v21 }
 0x134   : > { %7015 = vmatprep.mubr.bf16.mxu0 %v9281_v34 }
 0x13b   : > { %7016 = vmatmul.mubr.bf16.gmra.mrb[24].mxu0 %v9285_v28 }
 0x13c   : > { %7019 = vmatprep.mubr.bf16.mxu0 %v9287_v56 }
 0x143   : > { %7020 = vmatmul.mubr.bf16.gmra.mrb[28].mxu0 %v9291_v11 }
 0x144   : > { %7039 = vmatprep.mubr.bf16.mxu0 %v9186_v17  ;;  %v8366_v17 = vld [vmem:[#allocation6 + $0x128] sm:$0xff]  }
 0x14b   : > { %7040 = vmatmul.mubr.bf16.vlgmr.msra.gmra.mrb[0].mxu0 %v9188_v24  ;;  %v8367_v24 = vld [vmem:[#allocation6 + $0x130] sm:$0xff]  }
 0x14c   : > { %7072 = vmatpush3.bf16.msra.mxu0 %v8361_v62  ;;  %7043 = vmatprep.mubr.bf16.mxu0 %v9192_v52  ;;  %v8368_v52 = vld [vmem:[#allocation6 + $0x138] sm:$0xff]  }
 0x14d   : > { %7073 = vmatprep.subr.bf16.mxu0 %v8362_v32  ;;  %v1724_v62 = vld [vmem:[#allocation2 + $0x81] sm:$0xff] }
 0x14e   : > { %v9320_v15 = vpack.c.bf16 %v1724_v62, %v1723_v19  ;;  %v8393_v19 = vld [vmem:[#allocation6 + $0x200] sm:$0xff]  }
 0x150   : > { %7074 = vmatpush3.bf16.msra.mxu0 %v8362_v32  ;;  %v2338_v32 = vld [vmem:[#allocation2 + $0xa8] sm:$0xff] }
 0x151   : > { %7075 = vmatprep.subr.bf16.mxu0 %v8363_v44 }
 0x153   : > { %7044 = vmatmul.mubr.bf16.gmra.mrb[4].mxu0 %v9194_v18  ;;  %v8369_v18 = vld [vmem:[#allocation6 + $0x140] sm:$0xff]  }
 0x154   : > { %7047 = vmatprep.mubr.bf16.mxu0 %v9198_v30  ;;  %7076 = vmatpush3.bf16.msra.mxu0 %v8363_v44  ;;  %v1439_v30 = vld [vmem:[#allocation2 + $0x180] sm:$0xff]  ;;  %v2339_v44 = vld [vmem:[#allocation2 + $0xb0] sm:$0xff] }
 0x155   : > { %7077 = vmatprep.subr.bf16.mxu0 %v8364_v45 }
 0x158   : > { %7078 = vmatpush3.bf16.msra.mxu0 %v8364_v45  ;;  %v2340_v45 = vld [vmem:[#allocation2 + $0xc0] sm:$0xff] }
 0x159   : > { %7079 = vmatprep.subr.bf16.mxu0 %v8365_v47 }
 0x15b   : > { %7048 = vmatmul.mubr.bf16.gmra.mrb[8].mxu0 %v9200_v40  ;;  %v1440_v40 = vld [vmem:[#allocation2 + $0x188] sm:$0xff] }
 0x15c   : > { %7051 = vmatprep.mubr.bf16.mxu0 %v9204_v22  ;;  %7080 = vmatpush3.bf16.msra.mxu0 %v8365_v47  ;;  %v1715_v22 = vld [vmem:[#allocation2 + $0x19] sm:$0xff]  ;;  %v2341_v47 = vld [vmem:[#allocation2 + $0xc8] sm:$0xff] }
 0x15d   : > { %7081 = vmatprep.subr.bf16.mxu0 %v8366_v17 }
 0x160   : > { %7082 = vmatpush3.bf16.msra.mxu0 %v8366_v17  ;;  %v8389_v17 = vld [vmem:[#allocation6 + $0x1e0] sm:$0xff]  }
 0x161   : > { %7083 = vmatprep.subr.bf16.mxu0 %v8367_v24 }
 0x163   : > { %7052 = vmatmul.mubr.bf16.gmra.mrb[12].mxu0 %v9206_v35  ;;  %v1716_v35 = vld [vmem:[#allocation2 + $0x21] sm:$0xff] }
 0x164   : > { %7055 = vmatprep.mubr.bf16.mxu0 %v9210_v48  ;;  %7084 = vmatpush3.bf16.msra.mxu0 %v8367_v24  ;;  %v9309_v48 = vpack.c.bf16 %v1440_v40, %v1439_v30  ;;  %v1747_v26 = vpack.c.bf16 %v1716_v35, %v1715_v22  ;;  %v2365_v24 = vpack.c.bf16 %v2339_v44, %v2338_v32  ;;  %v2342_v30 = vld [vmem:[#allocation2 + $0xd8] sm:$0xff]  ;;  %v2343_v40 = vld [vmem:[#allocation2 + $0xe0] sm:$0xff]  ;;  %v2344_v22 = vld [vmem:[#allocation2 + $0xf0] sm:$0xff] }
 0x165   : > { %7085 = vmatprep.subr.bf16.mxu0 %v8368_v52  ;;  %v2345_v35 = vld [vmem:[#allocation2 + $0xf8] sm:$0xff]  ;;  %v2655_v32 = vld [vmem:[#allocation2 + $0x129] sm:$0xff] }
 0x168   : > { %7086 = vmatpush3.bf16.msra.mxu0 %v8368_v52  ;;  %v2366_v52 = vpack.c.bf16 %v2341_v47, %v2340_v45  ;;  %v2656_v47 = vld [vmem:[#allocation2 + $0x139] sm:$0xff] }
 0x169   : > { %7119 = vmatprep.subr.bf16.mxu0 %v8369_v18 }
 0x16b   : > { %7056 = vmatmul.mubr.bf16.gmra.mrb[16].mxu0 %v9212_v27  ;;  %v1717_v27 = vld [vmem:[#allocation2 + $0x31] sm:$0xff] }
 0x16c   : > { %7059 = vmatprep.mubr.bf16.mxu0 %v9216_v61  ;;  %v1718_v61 = vld [vmem:[#allocation2 + $0x39] sm:$0xff] }
 0x16d   : > { %v9312_v38 = vpack.c.bf16 %v1718_v61, %v1717_v27  ;;  %v2367_v27 = vpack.c.bf16 %v2343_v40, %v2342_v30  ;;  %v2368_v61 = vpack.c.bf16 %v2345_v35, %v2344_v22  ;;  %v2660_v40 = vld [vmem:[#allocation2 + $0x169] sm:$0xff]  ;;  %v2661_v22 = vld [vmem:[#allocation2 + $0x171] sm:$0xff] }
 0x16e   : > { %v2679_v35 = vpack.c.bf16 %v2661_v22, %v2660_v40 }
 0x173   : > { %7060 = vmatmul.mubr.bf16.gmra.mrb[20].mxu0 %v9218_v10  ;;  %v1720_v10 = vld [vmem:[#allocation2 + $0x51] sm:$0xff] }
 0x174   : > { %7063 = vmatprep.mubr.bf16.mxu0 %v9234_v12  ;;  %v9314_v12 = vpack.c.bf16 %v1720_v10, %v1719_v31  ;;  %v8392_v31 = vld [vmem:[#allocation6 + $0x1f8] sm:$0xff]  }
 0x175   : > { %v2346_v10 = vld [vmem:[#allocation2 + $0x108] sm:$0xff] }
 0x17b   : > { %7064 = vmatmul.mubr.bf16.gmra.mrb[24].mxu0 %v9238_v25  ;;  %v8370_v25 = vld [vmem:[#allocation6 + $0x148] sm:$0xff]  }
 0x17c   : > { %7067 = vmatprep.mubr.bf16.mxu0 %v9246_v55  ;;  %v1721_v55 = vld [vmem:[#allocation2 + $0x61] sm:$0xff] }
 0x17d   : > { %v9318_v14 = vpack.c.bf16 %v1722_v51, %v1721_v55  ;;  %v2348_v55 = vld [vmem:[#allocation2 + $0x120] sm:$0xff]  ;;  %v2349_v51 = vld [vmem:[#allocation2 + $0x128] sm:$0xff] }
 0x183   : > { %7068 = vmatmul.mubr.bf16.gmra.mrb[28].mxu0 %v9309_v48 }
 0x184   : > { %7087 = vmatprep.mubr.bf16.mxu0 %v1747_v26  ;;  %v8391_v26 = vld [vmem:[#allocation6 + $0x1f0] sm:$0xff]  }
 0x18b   : > { %7088 = vmatmul.mubr.bf16.vlgmr.msra.gmra.mrb[0].mxu0 %v9312_v38 }
 0x18c   : > { %7120 = vmatpush3.bf16.msra.mxu0 %v8369_v18  ;;  %7091 = vmatprep.mubr.bf16.mxu0 %v9314_v12  ;;  %v8390_v18 = vld [vmem:[#allocation6 + $0x1e8] sm:$0xff]  }
 0x18d   : > { %7121 = vmatprep.subr.bf16.mxu0 %v8370_v25 }
 0x190   : > { %7122 = vmatpush3.bf16.msra.mxu0 %v8370_v25  ;;  %v2347_v25 = vld [vmem:[#allocation2 + $0x110] sm:$0xff] }
 0x191   : > { %7123 = vmatprep.subr.bf16.mxu0 %v8371_v29  ;;  %v2369_v62 = vpack.c.bf16 %v2347_v25, %v2346_v10 }
 0x193   : > { %7092 = vmatmul.mubr.bf16.gmra.mrb[4].mxu0 %v9318_v14 }
 0x194   : > { %7095 = vmatprep.mubr.bf16.mxu0 %v9320_v15  ;;  %7124 = vmatpush3.bf16.msra.mxu0 %v8371_v29  ;;  %v2370_v29 = vpack.c.bf16 %v2349_v51, %v2348_v55  ;;  %v2942_v55 = vld [vmem:[#allocation2 + $0x4a] sm:$0xff]  ;;  %v2943_v51 = vld [vmem:[#allocation2 + $0x52] sm:$0xff] }
 0x195   : > { %7125 = vmatprep.subr.bf16.mxu0 %v8372_v20 }
 0x198   : > { %7126 = vmatpush3.bf16.msra.mxu0 %v8372_v20  ;;  %v2350_v20 = vld [vmem:[#allocation2 + $0x138] sm:$0xff] }
 0x199   : > { %7127 = vmatprep.subr.bf16.mxu0 %v8373_v36 }
 0x19b   : > { %7096 = vmatmul.mubr.bf16.gmra.mrb[8].mxu0 %v9130_v33  ;;  %v9338_v33 = vpack.c.bf16 %v522_v23, %v521_v16  ;;  %v2329_v16 = vld [vmem:[#allocation2 + $0x38] sm:$0xff] }
 0x19c   : > { %7099 = vmatprep.mubr.bf16.mxu0 %v9137_v46  ;;  %7128 = vmatpush3.bf16.msra.mxu0 %v8373_v36  ;;  %v8378_v46 = vld [vmem:[#allocation6 + $0x188] sm:$0xff]   ;;  %v2351_v36 = vld [vmem:[#allocation2 + $0x140] sm:$0xff] }
 0x19d   : > { %7129 = vmatprep.subr.bf16.mxu0 %v8374_v42 }
 0x1a0   : > { %7130 = vmatpush3.bf16.msra.mxu0 %v8374_v42  ;;  %v2352_v42 = vld [vmem:[#allocation2 + $0x150] sm:$0xff] }
 0x1a1   : > { %7131 = vmatprep.subr.bf16.mxu0 %v8375_v43 }
 0x1a3   : > { %7100 = vmatmul.mubr.bf16.gmra.mrb[12].mxu0 %v9143_v49  ;;  %v8379_v49 = vld [vmem:[#allocation6 + $0x190] sm:$0xff]  }
 0x1a4   : > { %7103 = vmatprep.mubr.bf16.mxu0 %v9151_v54  ;;  %7132 = vmatpush3.bf16.msra.mxu0 %v8375_v43  ;;  %v8380_v54 = vld [vmem:[#allocation6 + $0x198] sm:$0xff]   ;;  %v2353_v43 = vld [vmem:[#allocation2 + $0x158] sm:$0xff] }
 0x1a5   : > { %7133 = vmatprep.subr.bf16.mxu0 %v8376_v50 }
 0x1a8   : > { %7134 = vmatpush3.bf16.msra.mxu0 %v8376_v50  ;;  %v2371_v50 = vpack.c.bf16 %v2351_v36, %v2350_v20  ;;  %v2946_v36 = vld [vmem:[#allocation2 + $0x7a] sm:$0xff] }
 0x1a9   : > { %7167 = vmatprep.subr.bf16.mxu0 %v8377_v57 }
 0x1ab   : > { %7104 = vmatmul.mubr.bf16.gmra.mrb[16].mxu0 %v9157_v58  ;;  %v8381_v58 = vld [vmem:[#allocation6 + $0x1a0] sm:$0xff]  }
 0x1ac   : > { %7107 = vmatprep.mubr.bf16.mxu0 %v9165_v59  ;;  %v8382_v59 = vld [vmem:[#allocation6 + $0x1a8] sm:$0xff]  }
 0x1b3   : > { %7108 = vmatmul.mubr.bf16.gmra.mrb[20].mxu0 %v9171_v60  ;;  %v8383_v60 = vld [vmem:[#allocation6 + $0x1b0] sm:$0xff]  }
 0x1b4   : > { %7111 = vmatprep.mubr.bf16.mxu0 %v9177_v63  ;;  %v8384_v63 = vld [vmem:[#allocation6 + $0x1b8] sm:$0xff]  }
 0x1bb   : > { %7112 = vmatmul.mubr.bf16.gmra.mrb[24].mxu0 %v9179_v3  ;;  %v8385_v3 = vld [vmem:[#allocation6 + $0x1c0] sm:$0xff]  }
 0x1bc   : > { %7115 = vmatprep.mubr.bf16.mxu0 %v9183_v4  ;;  %v2051_v4 = vld [vmem:[#allocation2 + $0x182] sm:$0xff] }
 0x1bd   : > { %v9356_v23 = vpack.c.bf16 %v2052_v8, %v2051_v4  ;;  %v8394_v4 = vld [vmem:[#allocation6 + $0x208] sm:$0xff]  }
 0x1be   : > { %v2643_v8 = vld [vmem:[#allocation2 + $0x99] sm:$0xff] }
 0x1c3   : > { %7116 = vmatmul.mubr.bf16.gmra.mrb[28].mxu0 %v9338_v33 }
 0x1c4   : > { %7135 = vmatprep.mubr.bf16.mxu0 %v9249_v39  ;;  %v2360_v39 = vpack.c.bf16 %v2329_v16, %v2328_v9  ;;  %v8395_v9 = vld [vmem:[#allocation6 + $0x210] sm:$0xff]  }
 0x1cb   : > { %7136 = vmatmul.mubr.bf16.vlgmr.msra.gmra.mrb[0].mxu0 %v9251_v7  ;;  %v2330_v7 = vld [vmem:[#allocation2 + $0x48] sm:$0xff] }
 0x1cc   : > { %7168 = vmatpush3.bf16.msra.mxu0 %v8377_v57  ;;  %7139 = vmatprep.mubr.bf16.mxu0 %v9255_v37  ;;  %v2331_v37 = vld [vmem:[#allocation2 + $0x50] sm:$0xff]  ;;  %v2372_v57 = vpack.c.bf16 %v2353_v43, %v2352_v42  ;;  %v2947_v42 = vld [vmem:[#allocation2 + $0x82] sm:$0xff] }
 0x1cd   : > { %7169 = vmatprep.subr.bf16.mxu0 %v8378_v46  ;;  %v2948_v43 = vld [vmem:[#allocation2 + $0x92] sm:$0xff] }
 0x1d0   : > { %7170 = vmatpush3.bf16.msra.mxu0 %v8378_v46  ;;  %v2354_v46 = vld [vmem:[#allocation2 + $0x168] sm:$0xff] }
 0x1d1   : > { %7171 = vmatprep.subr.bf16.mxu0 %v8379_v49 }
 0x1d3   : > { %7140 = vmatmul.mubr.bf16.gmra.mrb[4].mxu0 %v9257_v41  ;;  %v2332_v41 = vld [vmem:[#allocation2 + $0x60] sm:$0xff] }
 0x1d4   : > { %7143 = vmatprep.mubr.bf16.mxu0 %v9261_v1  ;;  %7172 = vmatpush3.bf16.msra.mxu0 %v8379_v49  ;;  %v2333_v1 = vld [vmem:[#allocation2 + $0x68] sm:$0xff]  ;;  %v2355_v49 = vld [vmem:[#allocation2 + $0x170] sm:$0xff] }
 0x1d5   : > { %7173 = vmatprep.subr.bf16.mxu0 %v8380_v54 }
 0x1d8   : > { %7174 = vmatpush3.bf16.msra.mxu0 %v8380_v54  ;;  %v2373_v54 = vpack.c.bf16 %v2355_v49, %v2354_v46  ;;  %v2950_v46 = vld [vmem:[#allocation2 + $0xaa] sm:$0xff]  ;;  %v2951_v49 = vld [vmem:[#allocation2 + $0xb2] sm:$0xff] }
 0x1d9   : > { %7175 = vmatprep.subr.bf16.mxu0 %v8381_v58 }
 0x1db   : > { %7144 = vmatmul.mubr.bf16.gmra.mrb[8].mxu0 %v9263_v2  ;;  %v2361_v2 = vpack.c.bf16 %v2331_v37, %v2330_v7  ;;  %v2645_v7 = vld [vmem:[#allocation2 + $0xb1] sm:$0xff]  ;;  %v2647_v37 = vld [vmem:[#allocation2 + $0xc9] sm:$0xff] }
 0x1dc   : > { %7147 = vmatprep.mubr.bf16.mxu0 %v9267_v53  ;;  %7176 = vmatpush3.bf16.msra.mxu0 %v8381_v58  ;;  %v2362_v53 = vpack.c.bf16 %v2333_v1, %v2332_v41  ;;  %v8475_v58 = vld [vmem:[#allocation2] sm:$0xff]  ;;  %v8397_v41 = vld [vmem:[#allocation6 + $0x220] sm:$0xff]  }
 0x1dd   : > { %7177 = vmatprep.subr.bf16.mxu0 %v8382_v59 }
 0x1e0   : > { %7178 = vmatpush3.bf16.msra.mxu0 %v8382_v59  ;;  %v9360_v59 = vpack.c.bf16 %v8475_v58, %v8475_v58  ;;  %v2953_v58 = vld [vmem:[#allocation2 + $0xca] sm:$0xff] }
 0x1e1   : > { %7179 = vmatprep.subr.bf16.mxu0 %v8383_v60 }
 0x1e3   : > { %7148 = vmatmul.mubr.bf16.gmra.mrb[12].mxu0 %v9269_v5  ;;  %v8386_v5 = vld [vmem:[#allocation6 + $0x1c8] sm:$0xff]  }
 0x1e4   : > { %7151 = vmatprep.mubr.bf16.mxu0 %v9273_v0  ;;  %7180 = vmatpush3.bf16.msra.mxu0 %v8383_v60  ;;  %v2334_v0 = vld [vmem:[#allocation2 + $0x78] sm:$0xff]  ;;  %v8401_v60 = vld [vmem:[#allocation8 + $0x40] sm:$0xff]  }
 0x1e5   : > { %7181 = vmatprep.subr.bf16.mxu0 %v8384_v63  ;;  %7311 = vmatprep.subr.bf16.mxu1 %v8401_v60 }
 0x1e6   : > { %7312 = vmatpush3.bf16.msra.mxu1 %v8401_v60  ;;  %v2977_v60 = vpack.c.bf16 %v2951_v49, %v2950_v46  ;;  %v8410_v49 = vld [vmem:[#allocation8 + $0x8] sm:$0xff]  }
 0x1e8   : > { %7182 = vmatpush3.bf16.msra.mxu0 %v8384_v63  ;;  %v8402_v63 = vld [vmem:[#allocation8 + $0x48] sm:$0xff]  }
 0x1e9   : > { %7215 = vmatprep.subr.bf16.mxu0 %v8385_v3  ;;  %7313 = vmatprep.subr.bf16.mxu1 %v8402_v63 }
 0x1ea   : > { %7314 = vmatpush3.bf16.msra.mxu1 %v8402_v63 }
 0x1eb   : > { %7152 = vmatmul.mubr.bf16.gmra.mrb[16].mxu0 %v9275_v13  ;;  %v2335_v13 = vld [vmem:[#allocation2 + $0x80] sm:$0xff] }
 0x1ec   : > { %7155 = vmatprep.mubr.bf16.mxu0 %v9279_v21  ;;  %v2336_v21 = vld [vmem:[#allocation2 + $0x90] sm:$0xff] }
 0x1f3   : > { %7156 = vmatmul.mubr.bf16.gmra.mrb[20].mxu0 %v9281_v34  ;;  %v2337_v34 = vld [vmem:[#allocation2 + $0x98] sm:$0xff] }
 0x1f4   : > { %7159 = vmatprep.mubr.bf16.mxu0 %v9285_v28  ;;  %v8387_v28 = vld [vmem:[#allocation6 + $0x1d0] sm:$0xff]   ;;  %v2364_v6 = vpack.c.bf16 %v2337_v34, %v2336_v21 }
 0x1fb   : > { %7160 = vmatmul.mubr.bf16.gmra.mrb[24].mxu0 %v9287_v56  ;;  %v2363_v56 = vpack.c.bf16 %v2335_v13, %v2334_v0  ;;  %v2650_v0 = vld [vmem:[#allocation2 + $0xf1] sm:$0xff]  ;;  %v8399_v13 = vld [vmem:[#allocation6 + $0x230] sm:$0xff]  }
 0x1fc   : > { %7163 = vmatprep.mubr.bf16.mxu0 %v9291_v11  ;;  %v8388_v11 = vld [vmem:[#allocation6 + $0x1d8] sm:$0xff]  }
 0x203   : > { %7164 = vmatmul.mubr.bf16.gmra.mrb[28].mxu0 %v9356_v23 }
 0x204   : > { %7183 = vmatprep.mubr.bf16.mxu0 %v2360_v39  ;;  %v2644_v39 = vld [vmem:[#allocation2 + $0xa9] sm:$0xff] }
 0x20b   : > { %7184 = vmatmul.mubr.bf16.vlgmr.msra.gmra.mrb[0].mxu0 %v2361_v2  ;;  %v8398_v2 = vld [vmem:[#allocation6 + $0x228] sm:$0xff]  }
 0x20c   : > { %7216 = vmatpush3.bf16.msra.mxu0 %v8385_v3  ;;  %7187 = vmatprep.mubr.bf16.mxu0 %v2362_v53  ;;  %v8403_v3 = vld [vmem:[#allocation8 + $0x50] sm:$0xff]  }
 0x20d   : > { %7217 = vmatprep.subr.bf16.mxu0 %v8386_v5  ;;  %7315 = vmatprep.subr.bf16.mxu1 %v8403_v3  ;;  %v2648_v53 = vld [vmem:[#allocation2 + $0xd9] sm:$0xff] }
 0x20e   : > { %7316 = vmatpush3.bf16.msra.mxu1 %v8403_v3  ;;  %v2954_v3 = vld [vmem:[#allocation2 + $0xda] sm:$0xff] }
 0x210   : > { %7218 = vmatpush3.bf16.msra.mxu0 %v8386_v5  ;;  %v2649_v5 = vld [vmem:[#allocation2 + $0xe1] sm:$0xff] }
 0x211   : > { %7219 = vmatprep.subr.bf16.mxu0 %v8387_v28  ;;  %v2673_v21 = vpack.c.bf16 %v2649_v5, %v2648_v53  ;;  %v2965_v53 = vld [vmem:[#allocation2 + $0x15a] sm:$0xff] }
 0x213   : > { %7188 = vmatmul.mubr.bf16.gmra.mrb[4].mxu0 %v2363_v56  ;;  %v2652_v56 = vld [vmem:[#allocation2 + $0x109] sm:$0xff] }
 0x214   : > { %7191 = vmatprep.mubr.bf16.mxu0 %v2364_v6  ;;  %7220 = vmatpush3.bf16.msra.mxu0 %v8387_v28  ;;  %v8400_v28 = vld [vmem:[#allocation6 + $0x238] sm:$0xff]   ;;  %v2653_v6 = vld [vmem:[#allocation2 + $0x111] sm:$0xff] }
 0x215   : > { %7221 = vmatprep.subr.bf16.mxu0 %v8388_v11  ;;  %v2675_v44 = vpack.c.bf16 %v2653_v6, %v2652_v56  ;;  %v8404_v6 = vld [vmem:[#allocation8 + $0x58] sm:$0xff]  }
 0x216   : > { %7317 = vmatprep.subr.bf16.mxu1 %v8404_v6 }
 0x217   : > { %7318 = vmatpush3.bf16.msra.mxu1 %v8404_v6 }
 0x218   : > { %7222 = vmatpush3.bf16.msra.mxu0 %v8388_v11  ;;  %v2654_v11 = vld [vmem:[#allocation2 + $0x121] sm:$0xff] }
 0x219   : > { %7223 = vmatprep.subr.bf16.mxu0 %v8389_v17  ;;  %v2676_v45 = vpack.c.bf16 %v2655_v32, %v2654_v11  ;;  %v8405_v11 = vld [vmem:[#allocation8 + $0x60] sm:$0xff]   ;;  %v8406_v32 = vld [vmem:[#allocation8 + $0x68] sm:$0xff]  }
 0x21a   : > { %7319 = vmatprep.subr.bf16.mxu1 %v8405_v11 }
 0x21b   : > { %7192 = vmatmul.mubr.bf16.gmra.mrb[8].mxu0 %v2365_v24  ;;  %v2658_v24 = vld [vmem:[#allocation2 + $0x151] sm:$0xff]  ;;  %7320 = vmatpush3.bf16.msra.mxu1 %v8405_v11 }
 0x21c   : > { %7195 = vmatprep.mubr.bf16.mxu0 %v2366_v52  ;;  %7224 = vmatpush3.bf16.msra.mxu0 %v8389_v17  ;;  %v2657_v17 = vld [vmem:[#allocation2 + $0x141] sm:$0xff]  ;;  %v2659_v52 = vld [vmem:[#allocation2 + $0x159] sm:$0xff]  ;;  %v8413_v11 = vld [vmem:[#allocation8 + $0x20] sm:$0xff]  }
 0x21d   : > { %7225 = vmatprep.subr.bf16.mxu0 %v8390_v18  ;;  %v2678_v30 = vpack.c.bf16 %v2659_v52, %v2658_v24  ;;  %7321 = vmatprep.subr.bf16.mxu1 %v8406_v32  ;;  %v8409_v24 = vld [vmem:[#allocation8] sm:$0xff]   ;;  %v9372_v52 = vld [vmem:[%s9777_s4] ss:$0 sm:$0xff] }
 0x21f   : > { %7322 = vmatpush3.bf16.msra.mxu1 %v8406_v32 }
 0x220   : > { %7226 = vmatpush3.bf16.msra.mxu0 %v8390_v18  ;;  %v2677_v18 = vpack.c.bf16 %v2657_v17, %v2656_v47  ;;  %v3452_v47 = vld [vmem:[#allocation2 + $0x1] sm:$0xff] }
 0x221   : > { %7227 = vmatprep.subr.bf16.mxu0 %v8391_v26 }
 0x223   : > { %7196 = vmatmul.mubr.bf16.gmra.mrb[12].mxu0 %v2367_v27  ;;  %v2665_v27 = vld [vmem:[#allocation2 + $0x1a1] sm:$0xff] }
 0x224   : > { %7199 = vmatprep.mubr.bf16.mxu0 %v2368_v61  ;;  %7228 = vmatpush3.bf16.msra.mxu0 %v8391_v26  ;;  %v2664_v26 = vld [vmem:[#allocation2 + $0x199] sm:$0xff] }
 0x225   : > { %7229 = vmatprep.subr.bf16.mxu0 %v8392_v31  ;;  %v2940_v61 = vld [vmem:[#allocation2 + $0x32] sm:$0xff]  ;;  %v2681_v10 = vpack.c.bf16 %v2665_v27, %v2664_v26 }
 0x228   : > { %7230 = vmatpush3.bf16.msra.mxu0 %v8392_v31  ;;  %v2941_v31 = vld [vmem:[#allocation2 + $0x3a] sm:$0xff] }
 0x229   : > { %7263 = vmatprep.subr.bf16.mxu0 %v8393_v19  ;;  %v2972_v25 = vpack.c.bf16 %v2941_v31, %v2940_v61 }
 0x22b   : > { %7200 = vmatmul.mubr.bf16.gmra.mrb[16].mxu0 %v2369_v62  ;;  %v2945_v62 = vld [vmem:[#allocation2 + $0x6a] sm:$0xff] }
 0x22c   : > { %7203 = vmatprep.mubr.bf16.mxu0 %v2370_v29  ;;  %v2973_v29 = vpack.c.bf16 %v2943_v51, %v2942_v55 }
 0x233   : > { %7204 = vmatmul.mubr.bf16.gmra.mrb[20].mxu0 %v2371_v50  ;;  %v2975_v50 = vpack.c.bf16 %v2947_v42, %v2946_v36 }
 0x234   : > { %7207 = vmatprep.mubr.bf16.mxu0 %v2372_v57 }
 0x23b   : > { %7208 = vmatmul.mubr.bf16.gmra.mrb[24].mxu0 %v2373_v54  ;;  %v2952_v54 = vld [vmem:[#allocation2 + $0xc2] sm:$0xff] }
 0x23c   : > { %7211 = vmatprep.mubr.bf16.mxu0 %v9309_v48  ;;  %v2642_v48 = vld [vmem:[#allocation2 + $0x91] sm:$0xff]  ;;  %v2978_v63 = vpack.c.bf16 %v2953_v58, %v2952_v54 }
 0x23d   : > { %v2670_v16 = vpack.c.bf16 %v2643_v8, %v2642_v48  ;;  %v2956_v48 = vld [vmem:[#allocation2 + $0xf2] sm:$0xff]  ;;  %v2957_v8 = vld [vmem:[#allocation2 + $0xfa] sm:$0xff] }
 0x243   : > { %7212 = vmatmul.mubr.bf16.gmra.mrb[28].mxu0 %v9360_v59 }
 0x244   : > { %7231 = vmatprep.mubr.bf16.mxu0 %v9312_v38  ;;  %v8396_v38 = vld [vmem:[#allocation6 + $0x218] sm:$0xff]  }
 0x24b   : > { %7232 = vmatmul.mubr.bf16.vlgmr.msra.gmra.mrb[0].mxu0 %v9314_v12  ;;  %v2646_v12 = vld [vmem:[#allocation2 + $0xc1] sm:$0xff] }
 0x24c   : > { %7264 = vmatpush3.bf16.msra.mxu0 %v8393_v19  ;;  %7235 = vmatprep.mubr.bf16.mxu0 %v9318_v14  ;;  %v2671_v14 = vpack.c.bf16 %v2645_v7, %v2644_v39  ;;  %v2672_v1 = vpack.c.bf16 %v2647_v37, %v2646_v12  ;;  %v2944_v19 = vld [vmem:[#allocation2 + $0x62] sm:$0xff]  ;;  %v2959_v39 = vld [vmem:[#allocation2 + $0x112] sm:$0xff]  ;;  %v2961_v12 = vld [vmem:[#allocation2 + $0x12a] sm:$0xff] }
 0x24d   : > { %7265 = vmatprep.subr.bf16.mxu0 %v8394_v4  ;;  %v2974_v20 = vpack.c.bf16 %v2945_v62, %v2944_v19  ;;  %v2960_v7 = vld [vmem:[#allocation2 + $0x122] sm:$0xff] }
 0x250   : > { %7266 = vmatpush3.bf16.msra.mxu0 %v8394_v4  ;;  %v2955_v4 = vld [vmem:[#allocation2 + $0xe2] sm:$0xff] }
 0x251   : > { %7267 = vmatprep.subr.bf16.mxu0 %v8395_v9 }
 0x253   : > { %7236 = vmatmul.mubr.bf16.gmra.mrb[4].mxu0 %v9320_v15  ;;  %v2651_v15 = vld [vmem:[#allocation2 + $0xf9] sm:$0xff] }
 0x254   : > { %7239 = vmatprep.mubr.bf16.mxu0 %v2670_v16  ;;  %7268 = vmatpush3.bf16.msra.mxu0 %v8395_v9  ;;  %v2674_v34 = vpack.c.bf16 %v2651_v15, %v2650_v0  ;;  %v2979_v9 = vpack.c.bf16 %v2955_v4, %v2954_v3  ;;  %v2980_v16 = vpack.c.bf16 %v2957_v8, %v2956_v48  ;;  %v2966_v15 = vld [vmem:[#allocation2 + $0x16a] sm:$0xff] }
 0x255   : > { %7269 = vmatprep.subr.bf16.mxu0 %v8396_v38 }
 0x258   : > { %7270 = vmatpush3.bf16.msra.mxu0 %v8396_v38  ;;  %v2958_v38 = vld [vmem:[#allocation2 + $0x10a] sm:$0xff] }
 0x259   : > { %7271 = vmatprep.subr.bf16.mxu0 %v8397_v41  ;;  %v2981_v37 = vpack.c.bf16 %v2959_v39, %v2958_v38 }
 0x25b   : > { %7240 = vmatmul.mubr.bf16.gmra.mrb[8].mxu0 %v2671_v14  ;;  %v2962_v14 = vld [vmem:[#allocation2 + $0x13a] sm:$0xff] }
 0x25c   : > { %7243 = vmatprep.mubr.bf16.mxu0 %v2672_v1  ;;  %7272 = vmatpush3.bf16.msra.mxu0 %v8397_v41  ;;  %v2982_v41 = vpack.c.bf16 %v2961_v12, %v2960_v7  ;;  %v2963_v1 = vld [vmem:[#allocation2 + $0x142] sm:$0xff] }
 0x25d   : > { %7273 = vmatprep.subr.bf16.mxu0 %v8398_v2  ;;  %v2983_v5 = vpack.c.bf16 %v2963_v1, %v2962_v14 }
 0x260   : > { %7274 = vmatpush3.bf16.msra.mxu0 %v8398_v2  ;;  %v2964_v2 = vld [vmem:[#allocation2 + $0x152] sm:$0xff] }
 0x261   : > { %7275 = vmatprep.subr.bf16.mxu0 %v8399_v13  ;;  %v2984_v0 = vpack.c.bf16 %v2965_v53, %v2964_v2  ;;  %v8412_v53 = vld [vmem:[#allocation8 + $0x18] sm:$0xff]  }
 0x263   : > { %7244 = vmatmul.mubr.bf16.gmra.mrb[12].mxu0 %v2673_v21 }
 0x264   : > { %7247 = vmatprep.mubr.bf16.mxu0 %v2674_v34  ;;  %7276 = vmatpush3.bf16.msra.mxu0 %v8399_v13  ;;  %v2967_v13 = vld [vmem:[#allocation2 + $0x172] sm:$0xff]  ;;  %v2970_v34 = vld [vmem:[#allocation2 + $0x19a] sm:$0xff] }
 0x265   : > { %7277 = vmatprep.subr.bf16.mxu0 %v8400_v28  ;;  %v2985_v21 = vpack.c.bf16 %v2967_v13, %v2966_v15 }
 0x268   : > { %7278 = vmatpush3.bf16.msra.mxu0 %v8400_v28  ;;  %v2971_v28 = vld [vmem:[#allocation2 + $0x1a2] sm:$0xff] }
 0x269   : > { %v2987_v56 = vpack.c.bf16 %v2971_v28, %v2970_v34 }
 0x26b   : > { %7248 = vmatmul.mubr.bf16.gmra.mrb[16].mxu0 %v2675_v44  ;;  %v8407_v44 = vld [vmem:[#allocation8 + $0x70] sm:$0xff]  }
 0x26c   : > { %7251 = vmatprep.mubr.bf16.mxu0 %v2676_v45  ;;  %7323 = vmatprep.subr.bf16.mxu1 %v8407_v44  ;;  %v8408_v45 = vld [vmem:[#allocation8 + $0x78] sm:$0xff]  }
 0x26d   : > { %7324 = vmatpush3.bf16.msra.mxu1 %v8407_v44 }
 0x26e   : > { %7325 = vmatprep.subr.bf16.mxu1 %v8408_v45 }
 0x271   : > { %7326 = vmatpush3.bf16.msra.mxu1 %v8408_v45 }
 0x272   : > { %7359 = vmatprep.subr.bf16.mxu1 %v8409_v24 }
 0x273   : > { %7252 = vmatmul.mubr.bf16.gmra.mrb[20].mxu0 %v2677_v18 }
 0x274   : > { %7255 = vmatprep.mubr.bf16.mxu0 %v2678_v30  ;;  %v9377_v30 = vld [vmem:[%s9778_s5] ss:$0 sm:$0xff] }
 0x27b   : > { %7256 = vmatmul.mubr.bf16.gmra.mrb[24].mxu0 %v2679_v35 }
 0x27c   : > { %7259 = vmatprep.mubr.bf16.mxu0 %v9338_v33  ;;  %v2949_v33 = vld [vmem:[#allocation2 + $0x9a] sm:$0xff] }
 0x27d   : > { %v2976_v57 = vpack.c.bf16 %v2949_v33, %v2948_v43 }
 0x283   : > { %7260 = vmatmul.mubr.bf16.gmra.mrb[28].mxu0 %v2681_v10 }
 0x284   : > { %7279 = vmatprep.mubr.bf16.mxu0 %v2972_v25 }
 0x28b   : > { %7280 = vmatmul.mubr.bf16.vlgmr.msra.gmra.mrb[0].mxu0 %v2973_v29 }
 0x28c   : > { %7283 = vmatprep.mubr.bf16.mxu0 %v2974_v20 }
 0x293   : > { %7284 = vmatmul.mubr.bf16.gmra.mrb[4].mxu0 %v2975_v50 }
 0x294   : > { %7287 = vmatprep.mubr.bf16.mxu0 %v2976_v57 }
 0x29b   : > { %7288 = vmatmul.mubr.bf16.gmra.mrb[8].mxu0 %v2977_v60 }
 0x29c   : > { %7291 = vmatprep.mubr.bf16.mxu0 %v2978_v63 }
 0x2a3   : > { %7292 = vmatmul.mubr.bf16.gmra.mrb[12].mxu0 %v2979_v9 }
 0x2a4   : > { %7295 = vmatprep.mubr.bf16.mxu0 %v2980_v16  ;;  %v8411_v16 = vld [vmem:[#allocation8 + $0x10] sm:$0xff]  }
 0x2ab   : > { %7296 = vmatmul.mubr.bf16.gmra.mrb[16].mxu0 %v2981_v37 }
 0x2ac   : > { %7299 = vmatprep.mubr.bf16.mxu0 %v2982_v41 }
 0x2b3   : > { %7300 = vmatmul.mubr.bf16.gmra.mrb[20].mxu0 %v2983_v5 }
 0x2b4   : > { %7303 = vmatprep.mubr.bf16.mxu0 %v2984_v0 }
 0x2bb   : > { %7304 = vmatmul.mubr.bf16.gmra.mrb[24].mxu0 %v2985_v21 }
 0x2bc   : > { %7307 = vmatprep.mubr.bf16.mxu0 %v9356_v23  ;;  %v3453_v23 = vld [vmem:[#allocation2 + $0x9] sm:$0xff] }
 0x2bd   : > { %v3484_v17 = vpack.c.bf16 %v3453_v23, %v3452_v47 }
 0x2bf   : > { %7327 = vmatprep.mubr.bf16.mxu1 %v3484_v17 }
 0x2c3   : > { %7308 = vmatmul.mubr.bf16.gmra.mrb[28].mxu0 %v2987_v56 }
 0x35e   : > { %v7281_v18 = vpop.f32.mrb[0].mxu0 }
 0x35f   : > { %v3255_v40 = vmul.f32 %v7281_v18, %v9372_v52  ;;  %v3087_v22 = vpop.f32.mrb[1].mxu0 }
 0x360   : > { %v3253_v35 = vmul.f32 %v9372_v52, %v3087_v22  ;;  %v7282_v26 = vpop.f32.mrb[2].mxu0  ;;  %v8414_v22 = vld [vmem:[#allocation8 + $0x28] sm:$0xff]  }
 0x361   : > { %v3294_v27 = vadd.f32 %v9377_v30, %v3255_v40  ;;  %v3256_v61 = vmul.f32 %v7282_v26, %v9372_v52  ;;  %v3090_v31 = vpop.f32.mrb[3].mxu0 }
 0x362   : > { %v3292_v10 = vadd.f32 %v9377_v30, %v3253_v35  ;;  %v3254_v25 = vmul.f32 %v9372_v52, %v3090_v31 }
 0x363   : > { %v3326_v55 = vmax.f32 %v3294_v27, 0.0  ;;  %v3295_v51 = vadd.f32 %v9377_v30, %v3256_v61 }
 0x364   : > { %v3324_v19 = vmax.f32 %v3292_v10, 0.0  ;;  %v3293_v62 = vadd.f32 %v9377_v30, %v3254_v25 }
 0x365   : > { %3358 = vst [vmem:[#allocation2 + $0x31] sm:$0xff] %v3326_v55  ;;  %v3327_v29 = vmax.f32 %v3295_v51, 0.0 }
 0x366   : > { %3356 = vst [vmem:[#allocation2 + $0x19] sm:$0xff] %v3324_v19  ;;  %v3325_v20 = vmax.f32 %v3293_v62, 0.0  ;;  %v7285_v36 = vpop.f32.mrb[4].mxu0 }
 0x367   : > { %3359 = vst [vmem:[#allocation2 + $0x39] sm:$0xff] %v3327_v29  ;;  %v3259_v42 = vmul.f32 %v7285_v36, %v9372_v52  ;;  %v3103_v43 = vpop.f32.mrb[5].mxu0  ;;  %v3486_v33 = vpack.c.bf16 %v3327_v29, %v3326_v55 }
 0x368   : > { %3357 = vst [vmem:[#allocation2 + $0x21] sm:$0xff] %v3325_v20  ;;  %v3257_v50 = vmul.f32 %v9372_v52, %v3103_v43  ;;  %v7286_v57 = vpop.f32.mrb[6].mxu0  ;;  %v3485_v46 = vpack.c.bf16 %v3325_v20, %v3324_v19  ;;  %v8415_v19 = vld [vmem:[#allocation8 + $0x30] sm:$0xff]  }
 0x369   : > { %v3298_v54 = vadd.f32 %v9377_v30, %v3259_v42  ;;  %v3260_v58 = vmul.f32 %v7286_v57, %v9372_v52  ;;  %v3106_v60 = vpop.f32.mrb[7].mxu0 }
 0x36a   : > { %v3296_v63 = vadd.f32 %v9377_v30, %v3257_v50  ;;  %v3258_v3 = vmul.f32 %v9372_v52, %v3106_v60  ;;  %7328 = vmatmul.mubr.bf16.vlgmr.msra.gmra.mrb[0].mxu1 %v3485_v46  ;;  %v8416_v46 = vld [vmem:[#allocation8 + $0x38] sm:$0xff]  }
 0x36b   : > { %v3330_v4 = vmax.f32 %v3298_v54, 0.0  ;;  %v3299_v48 = vadd.f32 %v9377_v30, %v3260_v58  ;;  %7331 = vmatprep.mubr.bf16.mxu1 %v3486_v33  ;;  %7360 = vmatpush3.bf16.msra.mxu1 %v8409_v24 }
 0x36c   : > { %v3328_v8 = vmax.f32 %v3296_v63, 0.0  ;;  %v3297_v9 = vadd.f32 %v9377_v30, %v3258_v3  ;;  %7361 = vmatprep.subr.bf16.mxu1 %v8410_v49 }
 0x36d   : > { %3362 = vst [vmem:[#allocation2 + $0x61] sm:$0xff] %v3330_v4  ;;  %v3331_v38 = vmax.f32 %v3299_v48, 0.0 }
 0x36e   : > { %3360 = vst [vmem:[#allocation2 + $0x49] sm:$0xff] %v3328_v8  ;;  %v3329_v39 = vmax.f32 %v3297_v9, 0.0  ;;  %v7289_v7 = vpop.f32.mrb[8].mxu0  ;;  %v9419_v9 = vld [vmem:[#allocation8 + $0x80] sm:$0xff]  }
 0x36f   : > { %3363 = vst [vmem:[#allocation2 + $0x69] sm:$0xff] %v3331_v38  ;;  %v3263_v12 = vmul.f32 %v7289_v7, %v9372_v52  ;;  %v3119_v37 = vpop.f32.mrb[9].mxu0  ;;  %v3488_v41 = vpack.c.bf16 %v3331_v38, %v3330_v4  ;;  %7362 = vmatpush3.bf16.msra.mxu1 %v8410_v49 }
 0x370   : > { %3361 = vst [vmem:[#allocation2 + $0x51] sm:$0xff] %v3329_v39  ;;  %v3261_v14 = vmul.f32 %v9372_v52, %v3119_v37  ;;  %v7290_v1 = vpop.f32.mrb[10].mxu0  ;;  %v3487_v2 = vpack.c.bf16 %v3329_v39, %v3328_v8  ;;  %7363 = vmatprep.subr.bf16.mxu1 %v8411_v16 }
 0x371   : > { %v3302_v5 = vadd.f32 %v9377_v30, %v3263_v12  ;;  %v3264_v0 = vmul.f32 %v7290_v1, %v9372_v52  ;;  %v3122_v15 = vpop.f32.mrb[11].mxu0 }
 0x372   : > { %v3300_v13 = vadd.f32 %v9377_v30, %v3261_v14  ;;  %v3262_v21 = vmul.f32 %v9372_v52, %v3122_v15  ;;  %7332 = vmatmul.mubr.bf16.gmra.mrb[4].mxu1 %v3487_v2 }
 0x373   : > { %v3334_v34 = vmax.f32 %v3302_v5, 0.0  ;;  %v3303_v28 = vadd.f32 %v9377_v30, %v3264_v0  ;;  %7335 = vmatprep.mubr.bf16.mxu1 %v3488_v41  ;;  %7364 = vmatpush3.bf16.msra.mxu1 %v8411_v16 }
 0x374   : > { %v3332_v56 = vmax.f32 %v3300_v13, 0.0  ;;  %v3301_v6 = vadd.f32 %v9377_v30, %v3262_v21  ;;  %7365 = vmatprep.subr.bf16.mxu1 %v8412_v53 }
 0x375   : > { %3366 = vst [vmem:[#allocation2 + $0x91] sm:$0xff] %v3334_v34  ;;  %v3335_v32 = vmax.f32 %v3303_v28, 0.0 }
 0x376   : > { %3364 = vst [vmem:[#allocation2 + $0x79] sm:$0xff] %v3332_v56  ;;  %v3333_v44 = vmax.f32 %v3301_v6, 0.0  ;;  %v7293_v45 = vpop.f32.mrb[12].mxu0 }
 0x377   : > { %3367 = vst [vmem:[#allocation2 + $0x99] sm:$0xff] %v3335_v32  ;;  %v3267_v47 = vmul.f32 %v7293_v45, %v9372_v52  ;;  %v3135_v23 = vpop.f32.mrb[13].mxu0  ;;  %v3490_v17 = vpack.c.bf16 %v3335_v32, %v3334_v34  ;;  %7366 = vmatpush3.bf16.msra.mxu1 %v8412_v53 }
 0x378   : > { %3365 = vst [vmem:[#allocation2 + $0x81] sm:$0xff] %v3333_v44  ;;  %v3265_v24 = vmul.f32 %v9372_v52, %v3135_v23  ;;  %v7294_v18 = vpop.f32.mrb[14].mxu0  ;;  %v3489_v40 = vpack.c.bf16 %v3333_v44, %v3332_v56  ;;  %7367 = vmatprep.subr.bf16.mxu1 %v8413_v11 }
 0x379   : > { %v3306_v35 = vadd.f32 %v9377_v30, %v3267_v47  ;;  %v3268_v26 = vmul.f32 %v7294_v18, %v9372_v52  ;;  %v3138_v27 = vpop.f32.mrb[15].mxu0 }
 0x37a   : > { %v3304_v61 = vadd.f32 %v9377_v30, %v3265_v24  ;;  %v3266_v31 = vmul.f32 %v9372_v52, %v3138_v27  ;;  %7336 = vmatmul.mubr.bf16.gmra.mrb[8].mxu1 %v3489_v40 }
 0x37b   : > { %v3338_v10 = vmax.f32 %v3306_v35, 0.0  ;;  %v3307_v25 = vadd.f32 %v9377_v30, %v3268_v26  ;;  %7339 = vmatprep.mubr.bf16.mxu1 %v3490_v17  ;;  %7368 = vmatpush3.bf16.msra.mxu1 %v8413_v11 }
 0x37c   : > { %v3336_v55 = vmax.f32 %v3304_v61, 0.0  ;;  %v3305_v51 = vadd.f32 %v9377_v30, %v3266_v31  ;;  %7369 = vmatprep.subr.bf16.mxu1 %v8414_v22 }
 0x37d   : > { %3370 = vst [vmem:[#allocation2 + $0xc1] sm:$0xff] %v3338_v10  ;;  %v3339_v62 = vmax.f32 %v3307_v25, 0.0 }
 0x37e   : > { %3368 = vst [vmem:[#allocation2 + $0xa9] sm:$0xff] %v3336_v55  ;;  %v3337_v29 = vmax.f32 %v3305_v51, 0.0  ;;  %v7297_v20 = vpop.f32.mrb[16].mxu0 }
 0x37f   : > { %3371 = vst [vmem:[#allocation2 + $0xc9] sm:$0xff] %v3339_v62  ;;  %v3271_v36 = vmul.f32 %v7297_v20, %v9372_v52  ;;  %v3151_v42 = vpop.f32.mrb[17].mxu0  ;;  %v3492_v43 = vpack.c.bf16 %v3339_v62, %v3338_v10  ;;  %7370 = vmatpush3.bf16.msra.mxu1 %v8414_v22 }
 0x380   : > { %3369 = vst [vmem:[#allocation2 + $0xb1] sm:$0xff] %v3337_v29  ;;  %v3269_v33 = vmul.f32 %v9372_v52, %v3151_v42  ;;  %v7298_v50 = vpop.f32.mrb[18].mxu0  ;;  %v3491_v57 = vpack.c.bf16 %v3337_v29, %v3336_v55  ;;  %7371 = vmatprep.subr.bf16.mxu1 %v8415_v19 }
 0x381   : > { %v3310_v49 = vadd.f32 %v9377_v30, %v3271_v36  ;;  %v3272_v54 = vmul.f32 %v7298_v50, %v9372_v52  ;;  %v3154_v58 = vpop.f32.mrb[19].mxu0 }
 0x382   : > { %v3308_v60 = vadd.f32 %v9377_v30, %v3269_v33  ;;  %v3270_v63 = vmul.f32 %v9372_v52, %v3154_v58  ;;  %7340 = vmatmul.mubr.bf16.gmra.mrb[12].mxu1 %v3491_v57 }
 0x383   : > { %v3342_v3 = vmax.f32 %v3310_v49, 0.0  ;;  %v3311_v4 = vadd.f32 %v9377_v30, %v3272_v54  ;;  %7343 = vmatprep.mubr.bf16.mxu1 %v3492_v43  ;;  %7372 = vmatpush3.bf16.msra.mxu1 %v8415_v19 }
 0x384   : > { %v3340_v48 = vmax.f32 %v3308_v60, 0.0  ;;  %v3309_v8 = vadd.f32 %v9377_v30, %v3270_v63  ;;  %7373 = vmatprep.subr.bf16.mxu1 %v8416_v46 }
 0x385   : > { %3374 = vst [vmem:[#allocation2 + $0xf1] sm:$0xff] %v3342_v3  ;;  %v9421_v16 = vmax.f32 %v3311_v4, 0.0 }
 0x386   : > { %3372 = vst [vmem:[#allocation2 + $0xd9] sm:$0xff] %v3340_v48  ;;  %v3341_v38 = vmax.f32 %v3309_v8, 0.0  ;;  %v7301_v39 = vpop.f32.mrb[20].mxu0  ;;  %v3390_v8 = vld [vmem:[#allocation2 + $0x18] sm:$0xff] }
 0x387   : > { %3375 = vst [vmem:[#allocation2 + $0xf9] sm:$0xff] %v9421_v16  ;;  %v3275_v7 = vmul.f32 %v7301_v39, %v9372_v52  ;;  %v3167_v12 = vpop.f32.mrb[21].mxu0  ;;  %v3494_v37 = vpack.c.bf16 %v9421_v16, %v3342_v3  ;;  %7374 = vmatpush3.bf16.msra.mxu1 %v8416_v46  ;;  %v8418_v39 = vld [vmem:[#allocation8 + $0x88] sm:$0xff]  }
 0x388   : > { %3373 = vst [vmem:[#allocation2 + $0xe1] sm:$0xff] %v3341_v38  ;;  %v3273_v41 = vmul.f32 %v9372_v52, %v3167_v12  ;;  %v7302_v14 = vpop.f32.mrb[22].mxu0  ;;  %v9427_v1 = vpack.c.bf16 %v3341_v38, %v3340_v48  ;;  %7407 = vmatprep.subr.bf16.mxu1 %v9419_v9  ;;  %v3393_v48 = vld [vmem:[#allocation2 + $0x38] sm:$0xff]  ;;  %v8419_v12 = vld [vmem:[#allocation8 + $0x90] sm:$0xff]  }
 0x389   : > { %v3314_v2 = vadd.f32 %v9377_v30, %v3275_v7  ;;  %v3276_v53 = vmul.f32 %v7302_v14, %v9372_v52  ;;  %v3170_v5 = vpop.f32.mrb[23].mxu0 }
 0x38a   : > { %v3312_v0 = vadd.f32 %v9377_v30, %v3273_v41  ;;  %v3274_v15 = vmul.f32 %v9372_v52, %v3170_v5  ;;  %7344 = vmatmul.mubr.bf16.gmra.mrb[16].mxu1 %v9427_v1  ;;  %v3397_v41 = vld [vmem:[#allocation2 + $0x68] sm:$0xff] }
 0x38b   : > { %v3346_v13 = vmax.f32 %v3314_v2, 0.0  ;;  %v3315_v21 = vadd.f32 %v9377_v30, %v3276_v53  ;;  %7347 = vmatprep.mubr.bf16.mxu1 %v3494_v37  ;;  %v3395_v37 = vld [vmem:[#allocation2 + $0x50] sm:$0xff]  ;;  %v3396_v2 = vld [vmem:[#allocation2 + $0x60] sm:$0xff]  ;;  %v8420_v53 = vld [vmem:[#allocation8 + $0x98] sm:$0xff]  }
 0x38c   : > { %v3344_v34 = vmax.f32 %v3312_v0, 0.0  ;;  %v3313_v28 = vadd.f32 %v9377_v30, %v3274_v15  ;;  %v9480_v5 = vpack.c.bf16 %v3397_v41, %v3396_v2  ;;  %v3399_v0 = vld [vmem:[#allocation2 + $0x80] sm:$0xff]  ;;  %v3401_v15 = vld [vmem:[#allocation2 + $0x98] sm:$0xff] }
 0x38d   : > { %3378 = vst [vmem:[#allocation2 + $0x121] sm:$0xff] %v3346_v13  ;;  %v3347_v56 = vmax.f32 %v3315_v21, 0.0  ;;  %v8427_v41 = vld [vmem:[#allocation8 + $0xd0] sm:$0xff]   ;;  %v3942_v2 = vld [vmem:[#allocation2 + $0x52] sm:$0xff] }
 0x38e   : > { %3376 = vst [vmem:[#allocation2 + $0x109] sm:$0xff] %v3344_v34  ;;  %v3345_v6 = vmax.f32 %v3313_v28, 0.0  ;;  %v7305_v11 = vpop.f32.mrb[24].mxu0  ;;  %v8422_v28 = vld [vmem:[#allocation8 + $0xa8] sm:$0xff]  }
 0x38f   : > { %3379 = vst [vmem:[#allocation2 + $0x129] sm:$0xff] %v3347_v56  ;;  %v3279_v32 = vmul.f32 %v7305_v11, %v9372_v52  ;;  %v3183_v44 = vpop.f32.mrb[25].mxu0  ;;  %v9438_v45 = vpack.c.bf16 %v3347_v56, %v3346_v13  ;;  %v3398_v13 = vld [vmem:[#allocation2 + $0x78] sm:$0xff]  ;;  %v3403_v11 = vld [vmem:[#allocation2 + $0xb0] sm:$0xff] }
 0x390   : > { %3377 = vst [vmem:[#allocation2 + $0x111] sm:$0xff] %v3345_v6  ;;  %v3277_v47 = vmul.f32 %v9372_v52, %v3183_v44  ;;  %v7306_v23 = vpop.f32.mrb[26].mxu0  ;;  %v9441_v17 = vpack.c.bf16 %v3345_v6, %v3344_v34  ;;  %v9484_v21 = vpack.c.bf16 %v3399_v0, %v3398_v13  ;;  %v3400_v34 = vld [vmem:[#allocation2 + $0x90] sm:$0xff]  ;;  %v8423_v6 = vld [vmem:[#allocation8 + $0xb0] sm:$0xff]   ;;  %v3402_v44 = vld [vmem:[#allocation2 + $0xa8] sm:$0xff] }
 0x391   : > { %v3318_v24 = vadd.f32 %v9377_v30, %v3279_v32  ;;  %v3280_v18 = vmul.f32 %v7306_v23, %v9372_v52  ;;  %v3186_v40 = vpop.f32.mrb[27].mxu0  ;;  %v9486_v56 = vpack.c.bf16 %v3401_v15, %v3400_v34  ;;  %v3405_v32 = vld [vmem:[#allocation2 + $0xc8] sm:$0xff]  ;;  %v3404_v23 = vld [vmem:[#allocation2 + $0xc0] sm:$0xff]  ;;  %v8429_v34 = vld [vmem:[#allocation8 + $0xe0] sm:$0xff]  }
 0x392   : > { %v3316_v22 = vadd.f32 %v9377_v30, %v3277_v47  ;;  %v3278_v35 = vmul.f32 %v9372_v52, %v3186_v40  ;;  %7348 = vmatmul.mubr.bf16.gmra.mrb[20].mxu1 %v9441_v17  ;;  %v9490_v47 = vpack.c.bf16 %v3403_v11, %v3402_v44  ;;  %v8425_v40 = vld [vmem:[#allocation8 + $0xc0] sm:$0xff]   ;;  %v8428_v15 = vld [vmem:[#allocation8 + $0xd8] sm:$0xff]  }
 0x393   : > { %v3350_v26 = vmax.f32 %v3318_v24, 0.0  ;;  %v3319_v27 = vadd.f32 %v9377_v30, %v3280_v18  ;;  %7351 = vmatprep.mubr.bf16.mxu1 %v9438_v45  ;;  %v8424_v24 = vld [vmem:[#allocation8 + $0xb8] sm:$0xff]   ;;  %v9492_v18 = vpack.c.bf16 %v3405_v32, %v3404_v23  ;;  %v3947_v11 = vld [vmem:[#allocation2 + $0x92] sm:$0xff]  ;;  %v3948_v32 = vld [vmem:[#allocation2 + $0x9a] sm:$0xff] }
 0x394   : > { %v3348_v61 = vmax.f32 %v3316_v22, 0.0  ;;  %v3317_v31 = vadd.f32 %v9377_v30, %v3278_v35  ;;  %v3407_v22 = vld [vmem:[#allocation2 + $0xe0] sm:$0xff]  ;;  %v3409_v35 = vld [vmem:[#allocation2 + $0xf8] sm:$0xff] }
 0x395   : > { %3382 = vst [vmem:[#allocation2 + $0x151] sm:$0xff] %v3350_v26  ;;  %v3351_v10 = vmax.f32 %v3319_v27, 0.0  ;;  %v8430_v23 = vld [vmem:[#allocation8 + $0xe8] sm:$0xff]  }
 0x396   : > { %3380 = vst [vmem:[#allocation2 + $0x139] sm:$0xff] %v3348_v61  ;;  %v3349_v25 = vmax.f32 %v3317_v31, 0.0  ;;  %v7309_v55 = vpop.f32.mrb[28].mxu0 }
 0x397   : > { %3383 = vst [vmem:[#allocation2 + $0x159] sm:$0xff] %v3351_v10  ;;  %v3283_v51 = vmul.f32 %v7309_v55, %v9372_v52  ;;  %v3199_v19 = vpop.f32.mrb[29].mxu0  ;;  %v9452_v62 = vpack.c.bf16 %v3351_v10, %v3350_v26  ;;  %v3406_v26 = vld [vmem:[#allocation2 + $0xd8] sm:$0xff]  ;;  %v3411_v10 = vld [vmem:[#allocation2 + $0x110] sm:$0xff]  ;;  %v3410_v55 = vld [vmem:[#allocation2 + $0x108] sm:$0xff] }
 0x398   : > { %3381 = vst [vmem:[#allocation2 + $0x141] sm:$0xff] %v3349_v25  ;;  %v3281_v29 = vmul.f32 %v9372_v52, %v3199_v19  ;;  %v7310_v20 = vpop.f32.mrb[30].mxu0  ;;  %v9455_v36 = vpack.c.bf16 %v3349_v25, %v3348_v61  ;;  %v9496_v27 = vpack.c.bf16 %v3407_v22, %v3406_v26  ;;  %v3408_v61 = vld [vmem:[#allocation2 + $0xf0] sm:$0xff]  ;;  %v3413_v25 = vld [vmem:[#allocation2 + $0x128] sm:$0xff]  ;;  %v3412_v19 = vld [vmem:[#allocation2 + $0x120] sm:$0xff] }
 0x399   : > { %v3322_v42 = vadd.f32 %v9377_v30, %v3283_v51  ;;  %v3284_v43 = vmul.f32 %v7310_v20, %v9372_v52  ;;  %v3202_v33 = vpop.f32.mrb[31].mxu0  ;;  %v9498_v31 = vpack.c.bf16 %v3409_v35, %v3408_v61  ;;  %v9502_v51 = vpack.c.bf16 %v3411_v10, %v3410_v55  ;;  %v3949_v22 = vld [vmem:[#allocation2 + $0xaa] sm:$0xff]  ;;  %v3950_v35 = vld [vmem:[#allocation2 + $0xb2] sm:$0xff]  ;;  %v3951_v26 = vld [vmem:[#allocation2 + $0xc2] sm:$0xff] }
 0x39a   : > { %v3320_v50 = vadd.f32 %v9377_v30, %v3281_v29  ;;  %v3282_v57 = vmul.f32 %v9372_v52, %v3202_v33  ;;  %7352 = vmatmul.mubr.bf16.gmra.mrb[24].mxu1 %v9455_v36  ;;  %v3391_v52 = vld [vmem:[#allocation2 + $0x20] sm:$0xff]  ;;  %v9504_v29 = vpack.c.bf16 %v3413_v25, %v3412_v19  ;;  %v3952_v61 = vld [vmem:[#allocation2 + $0xca] sm:$0xff]  ;;  %v9535_v10 = vpack.c.bf16 %v3950_v35, %v3949_v22 }
 0x39b   : > { %v3354_v46 = vmax.f32 %v3322_v42, 0.0  ;;  %v3323_v49 = vadd.f32 %v9377_v30, %v3284_v43  ;;  %7355 = vmatprep.mubr.bf16.mxu1 %v9452_v62  ;;  %v9471_v38 = vpack.c.bf16 %v3391_v52, %v3390_v8  ;;  %v3937_v52 = vld [vmem:[#allocation2 + $0x1a] sm:$0xff]  ;;  %v3939_v8 = vld [vmem:[#allocation2 + $0x32] sm:$0xff]  ;;  %v8432_v25 = vld [vmem:[#allocation8 + $0xf8] sm:$0xff]   ;;  %v9537_v55 = vpack.c.bf16 %v3952_v61, %v3951_v26 }
 0x39c   : > { %v3352_v54 = vmax.f32 %v3320_v50, 0.0  ;;  %v3321_v58 = vadd.f32 %v9377_v30, %v3282_v57  ;;  %v3392_v30 = vld [vmem:[#allocation2 + $0x30] sm:$0xff]  ;;  %v4548_v26 = vld [vmem:[#allocation2 + $0x21] sm:$0xff] }
 0x39d   : > { %3386 = vst [vmem:[#allocation2 + $0x181] sm:$0xff] %v3354_v46  ;;  %v3355_v60 = vmax.f32 %v3323_v49, 0.0  ;;  %v9473_v7 = vpack.c.bf16 %v3393_v48, %v3392_v30  ;;  %v3414_v43 = vld [vmem:[#allocation2 + $0x138] sm:$0xff]  ;;  %v3416_v50 = vld [vmem:[#allocation2 + $0x150] sm:$0xff]  ;;  %v3938_v48 = vld [vmem:[#allocation2 + $0x22] sm:$0xff] }
 0x39e   : > { %3384 = vst [vmem:[#allocation2 + $0x169] sm:$0xff] %v3352_v54  ;;  %v3353_v63 = vmax.f32 %v3321_v58, 0.0  ;;  %v3417_v42 = vld [vmem:[#allocation2 + $0x158] sm:$0xff]  ;;  %v3936_v49 = vld [vmem:[#allocation2 + $0xa] sm:$0xff] }
 0x39f   : > { %3387 = vst [vmem:[#allocation2 + $0x189] sm:$0xff] %v3355_v60  ;;  %v9465_v3 = vpack.c.bf16 %v3355_v60, %v3354_v46  ;;  %v3415_v20 = vld [vmem:[#allocation2 + $0x140] sm:$0xff]  ;;  %v9510_v57 = vpack.c.bf16 %v3417_v42, %v3416_v50  ;;  %v8433_v19 = vld [vmem:[#allocation8 + $0x100] sm:$0xff]  }
 0x3a0   : > { %3385 = vst [vmem:[#allocation2 + $0x171] sm:$0xff] %v3353_v63  ;;  %v9467_v4 = vpack.c.bf16 %v3353_v63, %v3352_v54  ;;  %v9508_v33 = vpack.c.bf16 %v3415_v20, %v3414_v43  ;;  %v3935_v46 = vld [vmem:[#allocation2 + $0x2] sm:$0xff]  ;;  %v3940_v30 = vld [vmem:[#allocation2 + $0x3a] sm:$0xff]  ;;  %v3955_v43 = vld [vmem:[#allocation2 + $0xf2] sm:$0xff] }
 0x3a1   : > { %v3967_v60 = vpack.c.bf16 %v3936_v49, %v3935_v46  ;;  %v3953_v20 = vld [vmem:[#allocation2 + $0xda] sm:$0xff]  ;;  %v3954_v42 = vld [vmem:[#allocation2 + $0xe2] sm:$0xff]  ;;  %v8441_v22 = vld [vmem:[#allocation8 + $0x140] sm:$0xff]  }
 0x3a2   : > { %7356 = vmatmul.mubr.bf16.gmra.mrb[28].mxu1 %v9467_v4  ;;  %v3956_v50 = vld [vmem:[#allocation2 + $0xfa] sm:$0xff]  ;;  %v9541_v46 = vpack.c.bf16 %v3954_v42, %v3953_v20 }
 0x3a3   : > { %7375 = vmatprep.mubr.bf16.mxu1 %v9360_v59  ;;  %v3394_v59 = vld [vmem:[#allocation2 + $0x48] sm:$0xff]  ;;  %v9543_v49 = vpack.c.bf16 %v3956_v50, %v3955_v43  ;;  %v4550_v42 = vld [vmem:[#allocation2 + $0x39] sm:$0xff]  ;;  %v4552_v43 = vld [vmem:[#allocation2 + $0x51] sm:$0xff] }
 0x3a4   : > { %v9478_v14 = vpack.c.bf16 %v3395_v37, %v3394_v59  ;;  %v9519_v37 = vpack.c.bf16 %v3940_v30, %v3939_v8  ;;  %v3941_v59 = vld [vmem:[#allocation2 + $0x4a] sm:$0xff]  ;;  %v3961_v30 = vld [vmem:[#allocation2 + $0x13a] sm:$0xff] }
 0x3a5   : > { %v3418_v58 = vld [vmem:[#allocation2 + $0x168] sm:$0xff]  ;;  %v9523_v0 = vpack.c.bf16 %v3942_v2, %v3941_v59  ;;  %v3964_v59 = vld [vmem:[#allocation2 + $0x15a] sm:$0xff]  ;;  %v4549_v50 = vld [vmem:[#allocation2 + $0x31] sm:$0xff] }
 0x3a6   : > { %v4272_v35 = vld [vmem:[#allocation2 + $0x188] sm:$0xff]  ;;  %v4271_v61 = vld [vmem:[#allocation2 + $0x180] sm:$0xff] }
 0x3a7   : > { %v3419_v54 = vld [vmem:[#allocation2 + $0x170] sm:$0xff] }
 0x3a8   : > { %v9514_v63 = vpack.c.bf16 %v3419_v54, %v3418_v58  ;;  %v3957_v54 = vld [vmem:[#allocation2 + $0x10a] sm:$0xff]  ;;  %v3958_v58 = vld [vmem:[#allocation2 + $0x112] sm:$0xff] }
 0x3aa   : > { %7376 = vmatmul.mubr.bf16.vlgmr.msra.gmra.mrb[0].mxu1 %v9471_v38 }
 0x3ab   : > { %7379 = vmatprep.mubr.bf16.mxu1 %v9473_v7  ;;  %7408 = vmatpush3.bf16.msra.mxu1 %v9419_v9  ;;  %v8421_v9 = vld [vmem:[#allocation8 + $0xa0] sm:$0xff]  }
 0x3ac   : > { %7409 = vmatprep.subr.bf16.mxu1 %v8418_v39 }
 0x3af   : > { %7410 = vmatpush3.bf16.msra.mxu1 %v8418_v39  ;;  %v9517_v39 = vpack.c.bf16 %v3938_v48, %v3937_v52  ;;  %v3960_v52 = vld [vmem:[#allocation2 + $0x12a] sm:$0xff]  ;;  %v9547_v48 = vpack.c.bf16 %v3958_v58, %v3957_v54  ;;  %v9580_v54 = vpack.c.bf16 %v4550_v42, %v4549_v50 }
 0x3b0   : > { %7411 = vmatprep.subr.bf16.mxu1 %v8419_v12  ;;  %v4551_v58 = vld [vmem:[#allocation2 + $0x49] sm:$0xff] }
 0x3b1   : > { %v8449_v50 = vld [vmem:[#allocation8 + $0x180] sm:$0xff]  }
 0x3b2   : > { %7380 = vmatmul.mubr.bf16.gmra.mrb[4].mxu1 %v9478_v14 }
 0x3b3   : > { %7383 = vmatprep.mubr.bf16.mxu1 %v9480_v5  ;;  %7412 = vmatpush3.bf16.msra.mxu1 %v8419_v12  ;;  %v8426_v12 = vld [vmem:[#allocation8 + $0xc8] sm:$0xff]  }
 0x3b4   : > { %7413 = vmatprep.subr.bf16.mxu1 %v8420_v53 }
 0x3b7   : > { %7414 = vmatpush3.bf16.msra.mxu1 %v8420_v53  ;;  %v3943_v53 = vld [vmem:[#allocation2 + $0x62] sm:$0xff] }
 0x3b8   : > { %7415 = vmatprep.subr.bf16.mxu1 %v8421_v9 }
 0x3ba   : > { %7384 = vmatmul.mubr.bf16.gmra.mrb[8].mxu1 %v9484_v21 }
 0x3bb   : > { %7387 = vmatprep.mubr.bf16.mxu1 %v9486_v56  ;;  %7416 = vmatpush3.bf16.msra.mxu1 %v8421_v9  ;;  %v3944_v9 = vld [vmem:[#allocation2 + $0x6a] sm:$0xff] }
 0x3bc   : > { %7417 = vmatprep.subr.bf16.mxu1 %v8422_v28  ;;  %v9525_v13 = vpack.c.bf16 %v3944_v9, %v3943_v53  ;;  %v3965_v9 = vld [vmem:[#allocation2 + $0x16a] sm:$0xff] }
 0x3bf   : > { %7418 = vmatpush3.bf16.msra.mxu1 %v8422_v28  ;;  %v3945_v28 = vld [vmem:[#allocation2 + $0x7a] sm:$0xff] }
 0x3c0   : > { %7419 = vmatprep.subr.bf16.mxu1 %v8423_v6 }
 0x3c2   : > { %7388 = vmatmul.mubr.bf16.gmra.mrb[12].mxu1 %v9490_v47 }
 0x3c3   : > { %7391 = vmatprep.mubr.bf16.mxu1 %v9492_v18  ;;  %7420 = vmatpush3.bf16.msra.mxu1 %v8423_v6  ;;  %v3946_v6 = vld [vmem:[#allocation2 + $0x82] sm:$0xff] }
 0x3c4   : > { %7421 = vmatprep.subr.bf16.mxu1 %v8424_v24  ;;  %v9529_v44 = vpack.c.bf16 %v3946_v6, %v3945_v28  ;;  %v8434_v28 = vld [vmem:[#allocation8 + $0x108] sm:$0xff]   ;;  %v8435_v6 = vld [vmem:[#allocation8 + $0x110] sm:$0xff]  }
 0x3c7   : > { %7422 = vmatpush3.bf16.msra.mxu1 %v8424_v24  ;;  %v9531_v24 = vpack.c.bf16 %v3948_v32, %v3947_v11  ;;  %v8436_v11 = vld [vmem:[#allocation8 + $0x118] sm:$0xff]   ;;  %v8437_v32 = vld [vmem:[#allocation8 + $0x120] sm:$0xff]  }
 0x3c8   : > { %7455 = vmatprep.subr.bf16.mxu1 %v8425_v40 }
 0x3ca   : > { %7392 = vmatmul.mubr.bf16.gmra.mrb[16].mxu1 %v9496_v27 }
 0x3cb   : > { %7395 = vmatprep.mubr.bf16.mxu1 %v9498_v31 }
 0x3d2   : > { %7396 = vmatmul.mubr.bf16.gmra.mrb[20].mxu1 %v9502_v51 }
 0x3d3   : > { %7399 = vmatprep.mubr.bf16.mxu1 %v9504_v29 }
 0x3da   : > { %7400 = vmatmul.mubr.bf16.gmra.mrb[24].mxu1 %v9508_v33 }
 0x3db   : > { %7403 = vmatprep.mubr.bf16.mxu1 %v9510_v57 }
 0x3e2   : > { %7404 = vmatmul.mubr.bf16.gmra.mrb[28].mxu1 %v9514_v63 }
 0x3e3   : > { %7423 = vmatprep.mubr.bf16.mxu1 %v3967_v60  ;;  %v3959_v60 = vld [vmem:[#allocation2 + $0x122] sm:$0xff] }
 0x3e4   : > { %v9549_v8 = vpack.c.bf16 %v3960_v52, %v3959_v60  ;;  %v8442_v60 = vld [vmem:[#allocation8 + $0x148] sm:$0xff]   ;;  %v9582_v52 = vpack.c.bf16 %v4552_v43, %v4551_v58  ;;  %v8448_v43 = vld [vmem:[#allocation8 + $0x178] sm:$0xff]  }
 0x3e5   : > { %v9602_v58 = vld [vmem:[#allocation2 + $0xf1] sm:$0xff] }
 0x3ea   : > { %7424 = vmatmul.mubr.bf16.vlgmr.msra.gmra.mrb[0].mxu1 %v9517_v39 }
 0x3eb   : > { %7427 = vmatprep.mubr.bf16.mxu1 %v9519_v37  ;;  %7456 = vmatpush3.bf16.msra.mxu1 %v8425_v40  ;;  %v8431_v40 = vld [vmem:[#allocation8 + $0xf0] sm:$0xff]  }
 0x3ec   : > { %7457 = vmatprep.subr.bf16.mxu1 %v8426_v12 }
 0x3ef   : > { %7458 = vmatpush3.bf16.msra.mxu1 %v8426_v12  ;;  %v3962_v12 = vld [vmem:[#allocation2 + $0x142] sm:$0xff] }
 0x3f0   : > { %7459 = vmatprep.subr.bf16.mxu1 %v8427_v41  ;;  %v9553_v2 = vpack.c.bf16 %v3962_v12, %v3961_v30  ;;  %v8443_v30 = vld [vmem:[#allocation8 + $0x150] sm:$0xff]   ;;  %v4554_v12 = vld [vmem:[#allocation2 + $0x69] sm:$0xff] }
 0x3f2   : > { %7428 = vmatmul.mubr.bf16.gmra.mrb[4].mxu1 %v9523_v0 }
 0x3f3   : > { %7431 = vmatprep.mubr.bf16.mxu1 %v9525_v13  ;;  %7460 = vmatpush3.bf16.msra.mxu1 %v8427_v41  ;;  %v3963_v41 = vld [vmem:[#allocation2 + $0x152] sm:$0xff] }
 0x3f4   : > { %7461 = vmatprep.subr.bf16.mxu1 %v8428_v15  ;;  %v9555_v53 = vpack.c.bf16 %v3964_v59, %v3963_v41  ;;  %v4556_v41 = vld [vmem:[#allocation2 + $0x81] sm:$0xff] }
 0x3f5   : > { %v4553_v59 = vld [vmem:[#allocation2 + $0x61] sm:$0xff] }
 0x3f7   : > { %7462 = vmatpush3.bf16.msra.mxu1 %v8428_v15  ;;  %v3966_v15 = vld [vmem:[#allocation2 + $0x172] sm:$0xff] }
 0x3f8   : > { %7463 = vmatprep.subr.bf16.mxu1 %v8429_v34 }
 0x3fa   : > { %7432 = vmatmul.mubr.bf16.gmra.mrb[8].mxu1 %v9529_v44 }
 0x3fb   : > { %7435 = vmatprep.mubr.bf16.mxu1 %v9531_v24  ;;  %7464 = vmatpush3.bf16.msra.mxu1 %v8429_v34  ;;  %v9559_v34 = vpack.c.bf16 %v3966_v15, %v3965_v9  ;;  %v9586_v9 = vpack.c.bf16 %v4554_v12, %v4553_v59  ;;  %v4555_v15 = vld [vmem:[#allocation2 + $0x79] sm:$0xff]  ;;  %v5489_v59 = vld [vmem:[#allocation2 + $0x151] sm:$0xff] }
 0x3fc   : > { %7465 = vmatprep.subr.bf16.mxu1 %v8430_v23  ;;  %v5487_v12 = vld [vmem:[#allocation2 + $0x139] sm:$0xff] }
 0x3ff   : > { %7466 = vmatpush3.bf16.msra.mxu1 %v8430_v23  ;;  %v8439_v23 = vld [vmem:[#allocation8 + $0x130] sm:$0xff]  }
 0x400   : > { %7467 = vmatprep.subr.bf16.mxu1 %v8431_v40 }
 0x402   : > { %7436 = vmatmul.mubr.bf16.gmra.mrb[12].mxu1 %v9535_v10 }
 0x403   : > { %7439 = vmatprep.mubr.bf16.mxu1 %v9537_v55  ;;  %7468 = vmatpush3.bf16.msra.mxu1 %v8431_v40  ;;  %v8440_v40 = vld [vmem:[#allocation8 + $0x138] sm:$0xff]  }
 0x404   : > { %7469 = vmatprep.subr.bf16.mxu1 %v8432_v25 }
 0x407   : > { %7470 = vmatpush3.bf16.msra.mxu1 %v8432_v25  ;;  %v9577_v25 = vpack.c.bf16 %v4272_v35, %v4271_v61  ;;  %v8446_v35 = vld [vmem:[#allocation8 + $0x168] sm:$0xff]   ;;  %v8447_v61 = vld [vmem:[#allocation8 + $0x170] sm:$0xff]  }
 0x408   : > { %7503 = vmatprep.subr.bf16.mxu1 %v8433_v19 }
 0x40a   : > { %7440 = vmatmul.mubr.bf16.gmra.mrb[16].mxu1 %v9541_v46 }
 0x40b   : > { %7443 = vmatprep.mubr.bf16.mxu1 %v9543_v49 }
 0x412   : > { %7444 = vmatmul.mubr.bf16.gmra.mrb[20].mxu1 %v9547_v48 }
 0x413   : > { %7447 = vmatprep.mubr.bf16.mxu1 %v9549_v8 }
 0x41a   : > { %7448 = vmatmul.mubr.bf16.gmra.mrb[24].mxu1 %v9553_v2 }
 0x41b   : > { %7451 = vmatprep.mubr.bf16.mxu1 %v9555_v53 }
 0x422   : > { %7452 = vmatmul.mubr.bf16.gmra.mrb[28].mxu1 %v9559_v34 }
 0x423   : > { %7471 = vmatprep.mubr.bf16.mxu1 %v9471_v38  ;;  %v8438_v38 = vld [vmem:[#allocation8 + $0x128] sm:$0xff]  }
 0x42a   : > { %7472 = vmatmul.mubr.bf16.vlgmr.msra.gmra.mrb[0].mxu1 %v9473_v7 }
 0x42b   : > { %7475 = vmatprep.mubr.bf16.mxu1 %v9478_v14  ;;  %7504 = vmatpush3.bf16.msra.mxu1 %v8433_v19  ;;  %v4547_v19 = vld [vmem:[#allocation2 + $0x19] sm:$0xff] }
 0x42c   : > { %7505 = vmatprep.subr.bf16.mxu1 %v8434_v28  ;;  %v4579_v20 = vpack.c.bf16 %v4548_v26, %v4547_v19  ;;  %v4562_v19 = vld [vmem:[#allocation2 + $0xc9] sm:$0xff] }
 0x42f   : > { %7506 = vmatpush3.bf16.msra.mxu1 %v8434_v28  ;;  %v8444_v28 = vld [vmem:[#allocation8 + $0x158] sm:$0xff]  }
 0x430   : > { %7507 = vmatprep.subr.bf16.mxu1 %v8435_v6 }
 0x432   : > { %7476 = vmatmul.mubr.bf16.gmra.mrb[4].mxu1 %v9480_v5 }
 0x433   : > { %7479 = vmatprep.mubr.bf16.mxu1 %v9484_v21  ;;  %7508 = vmatpush3.bf16.msra.mxu1 %v8435_v6  ;;  %v9588_v6 = vpack.c.bf16 %v4556_v41, %v4555_v15  ;;  %v5492_v15 = vld [vmem:[#allocation2 + $0x171] sm:$0xff] }
 0x434   : > { %7509 = vmatprep.subr.bf16.mxu1 %v8436_v11 }
 0x437   : > { %7510 = vmatpush3.bf16.msra.mxu1 %v8436_v11  ;;  %v8445_v11 = vld [vmem:[#allocation8 + $0x160] sm:$0xff]  }
 0x438   : > { %7511 = vmatprep.subr.bf16.mxu1 %v8437_v32 }
 0x43a   : > { %7480 = vmatmul.mubr.bf16.gmra.mrb[8].mxu1 %v9486_v56 }
 0x43b   : > { %7483 = vmatprep.mubr.bf16.mxu1 %v9490_v47  ;;  %7512 = vmatpush3.bf16.msra.mxu1 %v8437_v32  ;;  %v4558_v32 = vld [vmem:[#allocation2 + $0x99] sm:$0xff] }
 0x43c   : > { %7513 = vmatprep.subr.bf16.mxu1 %v8438_v38 }
 0x43f   : > { %7514 = vmatpush3.bf16.msra.mxu1 %v8438_v38  ;;  %v4560_v38 = vld [vmem:[#allocation2 + $0xb1] sm:$0xff] }
 0x440   : > { %7515 = vmatprep.subr.bf16.mxu1 %v8439_v23 }
 0x442   : > { %7484 = vmatmul.mubr.bf16.gmra.mrb[12].mxu1 %v9492_v18 }
 0x443   : > { %7487 = vmatprep.mubr.bf16.mxu1 %v9496_v27  ;;  %7516 = vmatpush3.bf16.msra.mxu1 %v8439_v23  ;;  %v4557_v23 = vld [vmem:[#allocation2 + $0x91] sm:$0xff] }
 0x444   : > { %7517 = vmatprep.subr.bf16.mxu1 %v8440_v40 }
 0x447   : > { %7518 = vmatpush3.bf16.msra.mxu1 %v8440_v40  ;;  %v9592_v40 = vpack.c.bf16 %v4558_v32, %v4557_v23  ;;  %v5493_v32 = vld [vmem:[#allocation2 + $0x181] sm:$0xff]  ;;  %v5495_v23 = vld [vmem:[#allocation2 + $0x199] sm:$0xff] }
 0x448   : > { %7551 = vmatprep.subr.bf16.mxu1 %v8441_v22 }
 0x44a   : > { %7488 = vmatmul.mubr.bf16.gmra.mrb[16].mxu1 %v9498_v31 }
 0x44b   : > { %7491 = vmatprep.mubr.bf16.mxu1 %v9502_v51 }
 0x452   : > { %7492 = vmatmul.mubr.bf16.gmra.mrb[20].mxu1 %v9504_v29 }
 0x453   : > { %7495 = vmatprep.mubr.bf16.mxu1 %v9508_v33 }
 0x45a   : > { %7496 = vmatmul.mubr.bf16.gmra.mrb[24].mxu1 %v9510_v57 }
 0x45b   : > { %7499 = vmatprep.mubr.bf16.mxu1 %v9514_v63 }
 0x462   : > { %7500 = vmatmul.mubr.bf16.gmra.mrb[28].mxu1 %v9577_v25 }
 0x463   : > { %7519 = vmatprep.mubr.bf16.mxu1 %v4579_v20  ;;  %v4561_v20 = vld [vmem:[#allocation2 + $0xc1] sm:$0xff] }
 0x464   : > { %v9598_v42 = vpack.c.bf16 %v4562_v19, %v4561_v20  ;;  %v5773_v19 = vld [vmem:[#allocation2 + $0x4a] sm:$0xff]  ;;  %v5774_v20 = vld [vmem:[#allocation2 + $0x52] sm:$0xff] }
 0x46a   : > { %7520 = vmatmul.mubr.bf16.vlgmr.msra.gmra.mrb[0].mxu1 %v9580_v54 }
 0x46b   : > { %7523 = vmatprep.mubr.bf16.mxu1 %v9582_v52  ;;  %7552 = vmatpush3.bf16.msra.mxu1 %v8441_v22  ;;  %v4559_v22 = vld [vmem:[#allocation2 + $0xa9] sm:$0xff] }
 0x46c   : > { %7553 = vmatprep.subr.bf16.mxu1 %v8442_v60  ;;  %v9594_v26 = vpack.c.bf16 %v4560_v38, %v4559_v22 }
 0x46f   : > { %7554 = vmatpush3.bf16.msra.mxu1 %v8442_v60  ;;  %v4588_v60 = vpack.c.bf16 %v9421_v16, %v9602_v58  ;;  %v8451_v16 = vld [vmem:[#allocation8 + $0x190] sm:$0xff]  }
 0x470   : > { %7555 = vmatprep.subr.bf16.mxu1 %v8443_v30 }
 0x472   : > { %7524 = vmatmul.mubr.bf16.gmra.mrb[4].mxu1 %v9586_v9 }
 0x473   : > { %7527 = vmatprep.mubr.bf16.mxu1 %v9588_v6  ;;  %7556 = vmatpush3.bf16.msra.mxu1 %v8443_v30  ;;  %v5490_v30 = vld [vmem:[#allocation2 + $0x159] sm:$0xff] }
 0x474   : > { %7557 = vmatprep.subr.bf16.mxu1 %v8444_v28 }
 0x477   : > { %7558 = vmatpush3.bf16.msra.mxu1 %v8444_v28  ;;  %v5494_v28 = vld [vmem:[#allocation2 + $0x189] sm:$0xff] }
 0x478   : > { %7559 = vmatprep.subr.bf16.mxu1 %v8445_v11  ;;  %v5511_v38 = vpack.c.bf16 %v5494_v28, %v5493_v32 }
 0x47a   : > { %7528 = vmatmul.mubr.bf16.gmra.mrb[8].mxu1 %v9592_v40 }
 0x47b   : > { %7531 = vmatprep.mubr.bf16.mxu1 %v9594_v26  ;;  %7560 = vmatpush3.bf16.msra.mxu1 %v8445_v11 }
 0x47c   : > { %7561 = vmatprep.subr.bf16.mxu1 %v8446_v35 }
 0x47f   : > { %7562 = vmatpush3.bf16.msra.mxu1 %v8446_v35  ;;  %v5771_v35 = vld [vmem:[#allocation2 + $0x32] sm:$0xff] }
 0x480   : > { %7563 = vmatprep.subr.bf16.mxu1 %v8447_v61 }
 0x482   : > { %7532 = vmatmul.mubr.bf16.gmra.mrb[12].mxu1 %v9598_v42 }
 0x483   : > { %7535 = vmatprep.mubr.bf16.mxu1 %v9427_v1  ;;  %7564 = vmatpush3.bf16.msra.mxu1 %v8447_v61  ;;  %v8450_v1 = vld [vmem:[#allocation8 + $0x188] sm:$0xff]  }
 0x484   : > { %7565 = vmatprep.subr.bf16.mxu1 %v8448_v43 }
 0x487   : > { %7566 = vmatpush3.bf16.msra.mxu1 %v8448_v43  ;;  %v5776_v43 = vld [vmem:[#allocation2 + $0x6a] sm:$0xff] }
 0x488   : > { %7599 = vmatprep.subr.bf16.mxu1 %v8449_v50 }
 0x48a   : > { %7536 = vmatmul.mubr.bf16.gmra.mrb[16].mxu1 %v4588_v60  ;;  %v5777_v60 = vld [vmem:[#allocation2 + $0x7a] sm:$0xff] }
 0x48b   : > { %7539 = vmatprep.mubr.bf16.mxu1 %v9441_v17  ;;  %v8453_v17 = vld [vmem:[#allocation8 + $0x1a0] sm:$0xff]  }
 0x492   : > { %7540 = vmatmul.mubr.bf16.gmra.mrb[20].mxu1 %v9438_v45  ;;  %v8452_v45 = vld [vmem:[#allocation8 + $0x198] sm:$0xff]  }
 0x493   : > { %7543 = vmatprep.mubr.bf16.mxu1 %v9455_v36  ;;  %v8455_v36 = vld [vmem:[#allocation8 + $0x1b0] sm:$0xff]  }
 0x49a   : > { %7544 = vmatmul.mubr.bf16.gmra.mrb[24].mxu1 %v9452_v62  ;;  %v8454_v62 = vld [vmem:[#allocation8 + $0x1a8] sm:$0xff]  }
 0x49b   : > { %7547 = vmatprep.mubr.bf16.mxu1 %v9467_v4  ;;  %v8457_v4 = vld [vmem:[#allocation8 + $0x1c0] sm:$0xff]  }
 0x4a2   : > { %7548 = vmatmul.mubr.bf16.gmra.mrb[28].mxu1 %v9465_v3  ;;  %v8456_v3 = vld [vmem:[#allocation8 + $0x1b8] sm:$0xff]  }
 0x4a3   : > { %7567 = vmatprep.mubr.bf16.mxu1 %v9517_v39  ;;  %v4883_v39 = vld [vmem:[#allocation2 + $0x182] sm:$0xff] }
 0x4aa   : > { %7568 = vmatmul.mubr.bf16.vlgmr.msra.gmra.mrb[0].mxu1 %v9519_v37  ;;  %v4884_v37 = vld [vmem:[#allocation2 + $0x18a] sm:$0xff] }
 0x4ab   : > { %7571 = vmatprep.mubr.bf16.mxu1 %v9523_v0  ;;  %7600 = vmatpush3.bf16.msra.mxu1 %v8449_v50  ;;  %v9627_v0 = vpack.c.bf16 %v4884_v37, %v4883_v39  ;;  %v5804_v50 = vpack.c.bf16 %v5774_v20, %v5773_v19  ;;  %v5784_v39 = vld [vmem:[#allocation2 + $0xca] sm:$0xff] }
 0x4ac   : > { %7601 = vmatprep.subr.bf16.mxu1 %v8450_v1 }
 0x4af   : > { %7602 = vmatpush3.bf16.msra.mxu1 %v8450_v1  ;;  %v5778_v1 = vld [vmem:[#allocation2 + $0x82] sm:$0xff] }
 0x4b0   : > { %7603 = vmatprep.subr.bf16.mxu1 %v8451_v16 }
 0x4b2   : > { %7572 = vmatmul.mubr.bf16.gmra.mrb[4].mxu1 %v9525_v13  ;;  %v8458_v13 = vld [vmem:[#allocation8 + $0x1c8] sm:$0xff]  }
 0x4b3   : > { %7575 = vmatprep.mubr.bf16.mxu1 %v9529_v44  ;;  %7604 = vmatpush3.bf16.msra.mxu1 %v8451_v16  ;;  %v8459_v44 = vld [vmem:[#allocation8 + $0x1d0] sm:$0xff]   ;;  %v5779_v16 = vld [vmem:[#allocation2 + $0x92] sm:$0xff] }
 0x4b4   : > { %7605 = vmatprep.subr.bf16.mxu1 %v8452_v45 }
 0x4b7   : > { %7606 = vmatpush3.bf16.msra.mxu1 %v8452_v45  ;;  %v5780_v45 = vld [vmem:[#allocation2 + $0x9a] sm:$0xff] }
 0x4b8   : > { %7607 = vmatprep.subr.bf16.mxu1 %v8453_v17 }
 0x4ba   : > { %7576 = vmatmul.mubr.bf16.gmra.mrb[8].mxu1 %v9531_v24  ;;  %v8460_v24 = vld [vmem:[#allocation8 + $0x1d8] sm:$0xff]  }
 0x4bb   : > { %7579 = vmatprep.mubr.bf16.mxu1 %v9535_v10  ;;  %7608 = vmatpush3.bf16.msra.mxu1 %v8453_v17  ;;  %v8461_v10 = vld [vmem:[#allocation8 + $0x1e0] sm:$0xff]   ;;  %v5806_v17 = vpack.c.bf16 %v5778_v1, %v5777_v60 }
 0x4bc   : > { %7609 = vmatprep.subr.bf16.mxu1 %v8454_v62 }
 0x4bf   : > { %7610 = vmatpush3.bf16.msra.mxu1 %v8454_v62  ;;  %v5807_v62 = vpack.c.bf16 %v5780_v45, %v5779_v16  ;;  %v6086_v16 = vld [vmem:[%s8865_s21 + $0x48] sm:$0xff] }
 0x4c0   : > { %7611 = vmatprep.subr.bf16.mxu1 %v8455_v36 }
 0x4c2   : > { %7580 = vmatmul.mubr.bf16.gmra.mrb[12].mxu1 %v9537_v55  ;;  %v5479_v55 = vld [vmem:[#allocation2 + $0xd9] sm:$0xff] }
 0x4c3   : > { %7583 = vmatprep.mubr.bf16.mxu1 %v9541_v46  ;;  %7612 = vmatpush3.bf16.msra.mxu1 %v8455_v36  ;;  %v5781_v36 = vld [vmem:[#allocation2 + $0xaa] sm:$0xff] }
 0x4c4   : > { %7613 = vmatprep.subr.bf16.mxu1 %v8456_v3 }
 0x4c7   : > { %7614 = vmatpush3.bf16.msra.mxu1 %v8456_v3  ;;  %v5782_v3 = vld [vmem:[#allocation2 + $0xb2] sm:$0xff] }
 0x4c8   : > { %7647 = vmatprep.subr.bf16.mxu1 %v8457_v4  ;;  %v5808_v37 = vpack.c.bf16 %v5782_v3, %v5781_v36 }
 0x4ca   : > { %7584 = vmatmul.mubr.bf16.gmra.mrb[16].mxu1 %v9543_v49  ;;  %v8472_v49 = vld [vmem:[#allocation8 + $0x238] sm:$0xff]  }
 0x4cb   : > { %7587 = vmatprep.mubr.bf16.mxu1 %v9547_v48 }
 0x4d2   : > { %7588 = vmatmul.mubr.bf16.gmra.mrb[20].mxu1 %v9549_v8  ;;  %v5484_v8 = vld [vmem:[#allocation2 + $0x111] sm:$0xff] }
 0x4d3   : > { %7591 = vmatprep.mubr.bf16.mxu1 %v9553_v2  ;;  %v5486_v2 = vld [vmem:[#allocation2 + $0x129] sm:$0xff] }
 0x4da   : > { %7592 = vmatmul.mubr.bf16.gmra.mrb[24].mxu1 %v9555_v53  ;;  %v5483_v53 = vld [vmem:[#allocation2 + $0x109] sm:$0xff] }
 0x4db   : > { %7595 = vmatprep.mubr.bf16.mxu1 %v9559_v34  ;;  %v5506_v34 = vpack.c.bf16 %v5484_v8, %v5483_v53  ;;  %v5801_v8 = vld [vmem:[#allocation2 + $0x19a] sm:$0xff] }
 0x4e2   : > { %7596 = vmatmul.mubr.bf16.gmra.mrb[28].mxu1 %v9627_v0 }
 0x4e3   : > { %7615 = vmatprep.mubr.bf16.mxu1 %v9473_v7  ;;  %v8462_v7 = vld [vmem:[#allocation8 + $0x1e8] sm:$0xff]  }
 0x4ea   : > { %7616 = vmatmul.mubr.bf16.vlgmr.msra.gmra.mrb[0].mxu1 %v9478_v14  ;;  %v8463_v14 = vld [vmem:[#allocation8 + $0x1f0] sm:$0xff]  }
 0x4eb   : > { %7619 = vmatprep.mubr.bf16.mxu1 %v9480_v5  ;;  %7648 = vmatpush3.bf16.msra.mxu1 %v8457_v4  ;;  %v8464_v5 = vld [vmem:[#allocation8 + $0x1f8] sm:$0xff]  }
 0x4ec   : > { %7649 = vmatprep.subr.bf16.mxu1 %v8458_v13  ;;  %v5783_v4 = vld [vmem:[#allocation2 + $0xc2] sm:$0xff] }
 0x4ef   : > { %7650 = vmatpush3.bf16.msra.mxu1 %v8458_v13  ;;  %v5809_v13 = vpack.c.bf16 %v5784_v39, %v5783_v4  ;;  %v6091_v4 = vld [vmem:[%s8865_s21 + $0x70] sm:$0xff]  ;;  %v6089_v39 = vld [vmem:[%s8865_s21 + $0x60] sm:$0xff] }
 0x4f0   : > { %7651 = vmatprep.subr.bf16.mxu1 %v8459_v44 }
 0x4f2   : > { %7620 = vmatmul.mubr.bf16.gmra.mrb[4].mxu1 %v9484_v21  ;;  %v8465_v21 = vld [vmem:[#allocation8 + $0x200] sm:$0xff]  }
 0x4f3   : > { %7623 = vmatprep.mubr.bf16.mxu1 %v9486_v56  ;;  %7652 = vmatpush3.bf16.msra.mxu1 %v8459_v44  ;;  %v8476_v56 = vld [vmem:[#allocation2] sm:$0xff] }
 0x4f4   : > { %7653 = vmatprep.subr.bf16.mxu1 %v8460_v24  ;;  %v5785_v44 = vld [vmem:[#allocation2 + $0xda] sm:$0xff] }
 0x4f7   : > { %7654 = vmatpush3.bf16.msra.mxu1 %v8460_v24  ;;  %v5786_v24 = vld [vmem:[#allocation2 + $0xe2] sm:$0xff] }
 0x4f8   : > { %7655 = vmatprep.subr.bf16.mxu1 %v8461_v10 }
 0x4fa   : > { %7624 = vmatmul.mubr.bf16.gmra.mrb[8].mxu1 %v9490_v47  ;;  %v5206_v47 = vpack.c.bf16 %v8476_v56, %v8476_v56  ;;  %v5790_v56 = vld [vmem:[#allocation2 + $0x112] sm:$0xff] }
 0x4fb   : > { %7627 = vmatprep.mubr.bf16.mxu1 %v9492_v18  ;;  %7656 = vmatpush3.bf16.msra.mxu1 %v8461_v10  ;;  %v8466_v18 = vld [vmem:[#allocation8 + $0x208] sm:$0xff]  }
 0x4fc   : > { %7657 = vmatprep.subr.bf16.mxu1 %v8462_v7  ;;  %v5787_v10 = vld [vmem:[#allocation2 + $0xf2] sm:$0xff] }
 0x4ff   : > { %7658 = vmatpush3.bf16.msra.mxu1 %v8462_v7  ;;  %v5788_v7 = vld [vmem:[#allocation2 + $0xfa] sm:$0xff] }
 0x500   : > { %7659 = vmatprep.subr.bf16.mxu1 %v8463_v14 }
 0x502   : > { %7628 = vmatmul.mubr.bf16.gmra.mrb[12].mxu1 %v9496_v27  ;;  %v8467_v27 = vld [vmem:[#allocation8 + $0x210] sm:$0xff]  }
 0x503   : > { %7631 = vmatprep.mubr.bf16.mxu1 %v9498_v31  ;;  %7660 = vmatpush3.bf16.msra.mxu1 %v8463_v14  ;;  %v8468_v31 = vld [vmem:[#allocation8 + $0x218] sm:$0xff]   ;;  %v5810_v14 = vpack.c.bf16 %v5786_v24, %v5785_v44 }
 0x504   : > { %7661 = vmatprep.subr.bf16.mxu1 %v8464_v5 }
 0x507   : > { %7662 = vmatpush3.bf16.msra.mxu1 %v8464_v5  ;;  %v5811_v5 = vpack.c.bf16 %v5788_v7, %v5787_v10  ;;  %v6090_v10 = vld [vmem:[%s8865_s21 + $0x68] sm:$0xff] }
 0x508   : > { %7695 = vmatprep.subr.bf16.mxu1 %v8465_v21 }
 0x50a   : > { %7632 = vmatmul.mubr.bf16.gmra.mrb[16].mxu1 %v9502_v51  ;;  %v8469_v51 = vld [vmem:[#allocation8 + $0x220] sm:$0xff]  }
 0x50b   : > { %7635 = vmatprep.mubr.bf16.mxu1 %v9504_v29  ;;  %v8470_v29 = vld [vmem:[#allocation8 + $0x228] sm:$0xff]  }
 0x512   : > { %7636 = vmatmul.mubr.bf16.gmra.mrb[20].mxu1 %v9508_v33  ;;  %v8471_v33 = vld [vmem:[#allocation8 + $0x230] sm:$0xff]  }
 0x513   : > { %7639 = vmatprep.mubr.bf16.mxu1 %v9510_v57  ;;  %v5480_v57 = vld [vmem:[#allocation2 + $0xe1] sm:$0xff] }
 0x514   : > { %v5504_v46 = vpack.c.bf16 %v5480_v57, %v5479_v55  ;;  %v5796_v57 = vld [vmem:[#allocation2 + $0x15a] sm:$0xff] }
 0x51a   : > { %7640 = vmatmul.mubr.bf16.gmra.mrb[24].mxu1 %v9514_v63  ;;  %v5482_v63 = vld [vmem:[#allocation2 + $0xf9] sm:$0xff] }
 0x51b   : > { %7643 = vmatprep.mubr.bf16.mxu1 %v9577_v25  ;;  %v5505_v48 = vpack.c.bf16 %v5482_v63, %v9602_v58  ;;  %v5485_v25 = vld [vmem:[#allocation2 + $0x121] sm:$0xff] }
 0x522   : > { %7644 = vmatmul.mubr.bf16.gmra.mrb[28].mxu1 %v5206_v47  ;;  %v5791_v47 = vld [vmem:[#allocation2 + $0x122] sm:$0xff] }
 0x523   : > { %7663 = vmatprep.mubr.bf16.mxu1 %v9580_v54  ;;  %v5507_v54 = vpack.c.bf16 %v5486_v2, %v5485_v25  ;;  %v5802_v2 = vld [vmem:[#allocation2 + $0x1a2] sm:$0xff]  ;;  %v6077_v25 = vld [vmem:[%s8865_s21] sm:$0xff] }
 0x524   : > { %v5818_v53 = vpack.c.bf16 %v5802_v2, %v5801_v8  ;;  %v6097_v8 = vld [vmem:[%s8865_s21 + $0xa0] sm:$0xff] }
 0x52a   : > { %7664 = vmatmul.mubr.bf16.vlgmr.msra.gmra.mrb[0].mxu1 %v9582_v52  ;;  %v5488_v52 = vld [vmem:[#allocation2 + $0x141] sm:$0xff] }
 0x52b   : > { %7667 = vmatprep.mubr.bf16.mxu1 %v9586_v9  ;;  %7696 = vmatpush3.bf16.msra.mxu1 %v8465_v21  ;;  %v5508_v41 = vpack.c.bf16 %v5488_v52, %v5487_v12  ;;  %v5509_v9 = vpack.c.bf16 %v5490_v30, %v5489_v59  ;;  %v5789_v21 = vld [vmem:[#allocation2 + $0x10a] sm:$0xff] }
 0x52c   : > { %7697 = vmatprep.subr.bf16.mxu1 %v8466_v18  ;;  %v6080_v52 = vld [vmem:[%s8865_s21 + $0x18] sm:$0xff] }
 0x52f   : > { %7698 = vmatpush3.bf16.msra.mxu1 %v8466_v18  ;;  %v5792_v18 = vld [vmem:[#allocation2 + $0x12a] sm:$0xff] }
 0x530   : > { %7699 = vmatprep.subr.bf16.mxu1 %v8467_v27 }
 0x532   : > { %7668 = vmatmul.mubr.bf16.gmra.mrb[4].mxu1 %v9588_v6  ;;  %v5491_v6 = vld [vmem:[#allocation2 + $0x169] sm:$0xff] }
 0x533   : > { %7671 = vmatprep.mubr.bf16.mxu1 %v9592_v40  ;;  %7700 = vmatpush3.bf16.msra.mxu1 %v8467_v27  ;;  %v5510_v11 = vpack.c.bf16 %v5492_v15, %v5491_v6  ;;  %v5496_v40 = vld [vmem:[#allocation2 + $0x1a1] sm:$0xff]  ;;  %v5812_v27 = vpack.c.bf16 %v5790_v56, %v5789_v21 }
 0x534   : > { %7701 = vmatprep.subr.bf16.mxu1 %v8468_v31  ;;  %v5512_v22 = vpack.c.bf16 %v5496_v40, %v5495_v23  ;;  %v6083_v6 = vld [vmem:[%s8865_s21 + $0x30] sm:$0xff] }
 0x537   : > { %7702 = vmatpush3.bf16.msra.mxu1 %v8468_v31  ;;  %v5813_v31 = vpack.c.bf16 %v5792_v18, %v5791_v47  ;;  %v6095_v47 = vld [vmem:[%s8865_s21 + $0x90] sm:$0xff]  ;;  %v6093_v18 = vld [vmem:[%s8865_s21 + $0x80] sm:$0xff] }
 0x538   : > { %7703 = vmatprep.subr.bf16.mxu1 %v8469_v51 }
 0x53a   : > { %7672 = vmatmul.mubr.bf16.gmra.mrb[8].mxu1 %v9594_v26  ;;  %v5772_v26 = vld [vmem:[#allocation2 + $0x3a] sm:$0xff] }
 0x53b   : > { %7675 = vmatprep.mubr.bf16.mxu1 %v9598_v42  ;;  %7704 = vmatpush3.bf16.msra.mxu1 %v8469_v51  ;;  %v5803_v61 = vpack.c.bf16 %v5772_v26, %v5771_v35  ;;  %v5775_v42 = vld [vmem:[#allocation2 + $0x62] sm:$0xff]  ;;  %v5793_v51 = vld [vmem:[#allocation2 + $0x13a] sm:$0xff] }
 0x53c   : > { %7705 = vmatprep.subr.bf16.mxu1 %v8470_v29  ;;  %v5805_v58 = vpack.c.bf16 %v5776_v43, %v5775_v42  ;;  %v6087_v42 = vld [vmem:[%s8865_s21 + $0x50] sm:$0xff]  ;;  %v6085_v43 = vld [vmem:[%s8865_s21 + $0x40] sm:$0xff] }
 0x53f   : > { %7706 = vmatpush3.bf16.msra.mxu1 %v8470_v29  ;;  %v5794_v29 = vld [vmem:[#allocation2 + $0x142] sm:$0xff] }
 0x540   : > { %7707 = vmatprep.subr.bf16.mxu1 %v8471_v33  ;;  %v5814_v63 = vpack.c.bf16 %v5794_v29, %v5793_v51 }
 0x542   : > { %7676 = vmatmul.mubr.bf16.gmra.mrb[12].mxu1 %v5504_v46  ;;  %v5797_v46 = vld [vmem:[#allocation2 + $0x16a] sm:$0xff] }
 0x543   : > { %7679 = vmatprep.mubr.bf16.mxu1 %v5505_v48  ;;  %7708 = vmatpush3.bf16.msra.mxu1 %v8471_v33  ;;  %v5795_v33 = vld [vmem:[#allocation2 + $0x152] sm:$0xff] }
 0x544   : > { %7709 = vmatprep.subr.bf16.mxu1 %v8472_v49  ;;  %v5815_v55 = vpack.c.bf16 %v5796_v57, %v5795_v33  ;;  %v6094_v33 = vld [vmem:[%s8865_s21 + $0x88] sm:$0xff] }
 0x547   : > { %7710 = vmatpush3.bf16.msra.mxu1 %v8472_v49  ;;  %v5798_v49 = vld [vmem:[#allocation2 + $0x172] sm:$0xff] }
 0x548   : > { %v5816_v48 = vpack.c.bf16 %v5798_v49, %v5797_v46 }
 0x54a   : > { %7680 = vmatmul.mubr.bf16.gmra.mrb[16].mxu1 %v5506_v34  ;;  %v6079_v34 = vld [vmem:[%s8865_s21 + $0x10] sm:$0xff] }
 0x54b   : > { %7683 = vmatprep.mubr.bf16.mxu1 %v5507_v54 }
 0x552   : > { %7684 = vmatmul.mubr.bf16.gmra.mrb[20].mxu1 %v5508_v41  ;;  %v6078_v41 = vld [vmem:[%s8865_s21 + $0x8] sm:$0xff] }
 0x553   : > { %7687 = vmatprep.mubr.bf16.mxu1 %v5509_v9 }
 0x55a   : > { %7688 = vmatmul.mubr.bf16.gmra.mrb[24].mxu1 %v5510_v11  ;;  %v6081_v11 = vld [vmem:[%s8865_s21 + $0x20] sm:$0xff] }
 0x55b   : > { %7691 = vmatprep.mubr.bf16.mxu1 %v5511_v38  ;;  %v6084_v38 = vld [vmem:[%s8865_s21 + $0x38] sm:$0xff] }
 0x562   : > { %7692 = vmatmul.mubr.bf16.gmra.mrb[28].mxu1 %v5512_v22  ;;  %v6082_v22 = vld [vmem:[%s8865_s21 + $0x28] sm:$0xff] }
 0x563   : > { %7711 = vmatprep.mubr.bf16.mxu1 %v5803_v61 }
 0x56a   : > { %7712 = vmatmul.mubr.bf16.vlgmr.msra.gmra.mrb[0].mxu1 %v5804_v50 }
 0x56b   : > { %7715 = vmatprep.mubr.bf16.mxu1 %v5805_v58  ;;  %v6088_v58 = vld [vmem:[%s8865_s21 + $0x58] sm:$0xff] }
 0x572   : > { %7716 = vmatmul.mubr.bf16.gmra.mrb[4].mxu1 %v5806_v17 }
 0x573   : > { %7719 = vmatprep.mubr.bf16.mxu1 %v5807_v62 }
 0x57a   : > { %7720 = vmatmul.mubr.bf16.gmra.mrb[8].mxu1 %v5808_v37 }
 0x57b   : > { %7723 = vmatprep.mubr.bf16.mxu1 %v5809_v13  ;;  %v6092_v13 = vld [vmem:[%s8865_s21 + $0x78] sm:$0xff] }
 0x582   : > { %7724 = vmatmul.mubr.bf16.gmra.mrb[12].mxu1 %v5810_v14 }
 0x583   : > { %7727 = vmatprep.mubr.bf16.mxu1 %v5811_v5 }
 0x58a   : > { %7728 = vmatmul.mubr.bf16.gmra.mrb[16].mxu1 %v5812_v27 }
 0x58b   : > { %7731 = vmatprep.mubr.bf16.mxu1 %v5813_v31  ;;  %v6096_v31 = vld [vmem:[%s8865_s21 + $0x98] sm:$0xff] }
 0x592   : > { %7732 = vmatmul.mubr.bf16.gmra.mrb[20].mxu1 %v5814_v63 }
 0x593   : > { %7735 = vmatprep.mubr.bf16.mxu1 %v5815_v55 }
 0x59a   : > { %7736 = vmatmul.mubr.bf16.gmra.mrb[24].mxu1 %v5816_v48  ;;  %v6099_v48 = vld [vmem:[%s8865_s21 + $0xb0] sm:$0xff] }
 0x59b   : > { %7739 = vmatprep.mubr.bf16.mxu1 %v9627_v0 }
 0x5a2   : > { %7740 = vmatmul.mubr.bf16.gmra.mrb[28].mxu1 %v5818_v53  ;;  %v6100_v53 = vld [vmem:[%s8865_s21 + $0xb8] sm:$0xff] }
 0x63d   : > { %v7713_v54 = vpop.f32.mrb[0].mxu1 }
 0x63e   : > { %v6111_v30 = vadd.f32 %v7713_v54, %v6079_v34  ;;  %v5918_v12 = vpop.f32.mrb[1].mxu1  ;;  %v6098_v54 = vld [vmem:[%s8865_s21 + $0xa8] sm:$0xff] }
 0x63f   : > { %v6109_v59 = vadd.f32 %v6077_v25, %v5918_v12  ;;  %v7714_v9 = vpop.f32.mrb[2].mxu1 }
 0x640   : > { %6143 = vst [vmem:[%s9660_s9 + $0x10] sm:$0xff] %v6111_v30  ;;  %v6112_v0 = vadd.f32 %v7714_v9, %v6080_v52  ;;  %v5921_v15 = vpop.f32.mrb[3].mxu1  ;;  %v6103_v9 = vld [vmem:[%s8865_s21 + $0xd0] sm:$0xff] }
 0x641   : > { %6141 = vst [vmem:[%s9660_s9] sm:$0xff] %v6109_v59  ;;  %v6110_v28 = vadd.f32 %v6078_v41, %v5921_v15 }
 0x642   : > { %6144 = vst [vmem:[%s9660_s9 + $0x18] sm:$0xff] %v6112_v0  ;;  %v6101_v0 = vld [vmem:[%s8865_s21 + $0xc0] sm:$0xff] }
 0x643   : > { %6142 = vst [vmem:[%s9660_s9 + $0x8] sm:$0xff] %v6110_v28  ;;  %v6104_v28 = vld [vmem:[%s8865_s21 + $0xd8] sm:$0xff] }
 0x645   : > { %v7717_v32 = vpop.f32.mrb[4].mxu1 }
 0x646   : > { %v6115_v23 = vadd.f32 %v7717_v32, %v6083_v6  ;;  %v5934_v40 = vpop.f32.mrb[5].mxu1  ;;  %v6102_v32 = vld [vmem:[%s8865_s21 + $0xc8] sm:$0xff] }
 0x647   : > { %v6113_v35 = vadd.f32 %v6081_v11, %v5934_v40  ;;  %v7718_v26 = vpop.f32.mrb[6].mxu1 }
 0x648   : > { %6147 = vst [vmem:[%s9660_s9 + $0x30] sm:$0xff] %v6115_v23  ;;  %v6116_v61 = vadd.f32 %v7718_v26, %v6084_v38  ;;  %v5937_v19 = vpop.f32.mrb[7].mxu1  ;;  %v6107_v26 = vld [vmem:[%s8865_s21 + $0xf0] sm:$0xff] }
 0x649   : > { %6145 = vst [vmem:[%s9660_s9 + $0x20] sm:$0xff] %v6113_v35  ;;  %v6114_v20 = vadd.f32 %v6082_v22, %v5937_v19 }
 0x64a   : > { %6148 = vst [vmem:[%s9660_s9 + $0x38] sm:$0xff] %v6116_v61  ;;  %v6105_v61 = vld [vmem:[%s8865_s21 + $0xe0] sm:$0xff] }
 0x64b   : > { %6146 = vst [vmem:[%s9660_s9 + $0x28] sm:$0xff] %v6114_v20  ;;  %v6108_v20 = vld [vmem:[%s8865_s21 + $0xf8] sm:$0xff] }
 0x64d   : > { %v7721_v50 = vpop.f32.mrb[8].mxu1 }
 0x64e   : > { %v6119_v60 = vadd.f32 %v7721_v50, %v6087_v42  ;;  %v5950_v1 = vpop.f32.mrb[9].mxu1  ;;  %v6106_v50 = vld [vmem:[%s8865_s21 + $0xe8] sm:$0xff]  ;;  %s8563_s21 = scalar_lea.vmem %s9726_s20, 4096 }
 0x64f   : > { %v6117_v45 = vadd.f32 %v6085_v43, %v5950_v1  ;;  %v7722_v17 = vpop.f32.mrb[10].mxu1  ;;  %p8564_p11 = scmp.ne.s32.totalorder %s9726_s20, %s8563_s21  ;;  %p8571_p9 = scmp.lt.s32.totalorder %s8569_s12, %s8563_s21 }
 0x650   : > { %6151 = vst [vmem:[%s9660_s9 + $0x50] sm:$0xff] %v6119_v60  ;;  %v6120_v62 = vadd.f32 %v7722_v17, %v6088_v58  ;;  %v5953_v36 = vpop.f32.mrb[11].mxu1 }
 0x651   : > { %6149 = vst [vmem:[%s9660_s9 + $0x40] sm:$0xff] %v6117_v45  ;;  %v6118_v3 = vadd.f32 %v6086_v16, %v5953_v36  ;;  %p8565_p1 = pnand %p8564_p11, %p9794_p0  ;;  %p8572_p12 = por %p8571_p9, %p8570_p7 }
 0x652   : > { %6152 = vst [vmem:[%s9660_s9 + $0x58] sm:$0xff] %v6120_v62 }
 0x653   : > { %6150 = vst [vmem:[%s9660_s9 + $0x48] sm:$0xff] %v6118_v3  ;;  %p8566_p3 = pneg %p8565_p1 }
 0x655   : > { %v7725_v37 = vpop.f32.mrb[12].mxu1  ;;  %p8573_p2 = pnand %p8572_p12, %p8566_p3 }
 0x656   : > { %v6123_v44 = vadd.f32 %v7725_v37, %v6091_v4  ;;  %v5966_v24 = vpop.f32.mrb[13].mxu1 }
 0x657   : > { %v6121_v7 = vadd.f32 %v6089_v39, %v5966_v24  ;;  %v7726_v14 = vpop.f32.mrb[14].mxu1 }
 0x658   : > { %6155 = vst [vmem:[%s9660_s9 + $0x70] sm:$0xff] %v6123_v44  ;;  %v6124_v5 = vadd.f32 %v7726_v14, %v6092_v13  ;;  %v5969_v21 = vpop.f32.mrb[15].mxu1 }
 0x659   : > { %6153 = vst [vmem:[%s9660_s9 + $0x60] sm:$0xff] %v6121_v7  ;;  %v6122_v56 = vadd.f32 %v6090_v10, %v5969_v21 }
 0x65a   : > { %6156 = vst [vmem:[%s9660_s9 + $0x78] sm:$0xff] %v6124_v5 }
 0x65b   : > { %6154 = vst [vmem:[%s9660_s9 + $0x68] sm:$0xff] %v6122_v56 }
 0x65d   : > { %v7729_v27 = vpop.f32.mrb[16].mxu1 }
 0x65e   : > { %v6127_v51 = vadd.f32 %v7729_v27, %v6095_v47  ;;  %v5982_v29 = vpop.f32.mrb[17].mxu1 }
 0x65f   : > { %v6125_v57 = vadd.f32 %v6093_v18, %v5982_v29  ;;  %v7730_v63 = vpop.f32.mrb[18].mxu1 }
 0x660   : > { %6159 = vst [vmem:[%s9660_s9 + $0x90] sm:$0xff] %v6127_v51  ;;  %v6128_v55 = vadd.f32 %v7730_v63, %v6096_v31  ;;  %v5985_v46 = vpop.f32.mrb[19].mxu1 }
 0x661   : > { %6157 = vst [vmem:[%s9660_s9 + $0x80] sm:$0xff] %v6125_v57  ;;  %v6126_v49 = vadd.f32 %v6094_v33, %v5985_v46 }
 0x662   : > { %6160 = vst [vmem:[%s9660_s9 + $0x98] sm:$0xff] %v6128_v55 }
 0x663   : > { %6158 = vst [vmem:[%s9660_s9 + $0x88] sm:$0xff] %v6126_v49 }
 0x665   : > { %v7733_v2 = vpop.f32.mrb[20].mxu1 }
 0x666   : > { %v6131_v34 = vadd.f32 %v7733_v2, %v6099_v48  ;;  %v5998_v25 = vpop.f32.mrb[21].mxu1 }
 0x667   : > { %v6129_v52 = vadd.f32 %v6097_v8, %v5998_v25  ;;  %v7734_v30 = vpop.f32.mrb[22].mxu1 }
 0x668   : > { %6163 = vst [vmem:[%s9660_s9 + $0xb0] sm:$0xff] %v6131_v34  ;;  %v6132_v12 = vadd.f32 %v7734_v30, %v6100_v53  ;;  %v6001_v41 = vpop.f32.mrb[23].mxu1 }
 0x669   : > { %6161 = vst [vmem:[%s9660_s9 + $0xa0] sm:$0xff] %v6129_v52  ;;  %v6130_v59 = vadd.f32 %v6098_v54, %v6001_v41 }
 0x66a   : > { %6164 = vst [vmem:[%s9660_s9 + $0xb8] sm:$0xff] %v6132_v12 }
 0x66b   : > { %6162 = vst [vmem:[%s9660_s9 + $0xa8] sm:$0xff] %v6130_v59 }
 0x66d   : > { %v7737_v15 = vpop.f32.mrb[24].mxu1 }
 0x66e   : > { %v6135_v6 = vadd.f32 %v7737_v15, %v6103_v9  ;;  %v6014_v11 = vpop.f32.mrb[25].mxu1 }
 0x66f   : > { %v6133_v38 = vadd.f32 %v6101_v0, %v6014_v11  ;;  %v7738_v23 = vpop.f32.mrb[26].mxu1 }
 0x670   : > { %6167 = vst [vmem:[%s9660_s9 + $0xd0] sm:$0xff] %v6135_v6  ;;  %v6136_v40 = vadd.f32 %v7738_v23, %v6104_v28  ;;  %v6017_v22 = vpop.f32.mrb[27].mxu1 }
 0x671   : > { %6165 = vst [vmem:[%s9660_s9 + $0xc0] sm:$0xff] %v6133_v38  ;;  %v6134_v35 = vadd.f32 %v6102_v32, %v6017_v22 }
 0x672   : > { %6168 = vst [vmem:[%s9660_s9 + $0xd8] sm:$0xff] %v6136_v40 }
 0x673   : > { %6166 = vst [vmem:[%s9660_s9 + $0xc8] sm:$0xff] %v6134_v35 }
 0x675   : > { %v7741_v19 = vpop.f32.mrb[28].mxu1 }
 0x676   : > { %v6139_v42 = vadd.f32 %v7741_v19, %v6107_v26  ;;  %v6030_v43 = vpop.f32.mrb[29].mxu1 }
 0x677   : > { %v6137_v58 = vadd.f32 %v6105_v61, %v6030_v43  ;;  %v7742_v60 = vpop.f32.mrb[30].mxu1 }
 0x678   : > { %6171 = vst [vmem:[%s9660_s9 + $0xf0] sm:$0xff] %v6139_v42  ;;  %v6140_v1 = vadd.f32 %v7742_v60, %v6108_v20  ;;  %v6033_v16 = vpop.f32.mrb[31].mxu1 }
 0x679   : > { %6169 = vst [vmem:[%s9660_s9 + $0xe0] sm:$0xff] %v6137_v58  ;;  %v6138_v45 = vadd.f32 %v6106_v50, %v6033_v16 }
 0x67a   : > { %6172 = vst [vmem:[%s9660_s9 + $0xf8] sm:$0xff] %v6140_v1 }
 0x67b   : > { %6170 = vst [vmem:[%s9660_s9 + $0xe8] sm:$0xff] %v6138_v45 }
 0x67c   : > { %8576 = shalt.err (!%p8573_p2)
}
 0x67d   : > { %s8577_s14 = scalar_lea.hbm %s9724_s10, 4096  ;;  %s8581_s9 = scalar_lea.hbm %s9780_s7, 8192 }
 0x67e   : > { %p8578_p13 = scmp.ne.s32.totalorder %s9724_s10, %s8577_s14  ;;  %p8582_p4 = scmp.lt.u32.totalorder %s9724_s10, %s9780_s7 }
 0x67f   : > { %p8583_p5 = scmp.lt.u32.totalorder %s8581_s9, %s8577_s14  ;;  %p8585_p11 = scmp.lt.u32.totalorder %s8577_s14, %s9724_s10 }
 0x680   : > { %p8579_p6 = pnand %p8578_p13, %p9794_p0 }
 0x681   : > { %p8584_p8 = por %p8583_p5, %p8582_p4 }
 0x682   : > { %p8580_p10 = pneg %p8579_p6 }
 0x683   : > { %p8586_p1 = por %p8585_p11, %p8584_p8 }
 0x685   : > { %p8587_p3 = pnand %p8586_p1, %p8580_p10 }
 0x687   : > { %8590 = shalt.err (!%p8587_p3)
}
 0x688   : > { %s8645_s22 = smov 128   ;;  %s8646_s21 = smov 8  }
 0x689   : > { %8265 = dma.vmem_to_hbm [thread:$0]  (%p9794_p0), %s9726_s20, 4096, %s9724_s10, %s6174_s28, %s8645_s22, %s8645_s22, %s8646_s21  }
 0x68a PF: > { %s6202_s15 = sand.u32 1, %s8621_s24   ;;  %p9795_p7 = scmp.ne.s32.totalorder %s9785_s8, 0 }
 0x68b   : > { %p9796_p9 = scmp.ge.s32.totalorder %s8633_s27, 2  ;;  %s6203_s19 = scalar_lea.sflag [#allocation5], %s6202_s15 }
 0x68d   : > { %p8279_p12 = pnand %p9796_p9, %p9795_p7 }
 0x68f   : > { %8616 = dma.done.wait (!%p8279_p12), %s6203_s19, 4096  }
 0x690   : > { %8618 = vsyncadd (!%p8279_p12), %s6203_s19, 4294963200  ;;  %p21_p2 = scmp.ge.s32.totalorder %s8797_s13, 4   ;;  %s9797_s24 = smov %s8625_s25 }
 0x691   : > { %s9798_s25 = smov %s8629_s26  ;;  %s9799_s26 = smov %s8813_s17 }
 0x692   : > { %s9800_s27 = smov %s8797_s13  ;;  %23 = sbr.rel (!%p21_p2) target bundleno = 6 (0x6), region = 119 }
 0x699   :  { %6208 = vsyncpa [#allocation4], 1 }
 0x69a   :  { %6210 = vsyncpa [#allocation4 + $0x1], 1 }
 0x69b   :  { %6211 = vsyncpa [#allocation7], 1 }
 0x69c   :  { %6212 = vsyncpa [#allocation5], 1 }
 0x69d   :  { %6214 = vsyncpa [#allocation5 + $0x1], 1 }

</bundles_post_ra>
